<compile_context>
chip_gen: v7x
topology: tpu7x:2x2x1
jax: 0.10.0
libtpu: 0.0.40
codegen_flags: <defaults>
</compile_context>

<pallas_src>
import jax
import jax.numpy as jnp
from jax import lax
from jax.experimental import pallas as pl
from jax.experimental.pallas import tpu as pltpu


# --------------------------------------------------------------------------- #
# Shared kernel body
# --------------------------------------------------------------------------- #
def _fused_convs(load_tap_views, Cin, W, w1_ref, b1_ref, w2_ref, b2_ref, o_ref):
    """conv(3,1)+bias+ReLU -> conv(1,3)+bias+ReLU on one (rows, W) tile.

    ci-outer / co-inner with Ctag persistent accumulator planes (bounded live
    set), accumulators seeded with the bias splat.  Weights are SMEM scalars
    splat onto (rows, W) planes (VPU broadcast-FMA).
    """
    Ctag, rows, Wo = o_ref.shape[1], o_ref.shape[2], o_ref.shape[3]

    # ---- Conv2d(Cin -> Ctag, kernel (3,1)) + bias + ReLU --------------------
    acc = [jnp.full((rows, W), b1_ref[co], jnp.float32) for co in range(Ctag)]
    for ci in range(Cin):
        s0, s1, s2 = load_tap_views(ci)        # three (rows, W) H-tap views
        for co in range(Ctag):
            k = (co * Cin + ci) * 3
            acc[co] = (acc[co] + w1_ref[k] * s0
                       + w1_ref[k + 1] * s1 + w1_ref[k + 2] * s2)
    y1 = [jnp.maximum(a, 0.0) for a in acc]    # Dropout(p=0) == identity

    # ---- Conv2d(Ctag -> Ctag, kernel (1,3)) + bias + ReLU -------------------
    lane_aligned = (W % 128 == 0)
    acc_w = W if lane_aligned else Wo
    acc = [jnp.full((rows, acc_w), b2_ref[co], jnp.float32) for co in range(Ctag)]
    for ci in range(Ctag):
        y = y1[ci]
        if lane_aligned:
            # Zero-copy lane rotations (XLU); wrapped columns land beyond Wo
            # and are never stored.
            t0 = y
            t1 = pltpu.roll(y, W - 1, axis=1)  # t1[:, c] = y[:, c + 1]
            t2 = pltpu.roll(y, W - 2, axis=1)  # t2[:, c] = y[:, c + 2]
        else:
            # Small / unaligned W: all taps sit in one lane-tile; plain slices.
            t0, t1, t2 = y[:, 0:Wo], y[:, 1:1 + Wo], y[:, 2:2 + Wo]
        for co in range(Ctag):
            k = (co * Ctag + ci) * 3
            acc[co] = (acc[co] + w2_ref[k] * t0
                       + w2_ref[k + 1] * t1 + w2_ref[k + 2] * t2)

    for co in range(Ctag):
        res = jnp.maximum(acc[co], 0.0)        # Dropout(p=0) == identity
        o_ref[0, co] = res[:, :Wo].astype(o_ref.dtype)


# --------------------------------------------------------------------------- #
# Kernel bodies (two entry points sharing _fused_convs)
# --------------------------------------------------------------------------- #
def aux_conv_kernel_full(x_ref, w1_ref, b1_ref, w2_ref, b2_ref, o_ref):
    # x_ref: (1, Cin, H, W) whole image for one batch element
    # o_ref: (1, Ctag, H-2, W-2)
    Cin, W = x_ref.shape[1], x_ref.shape[3]
    Ho = o_ref.shape[2]

    def tap_views(ci):
        # Three H-shifted (Ho, W) views, loaded per-plane straight from the ref.
        return (x_ref[0, ci, 0:Ho, :].astype(jnp.float32),
                x_ref[0, ci, 1:1 + Ho, :].astype(jnp.float32),
                x_ref[0, ci, 2:2 + Ho, :].astype(jnp.float32))

    _fused_convs(tap_views, Cin, W, w1_ref, b1_ref, w2_ref, b2_ref, o_ref)


def aux_conv_kernel_htile(xm_ref, xh_ref, w1_ref, b1_ref, w2_ref, b2_ref,
                          o_ref, win_ref):
    # xm_ref : (1, Cin, TH, W)   rows [h*TH, h*TH+TH) of the image
    # xh_ref : (1, Cin, 8,  W)   rows starting at h*TH+TH; first 2 = halo
    # win_ref: (Cin, TH+2, W)    f32 scratch: stitched input window per tile
    # o_ref  : (1, Ctag, TH, Wo)
    Cin, TH, W = xm_ref.shape[1], xm_ref.shape[2], xm_ref.shape[3]

    # Stitch main rows + 2 halo rows once per input channel (cheap VMEM copies);
    # all tap views below are then plain static slices of the window.
    for ci in range(Cin):
        win_ref[ci, 0:TH, :] = xm_ref[0, ci].astype(jnp.float32)
        win_ref[ci, TH:TH + 2, :] = xh_ref[0, ci, 0:2, :].astype(jnp.float32)

    def tap_views(ci):
        return (win_ref[ci, 0:TH, :],
                win_ref[ci, 1:1 + TH, :],
                win_ref[ci, 2:2 + TH, :])

    _fused_convs(tap_views, Cin, W, w1_ref, b1_ref, w2_ref, b2_ref, o_ref)


# --------------------------------------------------------------------------- #
# Wrapper
# --------------------------------------------------------------------------- #
def _vmem_limit_bytes():
    """~3/4 of physical VMEM: 48 MiB on v7x (64 MiB phys), 96 MiB on v5e/v6e."""
    default_cap = 64 * 1024 * 1024
    try:
        cap = int(getattr(pltpu.get_tpu_info(), "vmem_capacity_bytes",
                          default_cap))
    except Exception:
        cap = default_cap
    return int(min(cap * 3 // 4, 96 * 1024 * 1024))


def _pick_h_tile(N, Ho, W, Cin, Ctag, vmem_budget):
    """Output rows per grid step, or None => whole image per step.

    Tiles must be multiples of 8 sublanes and divide Ho exactly (the 2-row halo
    is fetched as the leading rows of the next 8-row-aligned block).  Picks the
    largest tile that fits the VMEM budget, then shrinks until the grid has
    >= 4 parallel steps (v7x megacore + software pipelining).
    """
    if Ho % 8 != 0 or Ho <= 8:
        return None
    # rough per-output-row f32 working set (accs, y1, taps, window, 2x buffers)
    per_row = ((2 * Ctag + 3 + 2 * Cin) * W + 4 * (Cin * W + Ctag * (W - 2))) * 4
    divisors = [t for t in range(8, Ho + 1, 8) if Ho % t == 0]
    fitting = [t for t in divisors if (t + 2) * per_row <= vmem_budget] or [8]
    th = fitting[-1]
    while N * (Ho // th) < 4:
        smaller = [t for t in fitting if t < th]
        if not smaller:
            break
        th = smaller[-1]
    return None if th >= Ho else th


def aux_conv(x, w1_t, b1, w2_t, b2, *, h_tile=None):
    """x: (N, Cin, H, W) NCHW.  Weights in PyTorch layout:
       w1_t: (Ctag, Cin, 3, 1), w2_t: (Ctag, Ctag, 1, 3).  Returns NCHW."""
    N, Cin, H, W = x.shape
    Ctag = int(w1_t.shape[0])
    assert w1_t.shape == (Ctag, Cin, 3, 1) and w2_t.shape == (Ctag, Ctag, 1, 3)
    assert H >= 3 and W >= 3
    Ho, Wo = H - 2, W - 2

    vmem_limit = _vmem_limit_bytes()

    # Free reshapes only: flatten torch (O, I, kh, kw) weights row-major so the
    # kernel indexes (co * Cin_or_Ctag + ci) * 3 + k.
    w1_flat = jnp.asarray(w1_t, jnp.float32).reshape(-1)   # (Ctag*Cin*3,)
    w2_flat = jnp.asarray(w2_t, jnp.float32).reshape(-1)   # (Ctag*Ctag*3,)
    b1f = jnp.asarray(b1, jnp.float32)
    b2f = jnp.asarray(b2, jnp.float32)

    smem = pl.BlockSpec(memory_space=pltpu.MemorySpace.SMEM)
    out_shape = jax.ShapeDtypeStruct((N, Ctag, Ho, Wo), x.dtype)

    if h_tile is None:
        h_tile = _pick_h_tile(N, Ho, W, Cin, Ctag, (vmem_limit * 3) // 5)

    if h_tile is not None:
        assert Ho % h_tile == 0 and h_tile % 8 == 0, (Ho, h_tile)
        NH = Ho // h_tile
        HB = h_tile // 8   # halo block (8 rows) index stride per output tile

        grid_spec = pltpu.PrefetchScalarGridSpec(
            num_scalar_prefetch=0,
            grid=(N, NH),
            in_specs=[
                # main TH rows of the tile
                pl.BlockSpec((1, Cin, h_tile, W), lambda n, h: (n, 0, h, 0)),
                # 8-row-aligned block right after the tile; first 2 rows = halo
                pl.BlockSpec((1, Cin, 8, W),
                             lambda n, h: (n, 0, (h + 1) * HB, 0)),
                smem, smem, smem, smem,
            ],
            out_specs=pl.BlockSpec((1, Ctag, h_tile, Wo),
                                   lambda n, h: (n, 0, h, 0)),
            scratch_shapes=[pltpu.VMEM((Cin, h_tile + 2, W), jnp.float32)],
        )
        return pl.pallas_call(
            aux_conv_kernel_htile,
            out_shape=out_shape,
            grid_spec=grid_spec,
            compiler_params=pltpu.CompilerParams(
                dimension_semantics=("parallel", "parallel"),
                vmem_limit_bytes=vmem_limit),
        )(x, x, w1_flat, b1f, w2_flat, b2f)

    # Fallback: whole image per grid step (small images / Ho not multiple of 8).
    grid_spec = pltpu.PrefetchScalarGridSpec(
        num_scalar_prefetch=0,
        grid=(N,),
        in_specs=[pl.BlockSpec((1, Cin, H, W), lambda n: (n, 0, 0, 0)),
                  smem, smem, smem, smem],
        out_specs=pl.BlockSpec((1, Ctag, Ho, Wo), lambda n: (n, 0, 0, 0)),
    )
    return pl.pallas_call(
        aux_conv_kernel_full,
        out_shape=out_shape,
        grid_spec=grid_spec,
        compiler_params=pltpu.CompilerParams(
            dimension_semantics=("parallel",),
            vmem_limit_bytes=vmem_limit),
    )(x, w1_flat, b1f, w2_flat, b2f)


# --------------------------------------------------------------------------- #
# Pure-JAX reference mirroring the PyTorch module (eval mode, p=0)
# --------------------------------------------------------------------------- #
def aux_conv_reference(x_nchw, w1_t, b1, w2_t, b2):
    dn = ("NCHW", "OIHW", "NCHW")
    y = lax.conv_general_dilated(x_nchw, w1_t, (1, 1), "VALID",
                                 dimension_numbers=dn)
    y = jnp.maximum(y + b1[None, :, None, None], 0.0)
    y = lax.conv_general_dilated(y, w2_t, (1, 1), "VALID",
                                 dimension_numbers=dn)
    y = jnp.maximum(y + b2[None, :, None, None], 0.0)
    return y


if __name__ == "__main__":
    key = jax.random.PRNGKey(0)
    kx1, kx2, kw1, kb1, kw2, kb2 = jax.random.split(key, 6)

    Cin, Ctag = 4, 8
    # PyTorch Conv2d weight layouts: (out, in, kh, kw)
    w1 = jax.random.normal(kw1, (Ctag, Cin, 3, 1), jnp.float32) * 0.1
    b1 = jax.random.normal(kb1, (Ctag,), jnp.float32) * 0.1
    w2 = jax.random.normal(kw2, (Ctag, Ctag, 1, 3), jnp.float32) * 0.1
    b2 = jax.random.normal(kb2, (Ctag,), jnp.float32) * 0.1

    # 1) small image -> whole-image-per-step path, grid = (N,)
    x_small = jax.random.normal(kx1, (2, Cin, 16, 16), jnp.float32)
    out = jax.block_until_ready(aux_conv(x_small, w1, b1, w2, b2))
    ref = aux_conv_reference(x_small, w1, b1, w2, b2)
    assert out.shape == (2, Ctag, 14, 14), out.shape
    assert jnp.allclose(out, ref, atol=1e-4, rtol=1e-4), \
        float(jnp.max(jnp.abs(out - ref)))

    # 2) Ho = 16 -> H-tiled + 2-row-halo path, grid = (N, 2) = 4 parallel steps
    x_tiled = jax.random.normal(kx2, (2, Cin, 18, 16), jnp.float32)
    out = jax.block_until_ready(aux_conv(x_tiled, w1, b1, w2, b2))
    ref = aux_conv_reference(x_tiled, w1, b1, w2, b2)
    assert out.shape == (2, Ctag, 16, 14), out.shape
    assert jnp.allclose(out, ref, atol=1e-4, rtol=1e-4), \
        float(jnp.max(jnp.abs(out - ref)))

    print("KERNEL_OK")
</pallas_src>

<mosaic_0001>
module attributes {stable_mosaic.version = 11 : i64} {
  func.func @aux_conv_kernel_full(%arg0: i32, %arg1: memref<1x4x16x16xf32, #tpu.memory_space<vmem>>, %arg2: memref<96xf32, #tpu.memory_space<smem>>, %arg3: memref<8xf32, #tpu.memory_space<smem>>, %arg4: memref<192xf32, #tpu.memory_space<smem>>, %arg5: memref<8xf32, #tpu.memory_space<smem>>, %arg6: memref<1x8x14x14xf32, #tpu.memory_space<vmem>>) attributes {dimension_semantics = [#tpu.dimension_semantics<parallel>], iteration_bounds = array<i64: 2>, scalar_prefetch = 0 : i64, scratch_operands = 0 : i64, tpu.core_type = #tpu.core_type<tc>, window_params = [{transform_indices = @transform_0, window_bounds = array<i64: 1, 4, 16, 16>}, {transform_indices = @transform_1, window_bounds = array<i64: 96>}, {transform_indices = @transform_2, window_bounds = array<i64: 8>}, {transform_indices = @transform_3, window_bounds = array<i64: 192>}, {transform_indices = @transform_4, window_bounds = array<i64: 8>}, {transform_indices = @transform_5, window_bounds = array<i64: 1, 8, 14, 14>}]} {
    %c0 = arith.constant 0 : index
    %0 = memref.load %arg3[%c0] : memref<8xf32, #tpu.memory_space<smem>>
    %1 = vector.broadcast %0 : f32 to vector<14x16xf32>
    %c1 = arith.constant 1 : index
    %2 = memref.load %arg3[%c1] : memref<8xf32, #tpu.memory_space<smem>>
    %3 = vector.broadcast %2 : f32 to vector<14x16xf32>
    %c2 = arith.constant 2 : index
    %4 = memref.load %arg3[%c2] : memref<8xf32, #tpu.memory_space<smem>>
    %5 = vector.broadcast %4 : f32 to vector<14x16xf32>
    %c3 = arith.constant 3 : index
    %6 = memref.load %arg3[%c3] : memref<8xf32, #tpu.memory_space<smem>>
    %7 = vector.broadcast %6 : f32 to vector<14x16xf32>
    %c4 = arith.constant 4 : index
    %8 = memref.load %arg3[%c4] : memref<8xf32, #tpu.memory_space<smem>>
    %9 = vector.broadcast %8 : f32 to vector<14x16xf32>
    %c5 = arith.constant 5 : index
    %10 = memref.load %arg3[%c5] : memref<8xf32, #tpu.memory_space<smem>>
    %11 = vector.broadcast %10 : f32 to vector<14x16xf32>
    %c6 = arith.constant 6 : index
    %12 = memref.load %arg3[%c6] : memref<8xf32, #tpu.memory_space<smem>>
    %13 = vector.broadcast %12 : f32 to vector<14x16xf32>
    %c7 = arith.constant 7 : index
    %14 = memref.load %arg3[%c7] : memref<8xf32, #tpu.memory_space<smem>>
    %15 = vector.broadcast %14 : f32 to vector<14x16xf32>
    %c0_0 = arith.constant 0 : index
    %c0_1 = arith.constant 0 : index
    %c0_2 = arith.constant 0 : index
    %c0_3 = arith.constant 0 : index
    %16 = vector.load %arg1[%c0_0, %c0_1, %c0_2, %c0_3] : memref<1x4x16x16xf32, #tpu.memory_space<vmem>>, vector<1x1x14x16xf32>
    %17 = vector.shape_cast %16 : vector<1x1x14x16xf32> to vector<14x16xf32>
    %c0_4 = arith.constant 0 : index
    %c0_5 = arith.constant 0 : index
    %c1_6 = arith.constant 1 : index
    %c0_7 = arith.constant 0 : index
    %18 = vector.load %arg1[%c0_4, %c0_5, %c1_6, %c0_7] : memref<1x4x16x16xf32, #tpu.memory_space<vmem>>, vector<1x1x14x16xf32>
    %19 = vector.shape_cast %18 : vector<1x1x14x16xf32> to vector<14x16xf32>
    %c0_8 = arith.constant 0 : index
    %c0_9 = arith.constant 0 : index
    %c2_10 = arith.constant 2 : index
    %c0_11 = arith.constant 0 : index
    %20 = vector.load %arg1[%c0_8, %c0_9, %c2_10, %c0_11] : memref<1x4x16x16xf32, #tpu.memory_space<vmem>>, vector<1x1x14x16xf32>
    %21 = vector.shape_cast %20 : vector<1x1x14x16xf32> to vector<14x16xf32>
    %c0_12 = arith.constant 0 : index
    %22 = memref.load %arg2[%c0_12] : memref<96xf32, #tpu.memory_space<smem>>
    %23 = vector.broadcast %22 : f32 to vector<14x16xf32>
    %24 = arith.mulf %23, %17 : vector<14x16xf32>
    %25 = arith.addf %1, %24 : vector<14x16xf32>
    %c1_13 = arith.constant 1 : index
    %26 = memref.load %arg2[%c1_13] : memref<96xf32, #tpu.memory_space<smem>>
    %27 = vector.broadcast %26 : f32 to vector<14x16xf32>
    %28 = arith.mulf %27, %19 : vector<14x16xf32>
    %29 = arith.addf %25, %28 : vector<14x16xf32>
    %c2_14 = arith.constant 2 : index
    %30 = memref.load %arg2[%c2_14] : memref<96xf32, #tpu.memory_space<smem>>
    %31 = vector.broadcast %30 : f32 to vector<14x16xf32>
    %32 = arith.mulf %31, %21 : vector<14x16xf32>
    %33 = arith.addf %29, %32 : vector<14x16xf32>
    %c12 = arith.constant 12 : index
    %34 = memref.load %arg2[%c12] : memref<96xf32, #tpu.memory_space<smem>>
    %35 = vector.broadcast %34 : f32 to vector<14x16xf32>
    %36 = arith.mulf %35, %17 : vector<14x16xf32>
    %37 = arith.addf %3, %36 : vector<14x16xf32>
    %c13 = arith.constant 13 : index
    %38 = memref.load %arg2[%c13] : memref<96xf32, #tpu.memory_space<smem>>
    %39 = vector.broadcast %38 : f32 to vector<14x16xf32>
    %40 = arith.mulf %39, %19 : vector<14x16xf32>
    %41 = arith.addf %37, %40 : vector<14x16xf32>
    %c14 = arith.constant 14 : index
    %42 = memref.load %arg2[%c14] : memref<96xf32, #tpu.memory_space<smem>>
    %43 = vector.broadcast %42 : f32 to vector<14x16xf32>
    %44 = arith.mulf %43, %21 : vector<14x16xf32>
    %45 = arith.addf %41, %44 : vector<14x16xf32>
    %c24 = arith.constant 24 : index
    %46 = memref.load %arg2[%c24] : memref<96xf32, #tpu.memory_space<smem>>
    %47 = vector.broadcast %46 : f32 to vector<14x16xf32>
    %48 = arith.mulf %47, %17 : vector<14x16xf32>
    %49 = arith.addf %5, %48 : vector<14x16xf32>
    %c25 = arith.constant 25 : index
    %50 = memref.load %arg2[%c25] : memref<96xf32, #tpu.memory_space<smem>>
    %51 = vector.broadcast %50 : f32 to vector<14x16xf32>
    %52 = arith.mulf %51, %19 : vector<14x16xf32>
    %53 = arith.addf %49, %52 : vector<14x16xf32>
    %c26 = arith.constant 26 : index
    %54 = memref.load %arg2[%c26] : memref<96xf32, #tpu.memory_space<smem>>
    %55 = vector.broadcast %54 : f32 to vector<14x16xf32>
    %56 = arith.mulf %55, %21 : vector<14x16xf32>
    %57 = arith.addf %53, %56 : vector<14x16xf32>
    %c36 = arith.constant 36 : index
    %58 = memref.load %arg2[%c36] : memref<96xf32, #tpu.memory_space<smem>>
    %59 = vector.broadcast %58 : f32 to vector<14x16xf32>
    %60 = arith.mulf %59, %17 : vector<14x16xf32>
    %61 = arith.addf %7, %60 : vector<14x16xf32>
    %c37 = arith.constant 37 : index
    %62 = memref.load %arg2[%c37] : memref<96xf32, #tpu.memory_space<smem>>
    %63 = vector.broadcast %62 : f32 to vector<14x16xf32>
    %64 = arith.mulf %63, %19 : vector<14x16xf32>
    %65 = arith.addf %61, %64 : vector<14x16xf32>
    %c38 = arith.constant 38 : index
    %66 = memref.load %arg2[%c38] : memref<96xf32, #tpu.memory_space<smem>>
    %67 = vector.broadcast %66 : f32 to vector<14x16xf32>
    %68 = arith.mulf %67, %21 : vector<14x16xf32>
    %69 = arith.addf %65, %68 : vector<14x16xf32>
    %c48 = arith.constant 48 : index
    %70 = memref.load %arg2[%c48] : memref<96xf32, #tpu.memory_space<smem>>
    %71 = vector.broadcast %70 : f32 to vector<14x16xf32>
    %72 = arith.mulf %71, %17 : vector<14x16xf32>
    %73 = arith.addf %9, %72 : vector<14x16xf32>
    %c49 = arith.constant 49 : index
    %74 = memref.load %arg2[%c49] : memref<96xf32, #tpu.memory_space<smem>>
    %75 = vector.broadcast %74 : f32 to vector<14x16xf32>
    %76 = arith.mulf %75, %19 : vector<14x16xf32>
    %77 = arith.addf %73, %76 : vector<14x16xf32>
    %c50 = arith.constant 50 : index
    %78 = memref.load %arg2[%c50] : memref<96xf32, #tpu.memory_space<smem>>
    %79 = vector.broadcast %78 : f32 to vector<14x16xf32>
    %80 = arith.mulf %79, %21 : vector<14x16xf32>
    %81 = arith.addf %77, %80 : vector<14x16xf32>
    %c60 = arith.constant 60 : index
    %82 = memref.load %arg2[%c60] : memref<96xf32, #tpu.memory_space<smem>>
    %83 = vector.broadcast %82 : f32 to vector<14x16xf32>
    %84 = arith.mulf %83, %17 : vector<14x16xf32>
    %85 = arith.addf %11, %84 : vector<14x16xf32>
    %c61 = arith.constant 61 : index
    %86 = memref.load %arg2[%c61] : memref<96xf32, #tpu.memory_space<smem>>
    %87 = vector.broadcast %86 : f32 to vector<14x16xf32>
    %88 = arith.mulf %87, %19 : vector<14x16xf32>
    %89 = arith.addf %85, %88 : vector<14x16xf32>
    %c62 = arith.constant 62 : index
    %90 = memref.load %arg2[%c62] : memref<96xf32, #tpu.memory_space<smem>>
    %91 = vector.broadcast %90 : f32 to vector<14x16xf32>
    %92 = arith.mulf %91, %21 : vector<14x16xf32>
    %93 = arith.addf %89, %92 : vector<14x16xf32>
    %c72 = arith.constant 72 : index
    %94 = memref.load %arg2[%c72] : memref<96xf32, #tpu.memory_space<smem>>
    %95 = vector.broadcast %94 : f32 to vector<14x16xf32>
    %96 = arith.mulf %95, %17 : vector<14x16xf32>
    %97 = arith.addf %13, %96 : vector<14x16xf32>
    %c73 = arith.constant 73 : index
    %98 = memref.load %arg2[%c73] : memref<96xf32, #tpu.memory_space<smem>>
    %99 = vector.broadcast %98 : f32 to vector<14x16xf32>
    %100 = arith.mulf %99, %19 : vector<14x16xf32>
    %101 = arith.addf %97, %100 : vector<14x16xf32>
    %c74 = arith.constant 74 : index
    %102 = memref.load %arg2[%c74] : memref<96xf32, #tpu.memory_space<smem>>
    %103 = vector.broadcast %102 : f32 to vector<14x16xf32>
    %104 = arith.mulf %103, %21 : vector<14x16xf32>
    %105 = arith.addf %101, %104 : vector<14x16xf32>
    %c84 = arith.constant 84 : index
    %106 = memref.load %arg2[%c84] : memref<96xf32, #tpu.memory_space<smem>>
    %107 = vector.broadcast %106 : f32 to vector<14x16xf32>
    %108 = arith.mulf %107, %17 : vector<14x16xf32>
    %109 = arith.addf %15, %108 : vector<14x16xf32>
    %c85 = arith.constant 85 : index
    %110 = memref.load %arg2[%c85] : memref<96xf32, #tpu.memory_space<smem>>
    %111 = vector.broadcast %110 : f32 to vector<14x16xf32>
    %112 = arith.mulf %111, %19 : vector<14x16xf32>
    %113 = arith.addf %109, %112 : vector<14x16xf32>
    %c86 = arith.constant 86 : index
    %114 = memref.load %arg2[%c86] : memref<96xf32, #tpu.memory_space<smem>>
    %115 = vector.broadcast %114 : f32 to vector<14x16xf32>
    %116 = arith.mulf %115, %21 : vector<14x16xf32>
    %117 = arith.addf %113, %116 : vector<14x16xf32>
    %c0_15 = arith.constant 0 : index
    %c1_16 = arith.constant 1 : index
    %c0_17 = arith.constant 0 : index
    %c0_18 = arith.constant 0 : index
    %118 = vector.load %arg1[%c0_15, %c1_16, %c0_17, %c0_18] : memref<1x4x16x16xf32, #tpu.memory_space<vmem>>, vector<1x1x14x16xf32>
    %119 = vector.shape_cast %118 : vector<1x1x14x16xf32> to vector<14x16xf32>
    %c0_19 = arith.constant 0 : index
    %c1_20 = arith.constant 1 : index
    %c1_21 = arith.constant 1 : index
    %c0_22 = arith.constant 0 : index
    %120 = vector.load %arg1[%c0_19, %c1_20, %c1_21, %c0_22] : memref<1x4x16x16xf32, #tpu.memory_space<vmem>>, vector<1x1x14x16xf32>
    %121 = vector.shape_cast %120 : vector<1x1x14x16xf32> to vector<14x16xf32>
    %c0_23 = arith.constant 0 : index
    %c1_24 = arith.constant 1 : index
    %c2_25 = arith.constant 2 : index
    %c0_26 = arith.constant 0 : index
    %122 = vector.load %arg1[%c0_23, %c1_24, %c2_25, %c0_26] : memref<1x4x16x16xf32, #tpu.memory_space<vmem>>, vector<1x1x14x16xf32>
    %123 = vector.shape_cast %122 : vector<1x1x14x16xf32> to vector<14x16xf32>
    %c3_27 = arith.constant 3 : index
    %124 = memref.load %arg2[%c3_27] : memref<96xf32, #tpu.memory_space<smem>>
    %125 = vector.broadcast %124 : f32 to vector<14x16xf32>
    %126 = arith.mulf %125, %119 : vector<14x16xf32>
    %127 = arith.addf %33, %126 : vector<14x16xf32>
    %c4_28 = arith.constant 4 : index
    %128 = memref.load %arg2[%c4_28] : memref<96xf32, #tpu.memory_space<smem>>
    %129 = vector.broadcast %128 : f32 to vector<14x16xf32>
    %130 = arith.mulf %129, %121 : vector<14x16xf32>
    %131 = arith.addf %127, %130 : vector<14x16xf32>
    %c5_29 = arith.constant 5 : index
    %132 = memref.load %arg2[%c5_29] : memref<96xf32, #tpu.memory_space<smem>>
    %133 = vector.broadcast %132 : f32 to vector<14x16xf32>
    %134 = arith.mulf %133, %123 : vector<14x16xf32>
    %135 = arith.addf %131, %134 : vector<14x16xf32>
    %c15 = arith.constant 15 : index
    %136 = memref.load %arg2[%c15] : memref<96xf32, #tpu.memory_space<smem>>
    %137 = vector.broadcast %136 : f32 to vector<14x16xf32>
    %138 = arith.mulf %137, %119 : vector<14x16xf32>
    %139 = arith.addf %45, %138 : vector<14x16xf32>
    %c16 = arith.constant 16 : index
    %140 = memref.load %arg2[%c16] : memref<96xf32, #tpu.memory_space<smem>>
    %141 = vector.broadcast %140 : f32 to vector<14x16xf32>
    %142 = arith.mulf %141, %121 : vector<14x16xf32>
    %143 = arith.addf %139, %142 : vector<14x16xf32>
    %c17 = arith.constant 17 : index
    %144 = memref.load %arg2[%c17] : memref<96xf32, #tpu.memory_space<smem>>
    %145 = vector.broadcast %144 : f32 to vector<14x16xf32>
    %146 = arith.mulf %145, %123 : vector<14x16xf32>
    %147 = arith.addf %143, %146 : vector<14x16xf32>
    %c27 = arith.constant 27 : index
    %148 = memref.load %arg2[%c27] : memref<96xf32, #tpu.memory_space<smem>>
    %149 = vector.broadcast %148 : f32 to vector<14x16xf32>
    %150 = arith.mulf %149, %119 : vector<14x16xf32>
    %151 = arith.addf %57, %150 : vector<14x16xf32>
    %c28 = arith.constant 28 : index
    %152 = memref.load %arg2[%c28] : memref<96xf32, #tpu.memory_space<smem>>
    %153 = vector.broadcast %152 : f32 to vector<14x16xf32>
    %154 = arith.mulf %153, %121 : vector<14x16xf32>
    %155 = arith.addf %151, %154 : vector<14x16xf32>
    %c29 = arith.constant 29 : index
    %156 = memref.load %arg2[%c29] : memref<96xf32, #tpu.memory_space<smem>>
    %157 = vector.broadcast %156 : f32 to vector<14x16xf32>
    %158 = arith.mulf %157, %123 : vector<14x16xf32>
    %159 = arith.addf %155, %158 : vector<14x16xf32>
    %c39 = arith.constant 39 : index
    %160 = memref.load %arg2[%c39] : memref<96xf32, #tpu.memory_space<smem>>
    %161 = vector.broadcast %160 : f32 to vector<14x16xf32>
    %162 = arith.mulf %161, %119 : vector<14x16xf32>
    %163 = arith.addf %69, %162 : vector<14x16xf32>
    %c40 = arith.constant 40 : index
    %164 = memref.load %arg2[%c40] : memref<96xf32, #tpu.memory_space<smem>>
    %165 = vector.broadcast %164 : f32 to vector<14x16xf32>
    %166 = arith.mulf %165, %121 : vector<14x16xf32>
    %167 = arith.addf %163, %166 : vector<14x16xf32>
    %c41 = arith.constant 41 : index
    %168 = memref.load %arg2[%c41] : memref<96xf32, #tpu.memory_space<smem>>
    %169 = vector.broadcast %168 : f32 to vector<14x16xf32>
    %170 = arith.mulf %169, %123 : vector<14x16xf32>
    %171 = arith.addf %167, %170 : vector<14x16xf32>
    %c51 = arith.constant 51 : index
    %172 = memref.load %arg2[%c51] : memref<96xf32, #tpu.memory_space<smem>>
    %173 = vector.broadcast %172 : f32 to vector<14x16xf32>
    %174 = arith.mulf %173, %119 : vector<14x16xf32>
    %175 = arith.addf %81, %174 : vector<14x16xf32>
    %c52 = arith.constant 52 : index
    %176 = memref.load %arg2[%c52] : memref<96xf32, #tpu.memory_space<smem>>
    %177 = vector.broadcast %176 : f32 to vector<14x16xf32>
    %178 = arith.mulf %177, %121 : vector<14x16xf32>
    %179 = arith.addf %175, %178 : vector<14x16xf32>
    %c53 = arith.constant 53 : index
    %180 = memref.load %arg2[%c53] : memref<96xf32, #tpu.memory_space<smem>>
    %181 = vector.broadcast %180 : f32 to vector<14x16xf32>
    %182 = arith.mulf %181, %123 : vector<14x16xf32>
    %183 = arith.addf %179, %182 : vector<14x16xf32>
    %c63 = arith.constant 63 : index
    %184 = memref.load %arg2[%c63] : memref<96xf32, #tpu.memory_space<smem>>
    %185 = vector.broadcast %184 : f32 to vector<14x16xf32>
    %186 = arith.mulf %185, %119 : vector<14x16xf32>
    %187 = arith.addf %93, %186 : vector<14x16xf32>
    %c64 = arith.constant 64 : index
    %188 = memref.load %arg2[%c64] : memref<96xf32, #tpu.memory_space<smem>>
    %189 = vector.broadcast %188 : f32 to vector<14x16xf32>
    %190 = arith.mulf %189, %121 : vector<14x16xf32>
    %191 = arith.addf %187, %190 : vector<14x16xf32>
    %c65 = arith.constant 65 : index
    %192 = memref.load %arg2[%c65] : memref<96xf32, #tpu.memory_space<smem>>
    %193 = vector.broadcast %192 : f32 to vector<14x16xf32>
    %194 = arith.mulf %193, %123 : vector<14x16xf32>
    %195 = arith.addf %191, %194 : vector<14x16xf32>
    %c75 = arith.constant 75 : index
    %196 = memref.load %arg2[%c75] : memref<96xf32, #tpu.memory_space<smem>>
    %197 = vector.broadcast %196 : f32 to vector<14x16xf32>
    %198 = arith.mulf %197, %119 : vector<14x16xf32>
    %199 = arith.addf %105, %198 : vector<14x16xf32>
    %c76 = arith.constant 76 : index
    %200 = memref.load %arg2[%c76] : memref<96xf32, #tpu.memory_space<smem>>
    %201 = vector.broadcast %200 : f32 to vector<14x16xf32>
    %202 = arith.mulf %201, %121 : vector<14x16xf32>
    %203 = arith.addf %199, %202 : vector<14x16xf32>
    %c77 = arith.constant 77 : index
    %204 = memref.load %arg2[%c77] : memref<96xf32, #tpu.memory_space<smem>>
    %205 = vector.broadcast %204 : f32 to vector<14x16xf32>
    %206 = arith.mulf %205, %123 : vector<14x16xf32>
    %207 = arith.addf %203, %206 : vector<14x16xf32>
    %c87 = arith.constant 87 : index
    %208 = memref.load %arg2[%c87] : memref<96xf32, #tpu.memory_space<smem>>
    %209 = vector.broadcast %208 : f32 to vector<14x16xf32>
    %210 = arith.mulf %209, %119 : vector<14x16xf32>
    %211 = arith.addf %117, %210 : vector<14x16xf32>
    %c88 = arith.constant 88 : index
    %212 = memref.load %arg2[%c88] : memref<96xf32, #tpu.memory_space<smem>>
    %213 = vector.broadcast %212 : f32 to vector<14x16xf32>
    %214 = arith.mulf %213, %121 : vector<14x16xf32>
    %215 = arith.addf %211, %214 : vector<14x16xf32>
    %c89 = arith.constant 89 : index
    %216 = memref.load %arg2[%c89] : memref<96xf32, #tpu.memory_space<smem>>
    %217 = vector.broadcast %216 : f32 to vector<14x16xf32>
    %218 = arith.mulf %217, %123 : vector<14x16xf32>
    %219 = arith.addf %215, %218 : vector<14x16xf32>
    %c0_30 = arith.constant 0 : index
    %c2_31 = arith.constant 2 : index
    %c0_32 = arith.constant 0 : index
    %c0_33 = arith.constant 0 : index
    %220 = vector.load %arg1[%c0_30, %c2_31, %c0_32, %c0_33] : memref<1x4x16x16xf32, #tpu.memory_space<vmem>>, vector<1x1x14x16xf32>
    %221 = vector.shape_cast %220 : vector<1x1x14x16xf32> to vector<14x16xf32>
    %c0_34 = arith.constant 0 : index
    %c2_35 = arith.constant 2 : index
    %c1_36 = arith.constant 1 : index
    %c0_37 = arith.constant 0 : index
    %222 = vector.load %arg1[%c0_34, %c2_35, %c1_36, %c0_37] : memref<1x4x16x16xf32, #tpu.memory_space<vmem>>, vector<1x1x14x16xf32>
    %223 = vector.shape_cast %222 : vector<1x1x14x16xf32> to vector<14x16xf32>
    %c0_38 = arith.constant 0 : index
    %c2_39 = arith.constant 2 : index
    %c2_40 = arith.constant 2 : index
    %c0_41 = arith.constant 0 : index
    %224 = vector.load %arg1[%c0_38, %c2_39, %c2_40, %c0_41] : memref<1x4x16x16xf32, #tpu.memory_space<vmem>>, vector<1x1x14x16xf32>
    %225 = vector.shape_cast %224 : vector<1x1x14x16xf32> to vector<14x16xf32>
    %c6_42 = arith.constant 6 : index
    %226 = memref.load %arg2[%c6_42] : memref<96xf32, #tpu.memory_space<smem>>
    %227 = vector.broadcast %226 : f32 to vector<14x16xf32>
    %228 = arith.mulf %227, %221 : vector<14x16xf32>
    %229 = arith.addf %135, %228 : vector<14x16xf32>
    %c7_43 = arith.constant 7 : index
    %230 = memref.load %arg2[%c7_43] : memref<96xf32, #tpu.memory_space<smem>>
    %231 = vector.broadcast %230 : f32 to vector<14x16xf32>
    %232 = arith.mulf %231, %223 : vector<14x16xf32>
    %233 = arith.addf %229, %232 : vector<14x16xf32>
    %c8 = arith.constant 8 : index
    %234 = memref.load %arg2[%c8] : memref<96xf32, #tpu.memory_space<smem>>
    %235 = vector.broadcast %234 : f32 to vector<14x16xf32>
    %236 = arith.mulf %235, %225 : vector<14x16xf32>
    %237 = arith.addf %233, %236 : vector<14x16xf32>
    %c18 = arith.constant 18 : index
    %238 = memref.load %arg2[%c18] : memref<96xf32, #tpu.memory_space<smem>>
    %239 = vector.broadcast %238 : f32 to vector<14x16xf32>
    %240 = arith.mulf %239, %221 : vector<14x16xf32>
    %241 = arith.addf %147, %240 : vector<14x16xf32>
    %c19 = arith.constant 19 : index
    %242 = memref.load %arg2[%c19] : memref<96xf32, #tpu.memory_space<smem>>
    %243 = vector.broadcast %242 : f32 to vector<14x16xf32>
    %244 = arith.mulf %243, %223 : vector<14x16xf32>
    %245 = arith.addf %241, %244 : vector<14x16xf32>
    %c20 = arith.constant 20 : index
    %246 = memref.load %arg2[%c20] : memref<96xf32, #tpu.memory_space<smem>>
    %247 = vector.broadcast %246 : f32 to vector<14x16xf32>
    %248 = arith.mulf %247, %225 : vector<14x16xf32>
    %249 = arith.addf %245, %248 : vector<14x16xf32>
    %c30 = arith.constant 30 : index
    %250 = memref.load %arg2[%c30] : memref<96xf32, #tpu.memory_space<smem>>
    %251 = vector.broadcast %250 : f32 to vector<14x16xf32>
    %252 = arith.mulf %251, %221 : vector<14x16xf32>
    %253 = arith.addf %159, %252 : vector<14x16xf32>
    %c31 = arith.constant 31 : index
    %254 = memref.load %arg2[%c31] : memref<96xf32, #tpu.memory_space<smem>>
    %255 = vector.broadcast %254 : f32 to vector<14x16xf32>
    %256 = arith.mulf %255, %223 : vector<14x16xf32>
    %257 = arith.addf %253, %256 : vector<14x16xf32>
    %c32 = arith.constant 32 : index
    %258 = memref.load %arg2[%c32] : memref<96xf32, #tpu.memory_space<smem>>
    %259 = vector.broadcast %258 : f32 to vector<14x16xf32>
    %260 = arith.mulf %259, %225 : vector<14x16xf32>
    %261 = arith.addf %257, %260 : vector<14x16xf32>
    %c42 = arith.constant 42 : index
    %262 = memref.load %arg2[%c42] : memref<96xf32, #tpu.memory_space<smem>>
    %263 = vector.broadcast %262 : f32 to vector<14x16xf32>
    %264 = arith.mulf %263, %221 : vector<14x16xf32>
    %265 = arith.addf %171, %264 : vector<14x16xf32>
    %c43 = arith.constant 43 : index
    %266 = memref.load %arg2[%c43] : memref<96xf32, #tpu.memory_space<smem>>
    %267 = vector.broadcast %266 : f32 to vector<14x16xf32>
    %268 = arith.mulf %267, %223 : vector<14x16xf32>
    %269 = arith.addf %265, %268 : vector<14x16xf32>
    %c44 = arith.constant 44 : index
    %270 = memref.load %arg2[%c44] : memref<96xf32, #tpu.memory_space<smem>>
    %271 = vector.broadcast %270 : f32 to vector<14x16xf32>
    %272 = arith.mulf %271, %225 : vector<14x16xf32>
    %273 = arith.addf %269, %272 : vector<14x16xf32>
    %c54 = arith.constant 54 : index
    %274 = memref.load %arg2[%c54] : memref<96xf32, #tpu.memory_space<smem>>
    %275 = vector.broadcast %274 : f32 to vector<14x16xf32>
    %276 = arith.mulf %275, %221 : vector<14x16xf32>
    %277 = arith.addf %183, %276 : vector<14x16xf32>
    %c55 = arith.constant 55 : index
    %278 = memref.load %arg2[%c55] : memref<96xf32, #tpu.memory_space<smem>>
    %279 = vector.broadcast %278 : f32 to vector<14x16xf32>
    %280 = arith.mulf %279, %223 : vector<14x16xf32>
    %281 = arith.addf %277, %280 : vector<14x16xf32>
    %c56 = arith.constant 56 : index
    %282 = memref.load %arg2[%c56] : memref<96xf32, #tpu.memory_space<smem>>
    %283 = vector.broadcast %282 : f32 to vector<14x16xf32>
    %284 = arith.mulf %283, %225 : vector<14x16xf32>
    %285 = arith.addf %281, %284 : vector<14x16xf32>
    %c66 = arith.constant 66 : index
    %286 = memref.load %arg2[%c66] : memref<96xf32, #tpu.memory_space<smem>>
    %287 = vector.broadcast %286 : f32 to vector<14x16xf32>
    %288 = arith.mulf %287, %221 : vector<14x16xf32>
    %289 = arith.addf %195, %288 : vector<14x16xf32>
    %c67 = arith.constant 67 : index
    %290 = memref.load %arg2[%c67] : memref<96xf32, #tpu.memory_space<smem>>
    %291 = vector.broadcast %290 : f32 to vector<14x16xf32>
    %292 = arith.mulf %291, %223 : vector<14x16xf32>
    %293 = arith.addf %289, %292 : vector<14x16xf32>
    %c68 = arith.constant 68 : index
    %294 = memref.load %arg2[%c68] : memref<96xf32, #tpu.memory_space<smem>>
    %295 = vector.broadcast %294 : f32 to vector<14x16xf32>
    %296 = arith.mulf %295, %225 : vector<14x16xf32>
    %297 = arith.addf %293, %296 : vector<14x16xf32>
    %c78 = arith.constant 78 : index
    %298 = memref.load %arg2[%c78] : memref<96xf32, #tpu.memory_space<smem>>
    %299 = vector.broadcast %298 : f32 to vector<14x16xf32>
    %300 = arith.mulf %299, %221 : vector<14x16xf32>
    %301 = arith.addf %207, %300 : vector<14x16xf32>
    %c79 = arith.constant 79 : index
    %302 = memref.load %arg2[%c79] : memref<96xf32, #tpu.memory_space<smem>>
    %303 = vector.broadcast %302 : f32 to vector<14x16xf32>
    %304 = arith.mulf %303, %223 : vector<14x16xf32>
    %305 = arith.addf %301, %304 : vector<14x16xf32>
    %c80 = arith.constant 80 : index
    %306 = memref.load %arg2[%c80] : memref<96xf32, #tpu.memory_space<smem>>
    %307 = vector.broadcast %306 : f32 to vector<14x16xf32>
    %308 = arith.mulf %307, %225 : vector<14x16xf32>
    %309 = arith.addf %305, %308 : vector<14x16xf32>
    %c90 = arith.constant 90 : index
    %310 = memref.load %arg2[%c90] : memref<96xf32, #tpu.memory_space<smem>>
    %311 = vector.broadcast %310 : f32 to vector<14x16xf32>
    %312 = arith.mulf %311, %221 : vector<14x16xf32>
    %313 = arith.addf %219, %312 : vector<14x16xf32>
    %c91 = arith.constant 91 : index
    %314 = memref.load %arg2[%c91] : memref<96xf32, #tpu.memory_space<smem>>
    %315 = vector.broadcast %314 : f32 to vector<14x16xf32>
    %316 = arith.mulf %315, %223 : vector<14x16xf32>
    %317 = arith.addf %313, %316 : vector<14x16xf32>
    %c92 = arith.constant 92 : index
    %318 = memref.load %arg2[%c92] : memref<96xf32, #tpu.memory_space<smem>>
    %319 = vector.broadcast %318 : f32 to vector<14x16xf32>
    %320 = arith.mulf %319, %225 : vector<14x16xf32>
    %321 = arith.addf %317, %320 : vector<14x16xf32>
    %c0_44 = arith.constant 0 : index
    %c3_45 = arith.constant 3 : index
    %c0_46 = arith.constant 0 : index
    %c0_47 = arith.constant 0 : index
    %322 = vector.load %arg1[%c0_44, %c3_45, %c0_46, %c0_47] : memref<1x4x16x16xf32, #tpu.memory_space<vmem>>, vector<1x1x14x16xf32>
    %323 = vector.shape_cast %322 : vector<1x1x14x16xf32> to vector<14x16xf32>
    %c0_48 = arith.constant 0 : index
    %c3_49 = arith.constant 3 : index
    %c1_50 = arith.constant 1 : index
    %c0_51 = arith.constant 0 : index
    %324 = vector.load %arg1[%c0_48, %c3_49, %c1_50, %c0_51] : memref<1x4x16x16xf32, #tpu.memory_space<vmem>>, vector<1x1x14x16xf32>
    %325 = vector.shape_cast %324 : vector<1x1x14x16xf32> to vector<14x16xf32>
    %c0_52 = arith.constant 0 : index
    %c3_53 = arith.constant 3 : index
    %c2_54 = arith.constant 2 : index
    %c0_55 = arith.constant 0 : index
    %326 = vector.load %arg1[%c0_52, %c3_53, %c2_54, %c0_55] : memref<1x4x16x16xf32, #tpu.memory_space<vmem>>, vector<1x1x14x16xf32>
    %327 = vector.shape_cast %326 : vector<1x1x14x16xf32> to vector<14x16xf32>
    %c9 = arith.constant 9 : index
    %328 = memref.load %arg2[%c9] : memref<96xf32, #tpu.memory_space<smem>>
    %329 = vector.broadcast %328 : f32 to vector<14x16xf32>
    %330 = arith.mulf %329, %323 : vector<14x16xf32>
    %331 = arith.addf %237, %330 : vector<14x16xf32>
    %c10 = arith.constant 10 : index
    %332 = memref.load %arg2[%c10] : memref<96xf32, #tpu.memory_space<smem>>
    %333 = vector.broadcast %332 : f32 to vector<14x16xf32>
    %334 = arith.mulf %333, %325 : vector<14x16xf32>
    %335 = arith.addf %331, %334 : vector<14x16xf32>
    %c11 = arith.constant 11 : index
    %336 = memref.load %arg2[%c11] : memref<96xf32, #tpu.memory_space<smem>>
    %337 = vector.broadcast %336 : f32 to vector<14x16xf32>
    %338 = arith.mulf %337, %327 : vector<14x16xf32>
    %339 = arith.addf %335, %338 : vector<14x16xf32>
    %c21 = arith.constant 21 : index
    %340 = memref.load %arg2[%c21] : memref<96xf32, #tpu.memory_space<smem>>
    %341 = vector.broadcast %340 : f32 to vector<14x16xf32>
    %342 = arith.mulf %341, %323 : vector<14x16xf32>
    %343 = arith.addf %249, %342 : vector<14x16xf32>
    %c22 = arith.constant 22 : index
    %344 = memref.load %arg2[%c22] : memref<96xf32, #tpu.memory_space<smem>>
    %345 = vector.broadcast %344 : f32 to vector<14x16xf32>
    %346 = arith.mulf %345, %325 : vector<14x16xf32>
    %347 = arith.addf %343, %346 : vector<14x16xf32>
    %c23 = arith.constant 23 : index
    %348 = memref.load %arg2[%c23] : memref<96xf32, #tpu.memory_space<smem>>
    %349 = vector.broadcast %348 : f32 to vector<14x16xf32>
    %350 = arith.mulf %349, %327 : vector<14x16xf32>
    %351 = arith.addf %347, %350 : vector<14x16xf32>
    %c33 = arith.constant 33 : index
    %352 = memref.load %arg2[%c33] : memref<96xf32, #tpu.memory_space<smem>>
    %353 = vector.broadcast %352 : f32 to vector<14x16xf32>
    %354 = arith.mulf %353, %323 : vector<14x16xf32>
    %355 = arith.addf %261, %354 : vector<14x16xf32>
    %c34 = arith.constant 34 : index
    %356 = memref.load %arg2[%c34] : memref<96xf32, #tpu.memory_space<smem>>
    %357 = vector.broadcast %356 : f32 to vector<14x16xf32>
    %358 = arith.mulf %357, %325 : vector<14x16xf32>
    %359 = arith.addf %355, %358 : vector<14x16xf32>
    %c35 = arith.constant 35 : index
    %360 = memref.load %arg2[%c35] : memref<96xf32, #tpu.memory_space<smem>>
    %361 = vector.broadcast %360 : f32 to vector<14x16xf32>
    %362 = arith.mulf %361, %327 : vector<14x16xf32>
    %363 = arith.addf %359, %362 : vector<14x16xf32>
    %c45 = arith.constant 45 : index
    %364 = memref.load %arg2[%c45] : memref<96xf32, #tpu.memory_space<smem>>
    %365 = vector.broadcast %364 : f32 to vector<14x16xf32>
    %366 = arith.mulf %365, %323 : vector<14x16xf32>
    %367 = arith.addf %273, %366 : vector<14x16xf32>
    %c46 = arith.constant 46 : index
    %368 = memref.load %arg2[%c46] : memref<96xf32, #tpu.memory_space<smem>>
    %369 = vector.broadcast %368 : f32 to vector<14x16xf32>
    %370 = arith.mulf %369, %325 : vector<14x16xf32>
    %371 = arith.addf %367, %370 : vector<14x16xf32>
    %c47 = arith.constant 47 : index
    %372 = memref.load %arg2[%c47] : memref<96xf32, #tpu.memory_space<smem>>
    %373 = vector.broadcast %372 : f32 to vector<14x16xf32>
    %374 = arith.mulf %373, %327 : vector<14x16xf32>
    %375 = arith.addf %371, %374 : vector<14x16xf32>
    %c57 = arith.constant 57 : index
    %376 = memref.load %arg2[%c57] : memref<96xf32, #tpu.memory_space<smem>>
    %377 = vector.broadcast %376 : f32 to vector<14x16xf32>
    %378 = arith.mulf %377, %323 : vector<14x16xf32>
    %379 = arith.addf %285, %378 : vector<14x16xf32>
    %c58 = arith.constant 58 : index
    %380 = memref.load %arg2[%c58] : memref<96xf32, #tpu.memory_space<smem>>
    %381 = vector.broadcast %380 : f32 to vector<14x16xf32>
    %382 = arith.mulf %381, %325 : vector<14x16xf32>
    %383 = arith.addf %379, %382 : vector<14x16xf32>
    %c59 = arith.constant 59 : index
    %384 = memref.load %arg2[%c59] : memref<96xf32, #tpu.memory_space<smem>>
    %385 = vector.broadcast %384 : f32 to vector<14x16xf32>
    %386 = arith.mulf %385, %327 : vector<14x16xf32>
    %387 = arith.addf %383, %386 : vector<14x16xf32>
    %c69 = arith.constant 69 : index
    %388 = memref.load %arg2[%c69] : memref<96xf32, #tpu.memory_space<smem>>
    %389 = vector.broadcast %388 : f32 to vector<14x16xf32>
    %390 = arith.mulf %389, %323 : vector<14x16xf32>
    %391 = arith.addf %297, %390 : vector<14x16xf32>
    %c70 = arith.constant 70 : index
    %392 = memref.load %arg2[%c70] : memref<96xf32, #tpu.memory_space<smem>>
    %393 = vector.broadcast %392 : f32 to vector<14x16xf32>
    %394 = arith.mulf %393, %325 : vector<14x16xf32>
    %395 = arith.addf %391, %394 : vector<14x16xf32>
    %c71 = arith.constant 71 : index
    %396 = memref.load %arg2[%c71] : memref<96xf32, #tpu.memory_space<smem>>
    %397 = vector.broadcast %396 : f32 to vector<14x16xf32>
    %398 = arith.mulf %397, %327 : vector<14x16xf32>
    %399 = arith.addf %395, %398 : vector<14x16xf32>
    %c81 = arith.constant 81 : index
    %400 = memref.load %arg2[%c81] : memref<96xf32, #tpu.memory_space<smem>>
    %401 = vector.broadcast %400 : f32 to vector<14x16xf32>
    %402 = arith.mulf %401, %323 : vector<14x16xf32>
    %403 = arith.addf %309, %402 : vector<14x16xf32>
    %c82 = arith.constant 82 : index
    %404 = memref.load %arg2[%c82] : memref<96xf32, #tpu.memory_space<smem>>
    %405 = vector.broadcast %404 : f32 to vector<14x16xf32>
    %406 = arith.mulf %405, %325 : vector<14x16xf32>
    %407 = arith.addf %403, %406 : vector<14x16xf32>
    %c83 = arith.constant 83 : index
    %408 = memref.load %arg2[%c83] : memref<96xf32, #tpu.memory_space<smem>>
    %409 = vector.broadcast %408 : f32 to vector<14x16xf32>
    %410 = arith.mulf %409, %327 : vector<14x16xf32>
    %411 = arith.addf %407, %410 : vector<14x16xf32>
    %c93 = arith.constant 93 : index
    %412 = memref.load %arg2[%c93] : memref<96xf32, #tpu.memory_space<smem>>
    %413 = vector.broadcast %412 : f32 to vector<14x16xf32>
    %414 = arith.mulf %413, %323 : vector<14x16xf32>
    %415 = arith.addf %321, %414 : vector<14x16xf32>
    %c94 = arith.constant 94 : index
    %416 = memref.load %arg2[%c94] : memref<96xf32, #tpu.memory_space<smem>>
    %417 = vector.broadcast %416 : f32 to vector<14x16xf32>
    %418 = arith.mulf %417, %325 : vector<14x16xf32>
    %419 = arith.addf %415, %418 : vector<14x16xf32>
    %c95 = arith.constant 95 : index
    %420 = memref.load %arg2[%c95] : memref<96xf32, #tpu.memory_space<smem>>
    %421 = vector.broadcast %420 : f32 to vector<14x16xf32>
    %422 = arith.mulf %421, %327 : vector<14x16xf32>
    %423 = arith.addf %419, %422 : vector<14x16xf32>
    %cst = arith.constant 0.000000e+00 : f32
    %424 = vector.broadcast %cst : f32 to vector<14x16xf32>
    %425 = arith.maximumf %339, %424 : vector<14x16xf32>
    %cst_56 = arith.constant 0.000000e+00 : f32
    %426 = vector.broadcast %cst_56 : f32 to vector<14x16xf32>
    %427 = arith.maximumf %351, %426 : vector<14x16xf32>
    %cst_57 = arith.constant 0.000000e+00 : f32
    %428 = vector.broadcast %cst_57 : f32 to vector<14x16xf32>
    %429 = arith.maximumf %363, %428 : vector<14x16xf32>
    %cst_58 = arith.constant 0.000000e+00 : f32
    %430 = vector.broadcast %cst_58 : f32 to vector<14x16xf32>
    %431 = arith.maximumf %375, %430 : vector<14x16xf32>
    %cst_59 = arith.constant 0.000000e+00 : f32
    %432 = vector.broadcast %cst_59 : f32 to vector<14x16xf32>
    %433 = arith.maximumf %387, %432 : vector<14x16xf32>
    %cst_60 = arith.constant 0.000000e+00 : f32
    %434 = vector.broadcast %cst_60 : f32 to vector<14x16xf32>
    %435 = arith.maximumf %399, %434 : vector<14x16xf32>
    %cst_61 = arith.constant 0.000000e+00 : f32
    %436 = vector.broadcast %cst_61 : f32 to vector<14x16xf32>
    %437 = arith.maximumf %411, %436 : vector<14x16xf32>
    %cst_62 = arith.constant 0.000000e+00 : f32
    %438 = vector.broadcast %cst_62 : f32 to vector<14x16xf32>
    %439 = arith.maximumf %423, %438 : vector<14x16xf32>
    %c0_63 = arith.constant 0 : index
    %440 = memref.load %arg5[%c0_63] : memref<8xf32, #tpu.memory_space<smem>>
    %441 = vector.broadcast %440 : f32 to vector<14x14xf32>
    %c1_64 = arith.constant 1 : index
    %442 = memref.load %arg5[%c1_64] : memref<8xf32, #tpu.memory_space<smem>>
    %443 = vector.broadcast %442 : f32 to vector<14x14xf32>
    %c2_65 = arith.constant 2 : index
    %444 = memref.load %arg5[%c2_65] : memref<8xf32, #tpu.memory_space<smem>>
    %445 = vector.broadcast %444 : f32 to vector<14x14xf32>
    %c3_66 = arith.constant 3 : index
    %446 = memref.load %arg5[%c3_66] : memref<8xf32, #tpu.memory_space<smem>>
    %447 = vector.broadcast %446 : f32 to vector<14x14xf32>
    %c4_67 = arith.constant 4 : index
    %448 = memref.load %arg5[%c4_67] : memref<8xf32, #tpu.memory_space<smem>>
    %449 = vector.broadcast %448 : f32 to vector<14x14xf32>
    %c5_68 = arith.constant 5 : index
    %450 = memref.load %arg5[%c5_68] : memref<8xf32, #tpu.memory_space<smem>>
    %451 = vector.broadcast %450 : f32 to vector<14x14xf32>
    %c6_69 = arith.constant 6 : index
    %452 = memref.load %arg5[%c6_69] : memref<8xf32, #tpu.memory_space<smem>>
    %453 = vector.broadcast %452 : f32 to vector<14x14xf32>
    %c7_70 = arith.constant 7 : index
    %454 = memref.load %arg5[%c7_70] : memref<8xf32, #tpu.memory_space<smem>>
    %455 = vector.broadcast %454 : f32 to vector<14x14xf32>
    %456 = vector.extract_strided_slice %425 {offsets = [0, 0], sizes = [14, 14], strides = [1, 1]} : vector<14x16xf32> to vector<14x14xf32>
    %457 = vector.extract_strided_slice %425 {offsets = [0, 1], sizes = [14, 14], strides = [1, 1]} : vector<14x16xf32> to vector<14x14xf32>
    %458 = vector.extract_strided_slice %425 {offsets = [0, 2], sizes = [14, 14], strides = [1, 1]} : vector<14x16xf32> to vector<14x14xf32>
    %c0_71 = arith.constant 0 : index
    %459 = memref.load %arg4[%c0_71] : memref<192xf32, #tpu.memory_space<smem>>
    %460 = vector.broadcast %459 : f32 to vector<14x14xf32>
    %461 = arith.mulf %460, %456 : vector<14x14xf32>
    %462 = arith.addf %441, %461 : vector<14x14xf32>
    %c1_72 = arith.constant 1 : index
    %463 = memref.load %arg4[%c1_72] : memref<192xf32, #tpu.memory_space<smem>>
    %464 = vector.broadcast %463 : f32 to vector<14x14xf32>
    %465 = arith.mulf %464, %457 : vector<14x14xf32>
    %466 = arith.addf %462, %465 : vector<14x14xf32>
    %c2_73 = arith.constant 2 : index
    %467 = memref.load %arg4[%c2_73] : memref<192xf32, #tpu.memory_space<smem>>
    %468 = vector.broadcast %467 : f32 to vector<14x14xf32>
    %469 = arith.mulf %468, %458 : vector<14x14xf32>
    %470 = arith.addf %466, %469 : vector<14x14xf32>
    %c24_74 = arith.constant 24 : index
    %471 = memref.load %arg4[%c24_74] : memref<192xf32, #tpu.memory_space<smem>>
    %472 = vector.broadcast %471 : f32 to vector<14x14xf32>
    %473 = arith.mulf %472, %456 : vector<14x14xf32>
    %474 = arith.addf %443, %473 : vector<14x14xf32>
    %c25_75 = arith.constant 25 : index
    %475 = memref.load %arg4[%c25_75] : memref<192xf32, #tpu.memory_space<smem>>
    %476 = vector.broadcast %475 : f32 to vector<14x14xf32>
    %477 = arith.mulf %476, %457 : vector<14x14xf32>
    %478 = arith.addf %474, %477 : vector<14x14xf32>
    %c26_76 = arith.constant 26 : index
    %479 = memref.load %arg4[%c26_76] : memref<192xf32, #tpu.memory_space<smem>>
    %480 = vector.broadcast %479 : f32 to vector<14x14xf32>
    %481 = arith.mulf %480, %458 : vector<14x14xf32>
    %482 = arith.addf %478, %481 : vector<14x14xf32>
    %c48_77 = arith.constant 48 : index
    %483 = memref.load %arg4[%c48_77] : memref<192xf32, #tpu.memory_space<smem>>
    %484 = vector.broadcast %483 : f32 to vector<14x14xf32>
    %485 = arith.mulf %484, %456 : vector<14x14xf32>
    %486 = arith.addf %445, %485 : vector<14x14xf32>
    %c49_78 = arith.constant 49 : index
    %487 = memref.load %arg4[%c49_78] : memref<192xf32, #tpu.memory_space<smem>>
    %488 = vector.broadcast %487 : f32 to vector<14x14xf32>
    %489 = arith.mulf %488, %457 : vector<14x14xf32>
    %490 = arith.addf %486, %489 : vector<14x14xf32>
    %c50_79 = arith.constant 50 : index
    %491 = memref.load %arg4[%c50_79] : memref<192xf32, #tpu.memory_space<smem>>
    %492 = vector.broadcast %491 : f32 to vector<14x14xf32>
    %493 = arith.mulf %492, %458 : vector<14x14xf32>
    %494 = arith.addf %490, %493 : vector<14x14xf32>
    %c72_80 = arith.constant 72 : index
    %495 = memref.load %arg4[%c72_80] : memref<192xf32, #tpu.memory_space<smem>>
    %496 = vector.broadcast %495 : f32 to vector<14x14xf32>
    %497 = arith.mulf %496, %456 : vector<14x14xf32>
    %498 = arith.addf %447, %497 : vector<14x14xf32>
    %c73_81 = arith.constant 73 : index
    %499 = memref.load %arg4[%c73_81] : memref<192xf32, #tpu.memory_space<smem>>
    %500 = vector.broadcast %499 : f32 to vector<14x14xf32>
    %501 = arith.mulf %500, %457 : vector<14x14xf32>
    %502 = arith.addf %498, %501 : vector<14x14xf32>
    %c74_82 = arith.constant 74 : index
    %503 = memref.load %arg4[%c74_82] : memref<192xf32, #tpu.memory_space<smem>>
    %504 = vector.broadcast %503 : f32 to vector<14x14xf32>
    %505 = arith.mulf %504, %458 : vector<14x14xf32>
    %506 = arith.addf %502, %505 : vector<14x14xf32>
    %c96 = arith.constant 96 : index
    %507 = memref.load %arg4[%c96] : memref<192xf32, #tpu.memory_space<smem>>
    %508 = vector.broadcast %507 : f32 to vector<14x14xf32>
    %509 = arith.mulf %508, %456 : vector<14x14xf32>
    %510 = arith.addf %449, %509 : vector<14x14xf32>
    %c97 = arith.constant 97 : index
    %511 = memref.load %arg4[%c97] : memref<192xf32, #tpu.memory_space<smem>>
    %512 = vector.broadcast %511 : f32 to vector<14x14xf32>
    %513 = arith.mulf %512, %457 : vector<14x14xf32>
    %514 = arith.addf %510, %513 : vector<14x14xf32>
    %c98 = arith.constant 98 : index
    %515 = memref.load %arg4[%c98] : memref<192xf32, #tpu.memory_space<smem>>
    %516 = vector.broadcast %515 : f32 to vector<14x14xf32>
    %517 = arith.mulf %516, %458 : vector<14x14xf32>
    %518 = arith.addf %514, %517 : vector<14x14xf32>
    %c120 = arith.constant 120 : index
    %519 = memref.load %arg4[%c120] : memref<192xf32, #tpu.memory_space<smem>>
    %520 = vector.broadcast %519 : f32 to vector<14x14xf32>
    %521 = arith.mulf %520, %456 : vector<14x14xf32>
    %522 = arith.addf %451, %521 : vector<14x14xf32>
    %c121 = arith.constant 121 : index
    %523 = memref.load %arg4[%c121] : memref<192xf32, #tpu.memory_space<smem>>
    %524 = vector.broadcast %523 : f32 to vector<14x14xf32>
    %525 = arith.mulf %524, %457 : vector<14x14xf32>
    %526 = arith.addf %522, %525 : vector<14x14xf32>
    %c122 = arith.constant 122 : index
    %527 = memref.load %arg4[%c122] : memref<192xf32, #tpu.memory_space<smem>>
    %528 = vector.broadcast %527 : f32 to vector<14x14xf32>
    %529 = arith.mulf %528, %458 : vector<14x14xf32>
    %530 = arith.addf %526, %529 : vector<14x14xf32>
    %c144 = arith.constant 144 : index
    %531 = memref.load %arg4[%c144] : memref<192xf32, #tpu.memory_space<smem>>
    %532 = vector.broadcast %531 : f32 to vector<14x14xf32>
    %533 = arith.mulf %532, %456 : vector<14x14xf32>
    %534 = arith.addf %453, %533 : vector<14x14xf32>
    %c145 = arith.constant 145 : index
    %535 = memref.load %arg4[%c145] : memref<192xf32, #tpu.memory_space<smem>>
    %536 = vector.broadcast %535 : f32 to vector<14x14xf32>
    %537 = arith.mulf %536, %457 : vector<14x14xf32>
    %538 = arith.addf %534, %537 : vector<14x14xf32>
    %c146 = arith.constant 146 : index
    %539 = memref.load %arg4[%c146] : memref<192xf32, #tpu.memory_space<smem>>
    %540 = vector.broadcast %539 : f32 to vector<14x14xf32>
    %541 = arith.mulf %540, %458 : vector<14x14xf32>
    %542 = arith.addf %538, %541 : vector<14x14xf32>
    %c168 = arith.constant 168 : index
    %543 = memref.load %arg4[%c168] : memref<192xf32, #tpu.memory_space<smem>>
    %544 = vector.broadcast %543 : f32 to vector<14x14xf32>
    %545 = arith.mulf %544, %456 : vector<14x14xf32>
    %546 = arith.addf %455, %545 : vector<14x14xf32>
    %c169 = arith.constant 169 : index
    %547 = memref.load %arg4[%c169] : memref<192xf32, #tpu.memory_space<smem>>
    %548 = vector.broadcast %547 : f32 to vector<14x14xf32>
    %549 = arith.mulf %548, %457 : vector<14x14xf32>
    %550 = arith.addf %546, %549 : vector<14x14xf32>
    %c170 = arith.constant 170 : index
    %551 = memref.load %arg4[%c170] : memref<192xf32, #tpu.memory_space<smem>>
    %552 = vector.broadcast %551 : f32 to vector<14x14xf32>
    %553 = arith.mulf %552, %458 : vector<14x14xf32>
    %554 = arith.addf %550, %553 : vector<14x14xf32>
    %555 = vector.extract_strided_slice %427 {offsets = [0, 0], sizes = [14, 14], strides = [1, 1]} : vector<14x16xf32> to vector<14x14xf32>
    %556 = vector.extract_strided_slice %427 {offsets = [0, 1], sizes = [14, 14], strides = [1, 1]} : vector<14x16xf32> to vector<14x14xf32>
    %557 = vector.extract_strided_slice %427 {offsets = [0, 2], sizes = [14, 14], strides = [1, 1]} : vector<14x16xf32> to vector<14x14xf32>
    %c3_83 = arith.constant 3 : index
    %558 = memref.load %arg4[%c3_83] : memref<192xf32, #tpu.memory_space<smem>>
    %559 = vector.broadcast %558 : f32 to vector<14x14xf32>
    %560 = arith.mulf %559, %555 : vector<14x14xf32>
    %561 = arith.addf %470, %560 : vector<14x14xf32>
    %c4_84 = arith.constant 4 : index
    %562 = memref.load %arg4[%c4_84] : memref<192xf32, #tpu.memory_space<smem>>
    %563 = vector.broadcast %562 : f32 to vector<14x14xf32>
    %564 = arith.mulf %563, %556 : vector<14x14xf32>
    %565 = arith.addf %561, %564 : vector<14x14xf32>
    %c5_85 = arith.constant 5 : index
    %566 = memref.load %arg4[%c5_85] : memref<192xf32, #tpu.memory_space<smem>>
    %567 = vector.broadcast %566 : f32 to vector<14x14xf32>
    %568 = arith.mulf %567, %557 : vector<14x14xf32>
    %569 = arith.addf %565, %568 : vector<14x14xf32>
    %c27_86 = arith.constant 27 : index
    %570 = memref.load %arg4[%c27_86] : memref<192xf32, #tpu.memory_space<smem>>
    %571 = vector.broadcast %570 : f32 to vector<14x14xf32>
    %572 = arith.mulf %571, %555 : vector<14x14xf32>
    %573 = arith.addf %482, %572 : vector<14x14xf32>
    %c28_87 = arith.constant 28 : index
    %574 = memref.load %arg4[%c28_87] : memref<192xf32, #tpu.memory_space<smem>>
    %575 = vector.broadcast %574 : f32 to vector<14x14xf32>
    %576 = arith.mulf %575, %556 : vector<14x14xf32>
    %577 = arith.addf %573, %576 : vector<14x14xf32>
    %c29_88 = arith.constant 29 : index
    %578 = memref.load %arg4[%c29_88] : memref<192xf32, #tpu.memory_space<smem>>
    %579 = vector.broadcast %578 : f32 to vector<14x14xf32>
    %580 = arith.mulf %579, %557 : vector<14x14xf32>
    %581 = arith.addf %577, %580 : vector<14x14xf32>
    %c51_89 = arith.constant 51 : index
    %582 = memref.load %arg4[%c51_89] : memref<192xf32, #tpu.memory_space<smem>>
    %583 = vector.broadcast %582 : f32 to vector<14x14xf32>
    %584 = arith.mulf %583, %555 : vector<14x14xf32>
    %585 = arith.addf %494, %584 : vector<14x14xf32>
    %c52_90 = arith.constant 52 : index
    %586 = memref.load %arg4[%c52_90] : memref<192xf32, #tpu.memory_space<smem>>
    %587 = vector.broadcast %586 : f32 to vector<14x14xf32>
    %588 = arith.mulf %587, %556 : vector<14x14xf32>
    %589 = arith.addf %585, %588 : vector<14x14xf32>
    %c53_91 = arith.constant 53 : index
    %590 = memref.load %arg4[%c53_91] : memref<192xf32, #tpu.memory_space<smem>>
    %591 = vector.broadcast %590 : f32 to vector<14x14xf32>
    %592 = arith.mulf %591, %557 : vector<14x14xf32>
    %593 = arith.addf %589, %592 : vector<14x14xf32>
    %c75_92 = arith.constant 75 : index
    %594 = memref.load %arg4[%c75_92] : memref<192xf32, #tpu.memory_space<smem>>
    %595 = vector.broadcast %594 : f32 to vector<14x14xf32>
    %596 = arith.mulf %595, %555 : vector<14x14xf32>
    %597 = arith.addf %506, %596 : vector<14x14xf32>
    %c76_93 = arith.constant 76 : index
    %598 = memref.load %arg4[%c76_93] : memref<192xf32, #tpu.memory_space<smem>>
    %599 = vector.broadcast %598 : f32 to vector<14x14xf32>
    %600 = arith.mulf %599, %556 : vector<14x14xf32>
    %601 = arith.addf %597, %600 : vector<14x14xf32>
    %c77_94 = arith.constant 77 : index
    %602 = memref.load %arg4[%c77_94] : memref<192xf32, #tpu.memory_space<smem>>
    %603 = vector.broadcast %602 : f32 to vector<14x14xf32>
    %604 = arith.mulf %603, %557 : vector<14x14xf32>
    %605 = arith.addf %601, %604 : vector<14x14xf32>
    %c99 = arith.constant 99 : index
    %606 = memref.load %arg4[%c99] : memref<192xf32, #tpu.memory_space<smem>>
    %607 = vector.broadcast %606 : f32 to vector<14x14xf32>
    %608 = arith.mulf %607, %555 : vector<14x14xf32>
    %609 = arith.addf %518, %608 : vector<14x14xf32>
    %c100 = arith.constant 100 : index
    %610 = memref.load %arg4[%c100] : memref<192xf32, #tpu.memory_space<smem>>
    %611 = vector.broadcast %610 : f32 to vector<14x14xf32>
    %612 = arith.mulf %611, %556 : vector<14x14xf32>
    %613 = arith.addf %609, %612 : vector<14x14xf32>
    %c101 = arith.constant 101 : index
    %614 = memref.load %arg4[%c101] : memref<192xf32, #tpu.memory_space<smem>>
    %615 = vector.broadcast %614 : f32 to vector<14x14xf32>
    %616 = arith.mulf %615, %557 : vector<14x14xf32>
    %617 = arith.addf %613, %616 : vector<14x14xf32>
    %c123 = arith.constant 123 : index
    %618 = memref.load %arg4[%c123] : memref<192xf32, #tpu.memory_space<smem>>
    %619 = vector.broadcast %618 : f32 to vector<14x14xf32>
    %620 = arith.mulf %619, %555 : vector<14x14xf32>
    %621 = arith.addf %530, %620 : vector<14x14xf32>
    %c124 = arith.constant 124 : index
    %622 = memref.load %arg4[%c124] : memref<192xf32, #tpu.memory_space<smem>>
    %623 = vector.broadcast %622 : f32 to vector<14x14xf32>
    %624 = arith.mulf %623, %556 : vector<14x14xf32>
    %625 = arith.addf %621, %624 : vector<14x14xf32>
    %c125 = arith.constant 125 : index
    %626 = memref.load %arg4[%c125] : memref<192xf32, #tpu.memory_space<smem>>
    %627 = vector.broadcast %626 : f32 to vector<14x14xf32>
    %628 = arith.mulf %627, %557 : vector<14x14xf32>
    %629 = arith.addf %625, %628 : vector<14x14xf32>
    %c147 = arith.constant 147 : index
    %630 = memref.load %arg4[%c147] : memref<192xf32, #tpu.memory_space<smem>>
    %631 = vector.broadcast %630 : f32 to vector<14x14xf32>
    %632 = arith.mulf %631, %555 : vector<14x14xf32>
    %633 = arith.addf %542, %632 : vector<14x14xf32>
    %c148 = arith.constant 148 : index
    %634 = memref.load %arg4[%c148] : memref<192xf32, #tpu.memory_space<smem>>
    %635 = vector.broadcast %634 : f32 to vector<14x14xf32>
    %636 = arith.mulf %635, %556 : vector<14x14xf32>
    %637 = arith.addf %633, %636 : vector<14x14xf32>
    %c149 = arith.constant 149 : index
    %638 = memref.load %arg4[%c149] : memref<192xf32, #tpu.memory_space<smem>>
    %639 = vector.broadcast %638 : f32 to vector<14x14xf32>
    %640 = arith.mulf %639, %557 : vector<14x14xf32>
    %641 = arith.addf %637, %640 : vector<14x14xf32>
    %c171 = arith.constant 171 : index
    %642 = memref.load %arg4[%c171] : memref<192xf32, #tpu.memory_space<smem>>
    %643 = vector.broadcast %642 : f32 to vector<14x14xf32>
    %644 = arith.mulf %643, %555 : vector<14x14xf32>
    %645 = arith.addf %554, %644 : vector<14x14xf32>
    %c172 = arith.constant 172 : index
    %646 = memref.load %arg4[%c172] : memref<192xf32, #tpu.memory_space<smem>>
    %647 = vector.broadcast %646 : f32 to vector<14x14xf32>
    %648 = arith.mulf %647, %556 : vector<14x14xf32>
    %649 = arith.addf %645, %648 : vector<14x14xf32>
    %c173 = arith.constant 173 : index
    %650 = memref.load %arg4[%c173] : memref<192xf32, #tpu.memory_space<smem>>
    %651 = vector.broadcast %650 : f32 to vector<14x14xf32>
    %652 = arith.mulf %651, %557 : vector<14x14xf32>
    %653 = arith.addf %649, %652 : vector<14x14xf32>
    %654 = vector.extract_strided_slice %429 {offsets = [0, 0], sizes = [14, 14], strides = [1, 1]} : vector<14x16xf32> to vector<14x14xf32>
    %655 = vector.extract_strided_slice %429 {offsets = [0, 1], sizes = [14, 14], strides = [1, 1]} : vector<14x16xf32> to vector<14x14xf32>
    %656 = vector.extract_strided_slice %429 {offsets = [0, 2], sizes = [14, 14], strides = [1, 1]} : vector<14x16xf32> to vector<14x14xf32>
    %c6_95 = arith.constant 6 : index
    %657 = memref.load %arg4[%c6_95] : memref<192xf32, #tpu.memory_space<smem>>
    %658 = vector.broadcast %657 : f32 to vector<14x14xf32>
    %659 = arith.mulf %658, %654 : vector<14x14xf32>
    %660 = arith.addf %569, %659 : vector<14x14xf32>
    %c7_96 = arith.constant 7 : index
    %661 = memref.load %arg4[%c7_96] : memref<192xf32, #tpu.memory_space<smem>>
    %662 = vector.broadcast %661 : f32 to vector<14x14xf32>
    %663 = arith.mulf %662, %655 : vector<14x14xf32>
    %664 = arith.addf %660, %663 : vector<14x14xf32>
    %c8_97 = arith.constant 8 : index
    %665 = memref.load %arg4[%c8_97] : memref<192xf32, #tpu.memory_space<smem>>
    %666 = vector.broadcast %665 : f32 to vector<14x14xf32>
    %667 = arith.mulf %666, %656 : vector<14x14xf32>
    %668 = arith.addf %664, %667 : vector<14x14xf32>
    %c30_98 = arith.constant 30 : index
    %669 = memref.load %arg4[%c30_98] : memref<192xf32, #tpu.memory_space<smem>>
    %670 = vector.broadcast %669 : f32 to vector<14x14xf32>
    %671 = arith.mulf %670, %654 : vector<14x14xf32>
    %672 = arith.addf %581, %671 : vector<14x14xf32>
    %c31_99 = arith.constant 31 : index
    %673 = memref.load %arg4[%c31_99] : memref<192xf32, #tpu.memory_space<smem>>
    %674 = vector.broadcast %673 : f32 to vector<14x14xf32>
    %675 = arith.mulf %674, %655 : vector<14x14xf32>
    %676 = arith.addf %672, %675 : vector<14x14xf32>
    %c32_100 = arith.constant 32 : index
    %677 = memref.load %arg4[%c32_100] : memref<192xf32, #tpu.memory_space<smem>>
    %678 = vector.broadcast %677 : f32 to vector<14x14xf32>
    %679 = arith.mulf %678, %656 : vector<14x14xf32>
    %680 = arith.addf %676, %679 : vector<14x14xf32>
    %c54_101 = arith.constant 54 : index
    %681 = memref.load %arg4[%c54_101] : memref<192xf32, #tpu.memory_space<smem>>
    %682 = vector.broadcast %681 : f32 to vector<14x14xf32>
    %683 = arith.mulf %682, %654 : vector<14x14xf32>
    %684 = arith.addf %593, %683 : vector<14x14xf32>
    %c55_102 = arith.constant 55 : index
    %685 = memref.load %arg4[%c55_102] : memref<192xf32, #tpu.memory_space<smem>>
    %686 = vector.broadcast %685 : f32 to vector<14x14xf32>
    %687 = arith.mulf %686, %655 : vector<14x14xf32>
    %688 = arith.addf %684, %687 : vector<14x14xf32>
    %c56_103 = arith.constant 56 : index
    %689 = memref.load %arg4[%c56_103] : memref<192xf32, #tpu.memory_space<smem>>
    %690 = vector.broadcast %689 : f32 to vector<14x14xf32>
    %691 = arith.mulf %690, %656 : vector<14x14xf32>
    %692 = arith.addf %688, %691 : vector<14x14xf32>
    %c78_104 = arith.constant 78 : index
    %693 = memref.load %arg4[%c78_104] : memref<192xf32, #tpu.memory_space<smem>>
    %694 = vector.broadcast %693 : f32 to vector<14x14xf32>
    %695 = arith.mulf %694, %654 : vector<14x14xf32>
    %696 = arith.addf %605, %695 : vector<14x14xf32>
    %c79_105 = arith.constant 79 : index
    %697 = memref.load %arg4[%c79_105] : memref<192xf32, #tpu.memory_space<smem>>
    %698 = vector.broadcast %697 : f32 to vector<14x14xf32>
    %699 = arith.mulf %698, %655 : vector<14x14xf32>
    %700 = arith.addf %696, %699 : vector<14x14xf32>
    %c80_106 = arith.constant 80 : index
    %701 = memref.load %arg4[%c80_106] : memref<192xf32, #tpu.memory_space<smem>>
    %702 = vector.broadcast %701 : f32 to vector<14x14xf32>
    %703 = arith.mulf %702, %656 : vector<14x14xf32>
    %704 = arith.addf %700, %703 : vector<14x14xf32>
    %c102 = arith.constant 102 : index
    %705 = memref.load %arg4[%c102] : memref<192xf32, #tpu.memory_space<smem>>
    %706 = vector.broadcast %705 : f32 to vector<14x14xf32>
    %707 = arith.mulf %706, %654 : vector<14x14xf32>
    %708 = arith.addf %617, %707 : vector<14x14xf32>
    %c103 = arith.constant 103 : index
    %709 = memref.load %arg4[%c103] : memref<192xf32, #tpu.memory_space<smem>>
    %710 = vector.broadcast %709 : f32 to vector<14x14xf32>
    %711 = arith.mulf %710, %655 : vector<14x14xf32>
    %712 = arith.addf %708, %711 : vector<14x14xf32>
    %c104 = arith.constant 104 : index
    %713 = memref.load %arg4[%c104] : memref<192xf32, #tpu.memory_space<smem>>
    %714 = vector.broadcast %713 : f32 to vector<14x14xf32>
    %715 = arith.mulf %714, %656 : vector<14x14xf32>
    %716 = arith.addf %712, %715 : vector<14x14xf32>
    %c126 = arith.constant 126 : index
    %717 = memref.load %arg4[%c126] : memref<192xf32, #tpu.memory_space<smem>>
    %718 = vector.broadcast %717 : f32 to vector<14x14xf32>
    %719 = arith.mulf %718, %654 : vector<14x14xf32>
    %720 = arith.addf %629, %719 : vector<14x14xf32>
    %c127 = arith.constant 127 : index
    %721 = memref.load %arg4[%c127] : memref<192xf32, #tpu.memory_space<smem>>
    %722 = vector.broadcast %721 : f32 to vector<14x14xf32>
    %723 = arith.mulf %722, %655 : vector<14x14xf32>
    %724 = arith.addf %720, %723 : vector<14x14xf32>
    %c128 = arith.constant 128 : index
    %725 = memref.load %arg4[%c128] : memref<192xf32, #tpu.memory_space<smem>>
    %726 = vector.broadcast %725 : f32 to vector<14x14xf32>
    %727 = arith.mulf %726, %656 : vector<14x14xf32>
    %728 = arith.addf %724, %727 : vector<14x14xf32>
    %c150 = arith.constant 150 : index
    %729 = memref.load %arg4[%c150] : memref<192xf32, #tpu.memory_space<smem>>
    %730 = vector.broadcast %729 : f32 to vector<14x14xf32>
    %731 = arith.mulf %730, %654 : vector<14x14xf32>
    %732 = arith.addf %641, %731 : vector<14x14xf32>
    %c151 = arith.constant 151 : index
    %733 = memref.load %arg4[%c151] : memref<192xf32, #tpu.memory_space<smem>>
    %734 = vector.broadcast %733 : f32 to vector<14x14xf32>
    %735 = arith.mulf %734, %655 : vector<14x14xf32>
    %736 = arith.addf %732, %735 : vector<14x14xf32>
    %c152 = arith.constant 152 : index
    %737 = memref.load %arg4[%c152] : memref<192xf32, #tpu.memory_space<smem>>
    %738 = vector.broadcast %737 : f32 to vector<14x14xf32>
    %739 = arith.mulf %738, %656 : vector<14x14xf32>
    %740 = arith.addf %736, %739 : vector<14x14xf32>
    %c174 = arith.constant 174 : index
    %741 = memref.load %arg4[%c174] : memref<192xf32, #tpu.memory_space<smem>>
    %742 = vector.broadcast %741 : f32 to vector<14x14xf32>
    %743 = arith.mulf %742, %654 : vector<14x14xf32>
    %744 = arith.addf %653, %743 : vector<14x14xf32>
    %c175 = arith.constant 175 : index
    %745 = memref.load %arg4[%c175] : memref<192xf32, #tpu.memory_space<smem>>
    %746 = vector.broadcast %745 : f32 to vector<14x14xf32>
    %747 = arith.mulf %746, %655 : vector<14x14xf32>
    %748 = arith.addf %744, %747 : vector<14x14xf32>
    %c176 = arith.constant 176 : index
    %749 = memref.load %arg4[%c176] : memref<192xf32, #tpu.memory_space<smem>>
    %750 = vector.broadcast %749 : f32 to vector<14x14xf32>
    %751 = arith.mulf %750, %656 : vector<14x14xf32>
    %752 = arith.addf %748, %751 : vector<14x14xf32>
    %753 = vector.extract_strided_slice %431 {offsets = [0, 0], sizes = [14, 14], strides = [1, 1]} : vector<14x16xf32> to vector<14x14xf32>
    %754 = vector.extract_strided_slice %431 {offsets = [0, 1], sizes = [14, 14], strides = [1, 1]} : vector<14x16xf32> to vector<14x14xf32>
    %755 = vector.extract_strided_slice %431 {offsets = [0, 2], sizes = [14, 14], strides = [1, 1]} : vector<14x16xf32> to vector<14x14xf32>
    %c9_107 = arith.constant 9 : index
    %756 = memref.load %arg4[%c9_107] : memref<192xf32, #tpu.memory_space<smem>>
    %757 = vector.broadcast %756 : f32 to vector<14x14xf32>
    %758 = arith.mulf %757, %753 : vector<14x14xf32>
    %759 = arith.addf %668, %758 : vector<14x14xf32>
    %c10_108 = arith.constant 10 : index
    %760 = memref.load %arg4[%c10_108] : memref<192xf32, #tpu.memory_space<smem>>
    %761 = vector.broadcast %760 : f32 to vector<14x14xf32>
    %762 = arith.mulf %761, %754 : vector<14x14xf32>
    %763 = arith.addf %759, %762 : vector<14x14xf32>
    %c11_109 = arith.constant 11 : index
    %764 = memref.load %arg4[%c11_109] : memref<192xf32, #tpu.memory_space<smem>>
    %765 = vector.broadcast %764 : f32 to vector<14x14xf32>
    %766 = arith.mulf %765, %755 : vector<14x14xf32>
    %767 = arith.addf %763, %766 : vector<14x14xf32>
    %c33_110 = arith.constant 33 : index
    %768 = memref.load %arg4[%c33_110] : memref<192xf32, #tpu.memory_space<smem>>
    %769 = vector.broadcast %768 : f32 to vector<14x14xf32>
    %770 = arith.mulf %769, %753 : vector<14x14xf32>
    %771 = arith.addf %680, %770 : vector<14x14xf32>
    %c34_111 = arith.constant 34 : index
    %772 = memref.load %arg4[%c34_111] : memref<192xf32, #tpu.memory_space<smem>>
    %773 = vector.broadcast %772 : f32 to vector<14x14xf32>
    %774 = arith.mulf %773, %754 : vector<14x14xf32>
    %775 = arith.addf %771, %774 : vector<14x14xf32>
    %c35_112 = arith.constant 35 : index
    %776 = memref.load %arg4[%c35_112] : memref<192xf32, #tpu.memory_space<smem>>
    %777 = vector.broadcast %776 : f32 to vector<14x14xf32>
    %778 = arith.mulf %777, %755 : vector<14x14xf32>
    %779 = arith.addf %775, %778 : vector<14x14xf32>
    %c57_113 = arith.constant 57 : index
    %780 = memref.load %arg4[%c57_113] : memref<192xf32, #tpu.memory_space<smem>>
    %781 = vector.broadcast %780 : f32 to vector<14x14xf32>
    %782 = arith.mulf %781, %753 : vector<14x14xf32>
    %783 = arith.addf %692, %782 : vector<14x14xf32>
    %c58_114 = arith.constant 58 : index
    %784 = memref.load %arg4[%c58_114] : memref<192xf32, #tpu.memory_space<smem>>
    %785 = vector.broadcast %784 : f32 to vector<14x14xf32>
    %786 = arith.mulf %785, %754 : vector<14x14xf32>
    %787 = arith.addf %783, %786 : vector<14x14xf32>
    %c59_115 = arith.constant 59 : index
    %788 = memref.load %arg4[%c59_115] : memref<192xf32, #tpu.memory_space<smem>>
    %789 = vector.broadcast %788 : f32 to vector<14x14xf32>
    %790 = arith.mulf %789, %755 : vector<14x14xf32>
    %791 = arith.addf %787, %790 : vector<14x14xf32>
    %c81_116 = arith.constant 81 : index
    %792 = memref.load %arg4[%c81_116] : memref<192xf32, #tpu.memory_space<smem>>
    %793 = vector.broadcast %792 : f32 to vector<14x14xf32>
    %794 = arith.mulf %793, %753 : vector<14x14xf32>
    %795 = arith.addf %704, %794 : vector<14x14xf32>
    %c82_117 = arith.constant 82 : index
    %796 = memref.load %arg4[%c82_117] : memref<192xf32, #tpu.memory_space<smem>>
    %797 = vector.broadcast %796 : f32 to vector<14x14xf32>
    %798 = arith.mulf %797, %754 : vector<14x14xf32>
    %799 = arith.addf %795, %798 : vector<14x14xf32>
    %c83_118 = arith.constant 83 : index
    %800 = memref.load %arg4[%c83_118] : memref<192xf32, #tpu.memory_space<smem>>
    %801 = vector.broadcast %800 : f32 to vector<14x14xf32>
    %802 = arith.mulf %801, %755 : vector<14x14xf32>
    %803 = arith.addf %799, %802 : vector<14x14xf32>
    %c105 = arith.constant 105 : index
    %804 = memref.load %arg4[%c105] : memref<192xf32, #tpu.memory_space<smem>>
    %805 = vector.broadcast %804 : f32 to vector<14x14xf32>
    %806 = arith.mulf %805, %753 : vector<14x14xf32>
    %807 = arith.addf %716, %806 : vector<14x14xf32>
    %c106 = arith.constant 106 : index
    %808 = memref.load %arg4[%c106] : memref<192xf32, #tpu.memory_space<smem>>
    %809 = vector.broadcast %808 : f32 to vector<14x14xf32>
    %810 = arith.mulf %809, %754 : vector<14x14xf32>
    %811 = arith.addf %807, %810 : vector<14x14xf32>
    %c107 = arith.constant 107 : index
    %812 = memref.load %arg4[%c107] : memref<192xf32, #tpu.memory_space<smem>>
    %813 = vector.broadcast %812 : f32 to vector<14x14xf32>
    %814 = arith.mulf %813, %755 : vector<14x14xf32>
    %815 = arith.addf %811, %814 : vector<14x14xf32>
    %c129 = arith.constant 129 : index
    %816 = memref.load %arg4[%c129] : memref<192xf32, #tpu.memory_space<smem>>
    %817 = vector.broadcast %816 : f32 to vector<14x14xf32>
    %818 = arith.mulf %817, %753 : vector<14x14xf32>
    %819 = arith.addf %728, %818 : vector<14x14xf32>
    %c130 = arith.constant 130 : index
    %820 = memref.load %arg4[%c130] : memref<192xf32, #tpu.memory_space<smem>>
    %821 = vector.broadcast %820 : f32 to vector<14x14xf32>
    %822 = arith.mulf %821, %754 : vector<14x14xf32>
    %823 = arith.addf %819, %822 : vector<14x14xf32>
    %c131 = arith.constant 131 : index
    %824 = memref.load %arg4[%c131] : memref<192xf32, #tpu.memory_space<smem>>
    %825 = vector.broadcast %824 : f32 to vector<14x14xf32>
    %826 = arith.mulf %825, %755 : vector<14x14xf32>
    %827 = arith.addf %823, %826 : vector<14x14xf32>
    %c153 = arith.constant 153 : index
    %828 = memref.load %arg4[%c153] : memref<192xf32, #tpu.memory_space<smem>>
    %829 = vector.broadcast %828 : f32 to vector<14x14xf32>
    %830 = arith.mulf %829, %753 : vector<14x14xf32>
    %831 = arith.addf %740, %830 : vector<14x14xf32>
    %c154 = arith.constant 154 : index
    %832 = memref.load %arg4[%c154] : memref<192xf32, #tpu.memory_space<smem>>
    %833 = vector.broadcast %832 : f32 to vector<14x14xf32>
    %834 = arith.mulf %833, %754 : vector<14x14xf32>
    %835 = arith.addf %831, %834 : vector<14x14xf32>
    %c155 = arith.constant 155 : index
    %836 = memref.load %arg4[%c155] : memref<192xf32, #tpu.memory_space<smem>>
    %837 = vector.broadcast %836 : f32 to vector<14x14xf32>
    %838 = arith.mulf %837, %755 : vector<14x14xf32>
    %839 = arith.addf %835, %838 : vector<14x14xf32>
    %c177 = arith.constant 177 : index
    %840 = memref.load %arg4[%c177] : memref<192xf32, #tpu.memory_space<smem>>
    %841 = vector.broadcast %840 : f32 to vector<14x14xf32>
    %842 = arith.mulf %841, %753 : vector<14x14xf32>
    %843 = arith.addf %752, %842 : vector<14x14xf32>
    %c178 = arith.constant 178 : index
    %844 = memref.load %arg4[%c178] : memref<192xf32, #tpu.memory_space<smem>>
    %845 = vector.broadcast %844 : f32 to vector<14x14xf32>
    %846 = arith.mulf %845, %754 : vector<14x14xf32>
    %847 = arith.addf %843, %846 : vector<14x14xf32>
    %c179 = arith.constant 179 : index
    %848 = memref.load %arg4[%c179] : memref<192xf32, #tpu.memory_space<smem>>
    %849 = vector.broadcast %848 : f32 to vector<14x14xf32>
    %850 = arith.mulf %849, %755 : vector<14x14xf32>
    %851 = arith.addf %847, %850 : vector<14x14xf32>
    %852 = vector.extract_strided_slice %433 {offsets = [0, 0], sizes = [14, 14], strides = [1, 1]} : vector<14x16xf32> to vector<14x14xf32>
    %853 = vector.extract_strided_slice %433 {offsets = [0, 1], sizes = [14, 14], strides = [1, 1]} : vector<14x16xf32> to vector<14x14xf32>
    %854 = vector.extract_strided_slice %433 {offsets = [0, 2], sizes = [14, 14], strides = [1, 1]} : vector<14x16xf32> to vector<14x14xf32>
    %c12_119 = arith.constant 12 : index
    %855 = memref.load %arg4[%c12_119] : memref<192xf32, #tpu.memory_space<smem>>
    %856 = vector.broadcast %855 : f32 to vector<14x14xf32>
    %857 = arith.mulf %856, %852 : vector<14x14xf32>
    %858 = arith.addf %767, %857 : vector<14x14xf32>
    %c13_120 = arith.constant 13 : index
    %859 = memref.load %arg4[%c13_120] : memref<192xf32, #tpu.memory_space<smem>>
    %860 = vector.broadcast %859 : f32 to vector<14x14xf32>
    %861 = arith.mulf %860, %853 : vector<14x14xf32>
    %862 = arith.addf %858, %861 : vector<14x14xf32>
    %c14_121 = arith.constant 14 : index
    %863 = memref.load %arg4[%c14_121] : memref<192xf32, #tpu.memory_space<smem>>
    %864 = vector.broadcast %863 : f32 to vector<14x14xf32>
    %865 = arith.mulf %864, %854 : vector<14x14xf32>
    %866 = arith.addf %862, %865 : vector<14x14xf32>
    %c36_122 = arith.constant 36 : index
    %867 = memref.load %arg4[%c36_122] : memref<192xf32, #tpu.memory_space<smem>>
    %868 = vector.broadcast %867 : f32 to vector<14x14xf32>
    %869 = arith.mulf %868, %852 : vector<14x14xf32>
    %870 = arith.addf %779, %869 : vector<14x14xf32>
    %c37_123 = arith.constant 37 : index
    %871 = memref.load %arg4[%c37_123] : memref<192xf32, #tpu.memory_space<smem>>
    %872 = vector.broadcast %871 : f32 to vector<14x14xf32>
    %873 = arith.mulf %872, %853 : vector<14x14xf32>
    %874 = arith.addf %870, %873 : vector<14x14xf32>
    %c38_124 = arith.constant 38 : index
    %875 = memref.load %arg4[%c38_124] : memref<192xf32, #tpu.memory_space<smem>>
    %876 = vector.broadcast %875 : f32 to vector<14x14xf32>
    %877 = arith.mulf %876, %854 : vector<14x14xf32>
    %878 = arith.addf %874, %877 : vector<14x14xf32>
    %c60_125 = arith.constant 60 : index
    %879 = memref.load %arg4[%c60_125] : memref<192xf32, #tpu.memory_space<smem>>
    %880 = vector.broadcast %879 : f32 to vector<14x14xf32>
    %881 = arith.mulf %880, %852 : vector<14x14xf32>
    %882 = arith.addf %791, %881 : vector<14x14xf32>
    %c61_126 = arith.constant 61 : index
    %883 = memref.load %arg4[%c61_126] : memref<192xf32, #tpu.memory_space<smem>>
    %884 = vector.broadcast %883 : f32 to vector<14x14xf32>
    %885 = arith.mulf %884, %853 : vector<14x14xf32>
    %886 = arith.addf %882, %885 : vector<14x14xf32>
    %c62_127 = arith.constant 62 : index
    %887 = memref.load %arg4[%c62_127] : memref<192xf32, #tpu.memory_space<smem>>
    %888 = vector.broadcast %887 : f32 to vector<14x14xf32>
    %889 = arith.mulf %888, %854 : vector<14x14xf32>
    %890 = arith.addf %886, %889 : vector<14x14xf32>
    %c84_128 = arith.constant 84 : index
    %891 = memref.load %arg4[%c84_128] : memref<192xf32, #tpu.memory_space<smem>>
    %892 = vector.broadcast %891 : f32 to vector<14x14xf32>
    %893 = arith.mulf %892, %852 : vector<14x14xf32>
    %894 = arith.addf %803, %893 : vector<14x14xf32>
    %c85_129 = arith.constant 85 : index
    %895 = memref.load %arg4[%c85_129] : memref<192xf32, #tpu.memory_space<smem>>
    %896 = vector.broadcast %895 : f32 to vector<14x14xf32>
    %897 = arith.mulf %896, %853 : vector<14x14xf32>
    %898 = arith.addf %894, %897 : vector<14x14xf32>
    %c86_130 = arith.constant 86 : index
    %899 = memref.load %arg4[%c86_130] : memref<192xf32, #tpu.memory_space<smem>>
    %900 = vector.broadcast %899 : f32 to vector<14x14xf32>
    %901 = arith.mulf %900, %854 : vector<14x14xf32>
    %902 = arith.addf %898, %901 : vector<14x14xf32>
    %c108 = arith.constant 108 : index
    %903 = memref.load %arg4[%c108] : memref<192xf32, #tpu.memory_space<smem>>
    %904 = vector.broadcast %903 : f32 to vector<14x14xf32>
    %905 = arith.mulf %904, %852 : vector<14x14xf32>
    %906 = arith.addf %815, %905 : vector<14x14xf32>
    %c109 = arith.constant 109 : index
    %907 = memref.load %arg4[%c109] : memref<192xf32, #tpu.memory_space<smem>>
    %908 = vector.broadcast %907 : f32 to vector<14x14xf32>
    %909 = arith.mulf %908, %853 : vector<14x14xf32>
    %910 = arith.addf %906, %909 : vector<14x14xf32>
    %c110 = arith.constant 110 : index
    %911 = memref.load %arg4[%c110] : memref<192xf32, #tpu.memory_space<smem>>
    %912 = vector.broadcast %911 : f32 to vector<14x14xf32>
    %913 = arith.mulf %912, %854 : vector<14x14xf32>
    %914 = arith.addf %910, %913 : vector<14x14xf32>
    %c132 = arith.constant 132 : index
    %915 = memref.load %arg4[%c132] : memref<192xf32, #tpu.memory_space<smem>>
    %916 = vector.broadcast %915 : f32 to vector<14x14xf32>
    %917 = arith.mulf %916, %852 : vector<14x14xf32>
    %918 = arith.addf %827, %917 : vector<14x14xf32>
    %c133 = arith.constant 133 : index
    %919 = memref.load %arg4[%c133] : memref<192xf32, #tpu.memory_space<smem>>
    %920 = vector.broadcast %919 : f32 to vector<14x14xf32>
    %921 = arith.mulf %920, %853 : vector<14x14xf32>
    %922 = arith.addf %918, %921 : vector<14x14xf32>
    %c134 = arith.constant 134 : index
    %923 = memref.load %arg4[%c134] : memref<192xf32, #tpu.memory_space<smem>>
    %924 = vector.broadcast %923 : f32 to vector<14x14xf32>
    %925 = arith.mulf %924, %854 : vector<14x14xf32>
    %926 = arith.addf %922, %925 : vector<14x14xf32>
    %c156 = arith.constant 156 : index
    %927 = memref.load %arg4[%c156] : memref<192xf32, #tpu.memory_space<smem>>
    %928 = vector.broadcast %927 : f32 to vector<14x14xf32>
    %929 = arith.mulf %928, %852 : vector<14x14xf32>
    %930 = arith.addf %839, %929 : vector<14x14xf32>
    %c157 = arith.constant 157 : index
    %931 = memref.load %arg4[%c157] : memref<192xf32, #tpu.memory_space<smem>>
    %932 = vector.broadcast %931 : f32 to vector<14x14xf32>
    %933 = arith.mulf %932, %853 : vector<14x14xf32>
    %934 = arith.addf %930, %933 : vector<14x14xf32>
    %c158 = arith.constant 158 : index
    %935 = memref.load %arg4[%c158] : memref<192xf32, #tpu.memory_space<smem>>
    %936 = vector.broadcast %935 : f32 to vector<14x14xf32>
    %937 = arith.mulf %936, %854 : vector<14x14xf32>
    %938 = arith.addf %934, %937 : vector<14x14xf32>
    %c180 = arith.constant 180 : index
    %939 = memref.load %arg4[%c180] : memref<192xf32, #tpu.memory_space<smem>>
    %940 = vector.broadcast %939 : f32 to vector<14x14xf32>
    %941 = arith.mulf %940, %852 : vector<14x14xf32>
    %942 = arith.addf %851, %941 : vector<14x14xf32>
    %c181 = arith.constant 181 : index
    %943 = memref.load %arg4[%c181] : memref<192xf32, #tpu.memory_space<smem>>
    %944 = vector.broadcast %943 : f32 to vector<14x14xf32>
    %945 = arith.mulf %944, %853 : vector<14x14xf32>
    %946 = arith.addf %942, %945 : vector<14x14xf32>
    %c182 = arith.constant 182 : index
    %947 = memref.load %arg4[%c182] : memref<192xf32, #tpu.memory_space<smem>>
    %948 = vector.broadcast %947 : f32 to vector<14x14xf32>
    %949 = arith.mulf %948, %854 : vector<14x14xf32>
    %950 = arith.addf %946, %949 : vector<14x14xf32>
    %951 = vector.extract_strided_slice %435 {offsets = [0, 0], sizes = [14, 14], strides = [1, 1]} : vector<14x16xf32> to vector<14x14xf32>
    %952 = vector.extract_strided_slice %435 {offsets = [0, 1], sizes = [14, 14], strides = [1, 1]} : vector<14x16xf32> to vector<14x14xf32>
    %953 = vector.extract_strided_slice %435 {offsets = [0, 2], sizes = [14, 14], strides = [1, 1]} : vector<14x16xf32> to vector<14x14xf32>
    %c15_131 = arith.constant 15 : index
    %954 = memref.load %arg4[%c15_131] : memref<192xf32, #tpu.memory_space<smem>>
    %955 = vector.broadcast %954 : f32 to vector<14x14xf32>
    %956 = arith.mulf %955, %951 : vector<14x14xf32>
    %957 = arith.addf %866, %956 : vector<14x14xf32>
    %c16_132 = arith.constant 16 : index
    %958 = memref.load %arg4[%c16_132] : memref<192xf32, #tpu.memory_space<smem>>
    %959 = vector.broadcast %958 : f32 to vector<14x14xf32>
    %960 = arith.mulf %959, %952 : vector<14x14xf32>
    %961 = arith.addf %957, %960 : vector<14x14xf32>
    %c17_133 = arith.constant 17 : index
    %962 = memref.load %arg4[%c17_133] : memref<192xf32, #tpu.memory_space<smem>>
    %963 = vector.broadcast %962 : f32 to vector<14x14xf32>
    %964 = arith.mulf %963, %953 : vector<14x14xf32>
    %965 = arith.addf %961, %964 : vector<14x14xf32>
    %c39_134 = arith.constant 39 : index
    %966 = memref.load %arg4[%c39_134] : memref<192xf32, #tpu.memory_space<smem>>
    %967 = vector.broadcast %966 : f32 to vector<14x14xf32>
    %968 = arith.mulf %967, %951 : vector<14x14xf32>
    %969 = arith.addf %878, %968 : vector<14x14xf32>
    %c40_135 = arith.constant 40 : index
    %970 = memref.load %arg4[%c40_135] : memref<192xf32, #tpu.memory_space<smem>>
    %971 = vector.broadcast %970 : f32 to vector<14x14xf32>
    %972 = arith.mulf %971, %952 : vector<14x14xf32>
    %973 = arith.addf %969, %972 : vector<14x14xf32>
    %c41_136 = arith.constant 41 : index
    %974 = memref.load %arg4[%c41_136] : memref<192xf32, #tpu.memory_space<smem>>
    %975 = vector.broadcast %974 : f32 to vector<14x14xf32>
    %976 = arith.mulf %975, %953 : vector<14x14xf32>
    %977 = arith.addf %973, %976 : vector<14x14xf32>
    %c63_137 = arith.constant 63 : index
    %978 = memref.load %arg4[%c63_137] : memref<192xf32, #tpu.memory_space<smem>>
    %979 = vector.broadcast %978 : f32 to vector<14x14xf32>
    %980 = arith.mulf %979, %951 : vector<14x14xf32>
    %981 = arith.addf %890, %980 : vector<14x14xf32>
    %c64_138 = arith.constant 64 : index
    %982 = memref.load %arg4[%c64_138] : memref<192xf32, #tpu.memory_space<smem>>
    %983 = vector.broadcast %982 : f32 to vector<14x14xf32>
    %984 = arith.mulf %983, %952 : vector<14x14xf32>
    %985 = arith.addf %981, %984 : vector<14x14xf32>
    %c65_139 = arith.constant 65 : index
    %986 = memref.load %arg4[%c65_139] : memref<192xf32, #tpu.memory_space<smem>>
    %987 = vector.broadcast %986 : f32 to vector<14x14xf32>
    %988 = arith.mulf %987, %953 : vector<14x14xf32>
    %989 = arith.addf %985, %988 : vector<14x14xf32>
    %c87_140 = arith.constant 87 : index
    %990 = memref.load %arg4[%c87_140] : memref<192xf32, #tpu.memory_space<smem>>
    %991 = vector.broadcast %990 : f32 to vector<14x14xf32>
    %992 = arith.mulf %991, %951 : vector<14x14xf32>
    %993 = arith.addf %902, %992 : vector<14x14xf32>
    %c88_141 = arith.constant 88 : index
    %994 = memref.load %arg4[%c88_141] : memref<192xf32, #tpu.memory_space<smem>>
    %995 = vector.broadcast %994 : f32 to vector<14x14xf32>
    %996 = arith.mulf %995, %952 : vector<14x14xf32>
    %997 = arith.addf %993, %996 : vector<14x14xf32>
    %c89_142 = arith.constant 89 : index
    %998 = memref.load %arg4[%c89_142] : memref<192xf32, #tpu.memory_space<smem>>
    %999 = vector.broadcast %998 : f32 to vector<14x14xf32>
    %1000 = arith.mulf %999, %953 : vector<14x14xf32>
    %1001 = arith.addf %997, %1000 : vector<14x14xf32>
    %c111 = arith.constant 111 : index
    %1002 = memref.load %arg4[%c111] : memref<192xf32, #tpu.memory_space<smem>>
    %1003 = vector.broadcast %1002 : f32 to vector<14x14xf32>
    %1004 = arith.mulf %1003, %951 : vector<14x14xf32>
    %1005 = arith.addf %914, %1004 : vector<14x14xf32>
    %c112 = arith.constant 112 : index
    %1006 = memref.load %arg4[%c112] : memref<192xf32, #tpu.memory_space<smem>>
    %1007 = vector.broadcast %1006 : f32 to vector<14x14xf32>
    %1008 = arith.mulf %1007, %952 : vector<14x14xf32>
    %1009 = arith.addf %1005, %1008 : vector<14x14xf32>
    %c113 = arith.constant 113 : index
    %1010 = memref.load %arg4[%c113] : memref<192xf32, #tpu.memory_space<smem>>
    %1011 = vector.broadcast %1010 : f32 to vector<14x14xf32>
    %1012 = arith.mulf %1011, %953 : vector<14x14xf32>
    %1013 = arith.addf %1009, %1012 : vector<14x14xf32>
    %c135 = arith.constant 135 : index
    %1014 = memref.load %arg4[%c135] : memref<192xf32, #tpu.memory_space<smem>>
    %1015 = vector.broadcast %1014 : f32 to vector<14x14xf32>
    %1016 = arith.mulf %1015, %951 : vector<14x14xf32>
    %1017 = arith.addf %926, %1016 : vector<14x14xf32>
    %c136 = arith.constant 136 : index
    %1018 = memref.load %arg4[%c136] : memref<192xf32, #tpu.memory_space<smem>>
    %1019 = vector.broadcast %1018 : f32 to vector<14x14xf32>
    %1020 = arith.mulf %1019, %952 : vector<14x14xf32>
    %1021 = arith.addf %1017, %1020 : vector<14x14xf32>
    %c137 = arith.constant 137 : index
    %1022 = memref.load %arg4[%c137] : memref<192xf32, #tpu.memory_space<smem>>
    %1023 = vector.broadcast %1022 : f32 to vector<14x14xf32>
    %1024 = arith.mulf %1023, %953 : vector<14x14xf32>
    %1025 = arith.addf %1021, %1024 : vector<14x14xf32>
    %c159 = arith.constant 159 : index
    %1026 = memref.load %arg4[%c159] : memref<192xf32, #tpu.memory_space<smem>>
    %1027 = vector.broadcast %1026 : f32 to vector<14x14xf32>
    %1028 = arith.mulf %1027, %951 : vector<14x14xf32>
    %1029 = arith.addf %938, %1028 : vector<14x14xf32>
    %c160 = arith.constant 160 : index
    %1030 = memref.load %arg4[%c160] : memref<192xf32, #tpu.memory_space<smem>>
    %1031 = vector.broadcast %1030 : f32 to vector<14x14xf32>
    %1032 = arith.mulf %1031, %952 : vector<14x14xf32>
    %1033 = arith.addf %1029, %1032 : vector<14x14xf32>
    %c161 = arith.constant 161 : index
    %1034 = memref.load %arg4[%c161] : memref<192xf32, #tpu.memory_space<smem>>
    %1035 = vector.broadcast %1034 : f32 to vector<14x14xf32>
    %1036 = arith.mulf %1035, %953 : vector<14x14xf32>
    %1037 = arith.addf %1033, %1036 : vector<14x14xf32>
    %c183 = arith.constant 183 : index
    %1038 = memref.load %arg4[%c183] : memref<192xf32, #tpu.memory_space<smem>>
    %1039 = vector.broadcast %1038 : f32 to vector<14x14xf32>
    %1040 = arith.mulf %1039, %951 : vector<14x14xf32>
    %1041 = arith.addf %950, %1040 : vector<14x14xf32>
    %c184 = arith.constant 184 : index
    %1042 = memref.load %arg4[%c184] : memref<192xf32, #tpu.memory_space<smem>>
    %1043 = vector.broadcast %1042 : f32 to vector<14x14xf32>
    %1044 = arith.mulf %1043, %952 : vector<14x14xf32>
    %1045 = arith.addf %1041, %1044 : vector<14x14xf32>
    %c185 = arith.constant 185 : index
    %1046 = memref.load %arg4[%c185] : memref<192xf32, #tpu.memory_space<smem>>
    %1047 = vector.broadcast %1046 : f32 to vector<14x14xf32>
    %1048 = arith.mulf %1047, %953 : vector<14x14xf32>
    %1049 = arith.addf %1045, %1048 : vector<14x14xf32>
    %1050 = vector.extract_strided_slice %437 {offsets = [0, 0], sizes = [14, 14], strides = [1, 1]} : vector<14x16xf32> to vector<14x14xf32>
    %1051 = vector.extract_strided_slice %437 {offsets = [0, 1], sizes = [14, 14], strides = [1, 1]} : vector<14x16xf32> to vector<14x14xf32>
    %1052 = vector.extract_strided_slice %437 {offsets = [0, 2], sizes = [14, 14], strides = [1, 1]} : vector<14x16xf32> to vector<14x14xf32>
    %c18_143 = arith.constant 18 : index
    %1053 = memref.load %arg4[%c18_143] : memref<192xf32, #tpu.memory_space<smem>>
    %1054 = vector.broadcast %1053 : f32 to vector<14x14xf32>
    %1055 = arith.mulf %1054, %1050 : vector<14x14xf32>
    %1056 = arith.addf %965, %1055 : vector<14x14xf32>
    %c19_144 = arith.constant 19 : index
    %1057 = memref.load %arg4[%c19_144] : memref<192xf32, #tpu.memory_space<smem>>
    %1058 = vector.broadcast %1057 : f32 to vector<14x14xf32>
    %1059 = arith.mulf %1058, %1051 : vector<14x14xf32>
    %1060 = arith.addf %1056, %1059 : vector<14x14xf32>
    %c20_145 = arith.constant 20 : index
    %1061 = memref.load %arg4[%c20_145] : memref<192xf32, #tpu.memory_space<smem>>
    %1062 = vector.broadcast %1061 : f32 to vector<14x14xf32>
    %1063 = arith.mulf %1062, %1052 : vector<14x14xf32>
    %1064 = arith.addf %1060, %1063 : vector<14x14xf32>
    %c42_146 = arith.constant 42 : index
    %1065 = memref.load %arg4[%c42_146] : memref<192xf32, #tpu.memory_space<smem>>
    %1066 = vector.broadcast %1065 : f32 to vector<14x14xf32>
    %1067 = arith.mulf %1066, %1050 : vector<14x14xf32>
    %1068 = arith.addf %977, %1067 : vector<14x14xf32>
    %c43_147 = arith.constant 43 : index
    %1069 = memref.load %arg4[%c43_147] : memref<192xf32, #tpu.memory_space<smem>>
    %1070 = vector.broadcast %1069 : f32 to vector<14x14xf32>
    %1071 = arith.mulf %1070, %1051 : vector<14x14xf32>
    %1072 = arith.addf %1068, %1071 : vector<14x14xf32>
    %c44_148 = arith.constant 44 : index
    %1073 = memref.load %arg4[%c44_148] : memref<192xf32, #tpu.memory_space<smem>>
    %1074 = vector.broadcast %1073 : f32 to vector<14x14xf32>
    %1075 = arith.mulf %1074, %1052 : vector<14x14xf32>
    %1076 = arith.addf %1072, %1075 : vector<14x14xf32>
    %c66_149 = arith.constant 66 : index
    %1077 = memref.load %arg4[%c66_149] : memref<192xf32, #tpu.memory_space<smem>>
    %1078 = vector.broadcast %1077 : f32 to vector<14x14xf32>
    %1079 = arith.mulf %1078, %1050 : vector<14x14xf32>
    %1080 = arith.addf %989, %1079 : vector<14x14xf32>
    %c67_150 = arith.constant 67 : index
    %1081 = memref.load %arg4[%c67_150] : memref<192xf32, #tpu.memory_space<smem>>
    %1082 = vector.broadcast %1081 : f32 to vector<14x14xf32>
    %1083 = arith.mulf %1082, %1051 : vector<14x14xf32>
    %1084 = arith.addf %1080, %1083 : vector<14x14xf32>
    %c68_151 = arith.constant 68 : index
    %1085 = memref.load %arg4[%c68_151] : memref<192xf32, #tpu.memory_space<smem>>
    %1086 = vector.broadcast %1085 : f32 to vector<14x14xf32>
    %1087 = arith.mulf %1086, %1052 : vector<14x14xf32>
    %1088 = arith.addf %1084, %1087 : vector<14x14xf32>
    %c90_152 = arith.constant 90 : index
    %1089 = memref.load %arg4[%c90_152] : memref<192xf32, #tpu.memory_space<smem>>
    %1090 = vector.broadcast %1089 : f32 to vector<14x14xf32>
    %1091 = arith.mulf %1090, %1050 : vector<14x14xf32>
    %1092 = arith.addf %1001, %1091 : vector<14x14xf32>
    %c91_153 = arith.constant 91 : index
    %1093 = memref.load %arg4[%c91_153] : memref<192xf32, #tpu.memory_space<smem>>
    %1094 = vector.broadcast %1093 : f32 to vector<14x14xf32>
    %1095 = arith.mulf %1094, %1051 : vector<14x14xf32>
    %1096 = arith.addf %1092, %1095 : vector<14x14xf32>
    %c92_154 = arith.constant 92 : index
    %1097 = memref.load %arg4[%c92_154] : memref<192xf32, #tpu.memory_space<smem>>
    %1098 = vector.broadcast %1097 : f32 to vector<14x14xf32>
    %1099 = arith.mulf %1098, %1052 : vector<14x14xf32>
    %1100 = arith.addf %1096, %1099 : vector<14x14xf32>
    %c114 = arith.constant 114 : index
    %1101 = memref.load %arg4[%c114] : memref<192xf32, #tpu.memory_space<smem>>
    %1102 = vector.broadcast %1101 : f32 to vector<14x14xf32>
    %1103 = arith.mulf %1102, %1050 : vector<14x14xf32>
    %1104 = arith.addf %1013, %1103 : vector<14x14xf32>
    %c115 = arith.constant 115 : index
    %1105 = memref.load %arg4[%c115] : memref<192xf32, #tpu.memory_space<smem>>
    %1106 = vector.broadcast %1105 : f32 to vector<14x14xf32>
    %1107 = arith.mulf %1106, %1051 : vector<14x14xf32>
    %1108 = arith.addf %1104, %1107 : vector<14x14xf32>
    %c116 = arith.constant 116 : index
    %1109 = memref.load %arg4[%c116] : memref<192xf32, #tpu.memory_space<smem>>
    %1110 = vector.broadcast %1109 : f32 to vector<14x14xf32>
    %1111 = arith.mulf %1110, %1052 : vector<14x14xf32>
    %1112 = arith.addf %1108, %1111 : vector<14x14xf32>
    %c138 = arith.constant 138 : index
    %1113 = memref.load %arg4[%c138] : memref<192xf32, #tpu.memory_space<smem>>
    %1114 = vector.broadcast %1113 : f32 to vector<14x14xf32>
    %1115 = arith.mulf %1114, %1050 : vector<14x14xf32>
    %1116 = arith.addf %1025, %1115 : vector<14x14xf32>
    %c139 = arith.constant 139 : index
    %1117 = memref.load %arg4[%c139] : memref<192xf32, #tpu.memory_space<smem>>
    %1118 = vector.broadcast %1117 : f32 to vector<14x14xf32>
    %1119 = arith.mulf %1118, %1051 : vector<14x14xf32>
    %1120 = arith.addf %1116, %1119 : vector<14x14xf32>
    %c140 = arith.constant 140 : index
    %1121 = memref.load %arg4[%c140] : memref<192xf32, #tpu.memory_space<smem>>
    %1122 = vector.broadcast %1121 : f32 to vector<14x14xf32>
    %1123 = arith.mulf %1122, %1052 : vector<14x14xf32>
    %1124 = arith.addf %1120, %1123 : vector<14x14xf32>
    %c162 = arith.constant 162 : index
    %1125 = memref.load %arg4[%c162] : memref<192xf32, #tpu.memory_space<smem>>
    %1126 = vector.broadcast %1125 : f32 to vector<14x14xf32>
    %1127 = arith.mulf %1126, %1050 : vector<14x14xf32>
    %1128 = arith.addf %1037, %1127 : vector<14x14xf32>
    %c163 = arith.constant 163 : index
    %1129 = memref.load %arg4[%c163] : memref<192xf32, #tpu.memory_space<smem>>
    %1130 = vector.broadcast %1129 : f32 to vector<14x14xf32>
    %1131 = arith.mulf %1130, %1051 : vector<14x14xf32>
    %1132 = arith.addf %1128, %1131 : vector<14x14xf32>
    %c164 = arith.constant 164 : index
    %1133 = memref.load %arg4[%c164] : memref<192xf32, #tpu.memory_space<smem>>
    %1134 = vector.broadcast %1133 : f32 to vector<14x14xf32>
    %1135 = arith.mulf %1134, %1052 : vector<14x14xf32>
    %1136 = arith.addf %1132, %1135 : vector<14x14xf32>
    %c186 = arith.constant 186 : index
    %1137 = memref.load %arg4[%c186] : memref<192xf32, #tpu.memory_space<smem>>
    %1138 = vector.broadcast %1137 : f32 to vector<14x14xf32>
    %1139 = arith.mulf %1138, %1050 : vector<14x14xf32>
    %1140 = arith.addf %1049, %1139 : vector<14x14xf32>
    %c187 = arith.constant 187 : index
    %1141 = memref.load %arg4[%c187] : memref<192xf32, #tpu.memory_space<smem>>
    %1142 = vector.broadcast %1141 : f32 to vector<14x14xf32>
    %1143 = arith.mulf %1142, %1051 : vector<14x14xf32>
    %1144 = arith.addf %1140, %1143 : vector<14x14xf32>
    %c188 = arith.constant 188 : index
    %1145 = memref.load %arg4[%c188] : memref<192xf32, #tpu.memory_space<smem>>
    %1146 = vector.broadcast %1145 : f32 to vector<14x14xf32>
    %1147 = arith.mulf %1146, %1052 : vector<14x14xf32>
    %1148 = arith.addf %1144, %1147 : vector<14x14xf32>
    %1149 = vector.extract_strided_slice %439 {offsets = [0, 0], sizes = [14, 14], strides = [1, 1]} : vector<14x16xf32> to vector<14x14xf32>
    %1150 = vector.extract_strided_slice %439 {offsets = [0, 1], sizes = [14, 14], strides = [1, 1]} : vector<14x16xf32> to vector<14x14xf32>
    %1151 = vector.extract_strided_slice %439 {offsets = [0, 2], sizes = [14, 14], strides = [1, 1]} : vector<14x16xf32> to vector<14x14xf32>
    %c21_155 = arith.constant 21 : index
    %1152 = memref.load %arg4[%c21_155] : memref<192xf32, #tpu.memory_space<smem>>
    %1153 = vector.broadcast %1152 : f32 to vector<14x14xf32>
    %1154 = arith.mulf %1153, %1149 : vector<14x14xf32>
    %1155 = arith.addf %1064, %1154 : vector<14x14xf32>
    %c22_156 = arith.constant 22 : index
    %1156 = memref.load %arg4[%c22_156] : memref<192xf32, #tpu.memory_space<smem>>
    %1157 = vector.broadcast %1156 : f32 to vector<14x14xf32>
    %1158 = arith.mulf %1157, %1150 : vector<14x14xf32>
    %1159 = arith.addf %1155, %1158 : vector<14x14xf32>
    %c23_157 = arith.constant 23 : index
    %1160 = memref.load %arg4[%c23_157] : memref<192xf32, #tpu.memory_space<smem>>
    %1161 = vector.broadcast %1160 : f32 to vector<14x14xf32>
    %1162 = arith.mulf %1161, %1151 : vector<14x14xf32>
    %1163 = arith.addf %1159, %1162 : vector<14x14xf32>
    %c45_158 = arith.constant 45 : index
    %1164 = memref.load %arg4[%c45_158] : memref<192xf32, #tpu.memory_space<smem>>
    %1165 = vector.broadcast %1164 : f32 to vector<14x14xf32>
    %1166 = arith.mulf %1165, %1149 : vector<14x14xf32>
    %1167 = arith.addf %1076, %1166 : vector<14x14xf32>
    %c46_159 = arith.constant 46 : index
    %1168 = memref.load %arg4[%c46_159] : memref<192xf32, #tpu.memory_space<smem>>
    %1169 = vector.broadcast %1168 : f32 to vector<14x14xf32>
    %1170 = arith.mulf %1169, %1150 : vector<14x14xf32>
    %1171 = arith.addf %1167, %1170 : vector<14x14xf32>
    %c47_160 = arith.constant 47 : index
    %1172 = memref.load %arg4[%c47_160] : memref<192xf32, #tpu.memory_space<smem>>
    %1173 = vector.broadcast %1172 : f32 to vector<14x14xf32>
    %1174 = arith.mulf %1173, %1151 : vector<14x14xf32>
    %1175 = arith.addf %1171, %1174 : vector<14x14xf32>
    %c69_161 = arith.constant 69 : index
    %1176 = memref.load %arg4[%c69_161] : memref<192xf32, #tpu.memory_space<smem>>
    %1177 = vector.broadcast %1176 : f32 to vector<14x14xf32>
    %1178 = arith.mulf %1177, %1149 : vector<14x14xf32>
    %1179 = arith.addf %1088, %1178 : vector<14x14xf32>
    %c70_162 = arith.constant 70 : index
    %1180 = memref.load %arg4[%c70_162] : memref<192xf32, #tpu.memory_space<smem>>
    %1181 = vector.broadcast %1180 : f32 to vector<14x14xf32>
    %1182 = arith.mulf %1181, %1150 : vector<14x14xf32>
    %1183 = arith.addf %1179, %1182 : vector<14x14xf32>
    %c71_163 = arith.constant 71 : index
    %1184 = memref.load %arg4[%c71_163] : memref<192xf32, #tpu.memory_space<smem>>
    %1185 = vector.broadcast %1184 : f32 to vector<14x14xf32>
    %1186 = arith.mulf %1185, %1151 : vector<14x14xf32>
    %1187 = arith.addf %1183, %1186 : vector<14x14xf32>
    %c93_164 = arith.constant 93 : index
    %1188 = memref.load %arg4[%c93_164] : memref<192xf32, #tpu.memory_space<smem>>
    %1189 = vector.broadcast %1188 : f32 to vector<14x14xf32>
    %1190 = arith.mulf %1189, %1149 : vector<14x14xf32>
    %1191 = arith.addf %1100, %1190 : vector<14x14xf32>
    %c94_165 = arith.constant 94 : index
    %1192 = memref.load %arg4[%c94_165] : memref<192xf32, #tpu.memory_space<smem>>
    %1193 = vector.broadcast %1192 : f32 to vector<14x14xf32>
    %1194 = arith.mulf %1193, %1150 : vector<14x14xf32>
    %1195 = arith.addf %1191, %1194 : vector<14x14xf32>
    %c95_166 = arith.constant 95 : index
    %1196 = memref.load %arg4[%c95_166] : memref<192xf32, #tpu.memory_space<smem>>
    %1197 = vector.broadcast %1196 : f32 to vector<14x14xf32>
    %1198 = arith.mulf %1197, %1151 : vector<14x14xf32>
    %1199 = arith.addf %1195, %1198 : vector<14x14xf32>
    %c117 = arith.constant 117 : index
    %1200 = memref.load %arg4[%c117] : memref<192xf32, #tpu.memory_space<smem>>
    %1201 = vector.broadcast %1200 : f32 to vector<14x14xf32>
    %1202 = arith.mulf %1201, %1149 : vector<14x14xf32>
    %1203 = arith.addf %1112, %1202 : vector<14x14xf32>
    %c118 = arith.constant 118 : index
    %1204 = memref.load %arg4[%c118] : memref<192xf32, #tpu.memory_space<smem>>
    %1205 = vector.broadcast %1204 : f32 to vector<14x14xf32>
    %1206 = arith.mulf %1205, %1150 : vector<14x14xf32>
    %1207 = arith.addf %1203, %1206 : vector<14x14xf32>
    %c119 = arith.constant 119 : index
    %1208 = memref.load %arg4[%c119] : memref<192xf32, #tpu.memory_space<smem>>
    %1209 = vector.broadcast %1208 : f32 to vector<14x14xf32>
    %1210 = arith.mulf %1209, %1151 : vector<14x14xf32>
    %1211 = arith.addf %1207, %1210 : vector<14x14xf32>
    %c141 = arith.constant 141 : index
    %1212 = memref.load %arg4[%c141] : memref<192xf32, #tpu.memory_space<smem>>
    %1213 = vector.broadcast %1212 : f32 to vector<14x14xf32>
    %1214 = arith.mulf %1213, %1149 : vector<14x14xf32>
    %1215 = arith.addf %1124, %1214 : vector<14x14xf32>
    %c142 = arith.constant 142 : index
    %1216 = memref.load %arg4[%c142] : memref<192xf32, #tpu.memory_space<smem>>
    %1217 = vector.broadcast %1216 : f32 to vector<14x14xf32>
    %1218 = arith.mulf %1217, %1150 : vector<14x14xf32>
    %1219 = arith.addf %1215, %1218 : vector<14x14xf32>
    %c143 = arith.constant 143 : index
    %1220 = memref.load %arg4[%c143] : memref<192xf32, #tpu.memory_space<smem>>
    %1221 = vector.broadcast %1220 : f32 to vector<14x14xf32>
    %1222 = arith.mulf %1221, %1151 : vector<14x14xf32>
    %1223 = arith.addf %1219, %1222 : vector<14x14xf32>
    %c165 = arith.constant 165 : index
    %1224 = memref.load %arg4[%c165] : memref<192xf32, #tpu.memory_space<smem>>
    %1225 = vector.broadcast %1224 : f32 to vector<14x14xf32>
    %1226 = arith.mulf %1225, %1149 : vector<14x14xf32>
    %1227 = arith.addf %1136, %1226 : vector<14x14xf32>
    %c166 = arith.constant 166 : index
    %1228 = memref.load %arg4[%c166] : memref<192xf32, #tpu.memory_space<smem>>
    %1229 = vector.broadcast %1228 : f32 to vector<14x14xf32>
    %1230 = arith.mulf %1229, %1150 : vector<14x14xf32>
    %1231 = arith.addf %1227, %1230 : vector<14x14xf32>
    %c167 = arith.constant 167 : index
    %1232 = memref.load %arg4[%c167] : memref<192xf32, #tpu.memory_space<smem>>
    %1233 = vector.broadcast %1232 : f32 to vector<14x14xf32>
    %1234 = arith.mulf %1233, %1151 : vector<14x14xf32>
    %1235 = arith.addf %1231, %1234 : vector<14x14xf32>
    %c189 = arith.constant 189 : index
    %1236 = memref.load %arg4[%c189] : memref<192xf32, #tpu.memory_space<smem>>
    %1237 = vector.broadcast %1236 : f32 to vector<14x14xf32>
    %1238 = arith.mulf %1237, %1149 : vector<14x14xf32>
    %1239 = arith.addf %1148, %1238 : vector<14x14xf32>
    %c190 = arith.constant 190 : index
    %1240 = memref.load %arg4[%c190] : memref<192xf32, #tpu.memory_space<smem>>
    %1241 = vector.broadcast %1240 : f32 to vector<14x14xf32>
    %1242 = arith.mulf %1241, %1150 : vector<14x14xf32>
    %1243 = arith.addf %1239, %1242 : vector<14x14xf32>
    %c191 = arith.constant 191 : index
    %1244 = memref.load %arg4[%c191] : memref<192xf32, #tpu.memory_space<smem>>
    %1245 = vector.broadcast %1244 : f32 to vector<14x14xf32>
    %1246 = arith.mulf %1245, %1151 : vector<14x14xf32>
    %1247 = arith.addf %1243, %1246 : vector<14x14xf32>
    %cst_167 = arith.constant 0.000000e+00 : f32
    %1248 = vector.broadcast %cst_167 : f32 to vector<14x14xf32>
    %1249 = arith.maximumf %1163, %1248 : vector<14x14xf32>
    %c0_168 = arith.constant 0 : index
    %c0_169 = arith.constant 0 : index
    %c0_170 = arith.constant 0 : index
    %c0_171 = arith.constant 0 : index
    %1250 = vector.load %arg6[%c0_168, %c0_169, %c0_170, %c0_171] : memref<1x8x14x14xf32, #tpu.memory_space<vmem>>, vector<1x1x14x14xf32>
    %1251 = vector.shape_cast %1250 : vector<1x1x14x14xf32> to vector<14x14xf32>
    %1252 = vector.shape_cast %1249 : vector<14x14xf32> to vector<1x1x14x14xf32>
    tpu.vector_store %arg6[%c0_168, %c0_169, %c0_170, %c0_171], %1252 {strides = array<i32>} : memref<1x8x14x14xf32, #tpu.memory_space<vmem>>, vector<1x1x14x14xf32>,
    %cst_172 = arith.constant 0.000000e+00 : f32
    %1253 = vector.broadcast %cst_172 : f32 to vector<14x14xf32>
    %1254 = arith.maximumf %1175, %1253 : vector<14x14xf32>
    %c0_173 = arith.constant 0 : index
    %c1_174 = arith.constant 1 : index
    %c0_175 = arith.constant 0 : index
    %c0_176 = arith.constant 0 : index
    %1255 = vector.load %arg6[%c0_173, %c1_174, %c0_175, %c0_176] : memref<1x8x14x14xf32, #tpu.memory_space<vmem>>, vector<1x1x14x14xf32>
    %1256 = vector.shape_cast %1255 : vector<1x1x14x14xf32> to vector<14x14xf32>
    %1257 = vector.shape_cast %1254 : vector<14x14xf32> to vector<1x1x14x14xf32>
    tpu.vector_store %arg6[%c0_173, %c1_174, %c0_175, %c0_176], %1257 {strides = array<i32>} : memref<1x8x14x14xf32, #tpu.memory_space<vmem>>, vector<1x1x14x14xf32>,
    %cst_177 = arith.constant 0.000000e+00 : f32
    %1258 = vector.broadcast %cst_177 : f32 to vector<14x14xf32>
    %1259 = arith.maximumf %1187, %1258 : vector<14x14xf32>
    %c0_178 = arith.constant 0 : index
    %c2_179 = arith.constant 2 : index
    %c0_180 = arith.constant 0 : index
    %c0_181 = arith.constant 0 : index
    %1260 = vector.load %arg6[%c0_178, %c2_179, %c0_180, %c0_181] : memref<1x8x14x14xf32, #tpu.memory_space<vmem>>, vector<1x1x14x14xf32>
    %1261 = vector.shape_cast %1260 : vector<1x1x14x14xf32> to vector<14x14xf32>
    %1262 = vector.shape_cast %1259 : vector<14x14xf32> to vector<1x1x14x14xf32>
    tpu.vector_store %arg6[%c0_178, %c2_179, %c0_180, %c0_181], %1262 {strides = array<i32>} : memref<1x8x14x14xf32, #tpu.memory_space<vmem>>, vector<1x1x14x14xf32>,
    %cst_182 = arith.constant 0.000000e+00 : f32
    %1263 = vector.broadcast %cst_182 : f32 to vector<14x14xf32>
    %1264 = arith.maximumf %1199, %1263 : vector<14x14xf32>
    %c0_183 = arith.constant 0 : index
    %c3_184 = arith.constant 3 : index
    %c0_185 = arith.constant 0 : index
    %c0_186 = arith.constant 0 : index
    %1265 = vector.load %arg6[%c0_183, %c3_184, %c0_185, %c0_186] : memref<1x8x14x14xf32, #tpu.memory_space<vmem>>, vector<1x1x14x14xf32>
    %1266 = vector.shape_cast %1265 : vector<1x1x14x14xf32> to vector<14x14xf32>
    %1267 = vector.shape_cast %1264 : vector<14x14xf32> to vector<1x1x14x14xf32>
    tpu.vector_store %arg6[%c0_183, %c3_184, %c0_185, %c0_186], %1267 {strides = array<i32>} : memref<1x8x14x14xf32, #tpu.memory_space<vmem>>, vector<1x1x14x14xf32>,
    %cst_187 = arith.constant 0.000000e+00 : f32
    %1268 = vector.broadcast %cst_187 : f32 to vector<14x14xf32>
    %1269 = arith.maximumf %1211, %1268 : vector<14x14xf32>
    %c0_188 = arith.constant 0 : index
    %c4_189 = arith.constant 4 : index
    %c0_190 = arith.constant 0 : index
    %c0_191 = arith.constant 0 : index
    %1270 = vector.load %arg6[%c0_188, %c4_189, %c0_190, %c0_191] : memref<1x8x14x14xf32, #tpu.memory_space<vmem>>, vector<1x1x14x14xf32>
    %1271 = vector.shape_cast %1270 : vector<1x1x14x14xf32> to vector<14x14xf32>
    %1272 = vector.shape_cast %1269 : vector<14x14xf32> to vector<1x1x14x14xf32>
    tpu.vector_store %arg6[%c0_188, %c4_189, %c0_190, %c0_191], %1272 {strides = array<i32>} : memref<1x8x14x14xf32, #tpu.memory_space<vmem>>, vector<1x1x14x14xf32>,
    %cst_192 = arith.constant 0.000000e+00 : f32
    %1273 = vector.broadcast %cst_192 : f32 to vector<14x14xf32>
    %1274 = arith.maximumf %1223, %1273 : vector<14x14xf32>
    %c0_193 = arith.constant 0 : index
    %c5_194 = arith.constant 5 : index
    %c0_195 = arith.constant 0 : index
    %c0_196 = arith.constant 0 : index
    %1275 = vector.load %arg6[%c0_193, %c5_194, %c0_195, %c0_196] : memref<1x8x14x14xf32, #tpu.memory_space<vmem>>, vector<1x1x14x14xf32>
    %1276 = vector.shape_cast %1275 : vector<1x1x14x14xf32> to vector<14x14xf32>
    %1277 = vector.shape_cast %1274 : vector<14x14xf32> to vector<1x1x14x14xf32>
    tpu.vector_store %arg6[%c0_193, %c5_194, %c0_195, %c0_196], %1277 {strides = array<i32>} : memref<1x8x14x14xf32, #tpu.memory_space<vmem>>, vector<1x1x14x14xf32>,
    %cst_197 = arith.constant 0.000000e+00 : f32
    %1278 = vector.broadcast %cst_197 : f32 to vector<14x14xf32>
    %1279 = arith.maximumf %1235, %1278 : vector<14x14xf32>
    %c0_198 = arith.constant 0 : index
    %c6_199 = arith.constant 6 : index
    %c0_200 = arith.constant 0 : index
    %c0_201 = arith.constant 0 : index
    %1280 = vector.load %arg6[%c0_198, %c6_199, %c0_200, %c0_201] : memref<1x8x14x14xf32, #tpu.memory_space<vmem>>, vector<1x1x14x14xf32>
    %1281 = vector.shape_cast %1280 : vector<1x1x14x14xf32> to vector<14x14xf32>
    %1282 = vector.shape_cast %1279 : vector<14x14xf32> to vector<1x1x14x14xf32>
    tpu.vector_store %arg6[%c0_198, %c6_199, %c0_200, %c0_201], %1282 {strides = array<i32>} : memref<1x8x14x14xf32, #tpu.memory_space<vmem>>, vector<1x1x14x14xf32>,
    %cst_202 = arith.constant 0.000000e+00 : f32
    %1283 = vector.broadcast %cst_202 : f32 to vector<14x14xf32>
    %1284 = arith.maximumf %1247, %1283 : vector<14x14xf32>
    %c0_203 = arith.constant 0 : index
    %c7_204 = arith.constant 7 : index
    %c0_205 = arith.constant 0 : index
    %c0_206 = arith.constant 0 : index
    %1285 = vector.load %arg6[%c0_203, %c7_204, %c0_205, %c0_206] : memref<1x8x14x14xf32, #tpu.memory_space<vmem>>, vector<1x1x14x14xf32>
    %1286 = vector.shape_cast %1285 : vector<1x1x14x14xf32> to vector<14x14xf32>
    %1287 = vector.shape_cast %1284 : vector<14x14xf32> to vector<1x1x14x14xf32>
    tpu.vector_store %arg6[%c0_203, %c7_204, %c0_205, %c0_206], %1287 {strides = array<i32>} : memref<1x8x14x14xf32, #tpu.memory_space<vmem>>, vector<1x1x14x14xf32>,
    return
  }
  func.func @transform_0(%arg0: i32) -> (i32, i32, i32, i32) {
    %c0_i32 = arith.constant 0 : i32
    %c0_i32_0 = arith.constant 0 : i32
    %c0_i32_1 = arith.constant 0 : i32
    %c0_i32_2 = arith.constant 0 : i32
    return %arg0, %c0_i32, %c0_i32_0, %c0_i32_1 : i32, i32, i32, i32
  }
  func.func @transform_1(%arg0: i32) -> i32 {
    %c0_i32 = arith.constant 0 : i32
    %c0_i32_0 = arith.constant 0 : i32
    return %c0_i32 : i32
  }
  func.func @transform_2(%arg0: i32) -> i32 {
    %c0_i32 = arith.constant 0 : i32
    %c0_i32_0 = arith.constant 0 : i32
    return %c0_i32 : i32
  }
  func.func @transform_3(%arg0: i32) -> i32 {
    %c0_i32 = arith.constant 0 : i32
    %c0_i32_0 = arith.constant 0 : i32
    return %c0_i32 : i32
  }
  func.func @transform_4(%arg0: i32) -> i32 {
    %c0_i32 = arith.constant 0 : i32
    %c0_i32_0 = arith.constant 0 : i32
    return %c0_i32 : i32
  }
  func.func @transform_5(%arg0: i32) -> (i32, i32, i32, i32) {
    %c0_i32 = arith.constant 0 : i32
    %c0_i32_0 = arith.constant 0 : i32
    %c0_i32_1 = arith.constant 0 : i32
    %c0_i32_2 = arith.constant 0 : i32
    return %arg0, %c0_i32, %c0_i32_0, %c0_i32_1 : i32, i32, i32, i32
  }
}

</mosaic_0001>

<bundles_post_ra>
// kernel: tpu_custom_call.1
= control target key start
LH: loop header
LB: loop body
LE: loop exit
PB: predicated region body
PF: predicated region fallthrough
CT: control target
= control target key end

     0   :  { %10 = vsyncpa [#allocation3], 0  ;;  %s6711_s0 = inlined_call_operand.hbm [shape: f32[2,4,16,16], index: 0, kind: input, shape index: {}]   ;;  %s6712_s1 = inlined_call_operand.vmem [shape: f32[96], index: 1, kind: input, shape index: {}]   ;;  %s6713_s2 = inlined_call_operand.vmem [shape: f32[8], index: 2, kind: input, shape index: {}]   ;;  %s6714_s3 = inlined_call_operand.vmem [shape: f32[192], index: 3, kind: input, shape index: {}]   ;;  %s6715_s4 = inlined_call_operand.vmem [shape: f32[8], index: 4, kind: input, shape index: {}]   ;;  %s6716_s5 = inlined_call_operand.vmem [shape: f32[2,8,14,14], index: 5, kind: output, shape index: {}]  }
   0x1   :  { %12 = vsyncpa [#allocation3 + $0x1], 0 }
   0x2   :  { %13 = vsyncpa [#allocation4], 0 }
   0x3   :  { %14 = vsyncpa [#allocation7], 0 }
   0x4   :  { %15 = vsyncpa [#allocation10], 0  ;;  %s3936_s18 = smov 0   ;;  %s3938_s19 = smov 0  }
   0x5   :  { %s3940_s20 = smov 0   ;;  %s3942_s21 = smov 0  }
   0x6 LB: > { %s3955_s22 = sadd.s32 4294967295, %s3895_s21   ;;  %p41_p0 = scmp.ne.s32.totalorder %s3887_s19, %s3883_s18  ;;  %s3895_s21 = sphi %s3942_s21, %s6956_s21   ;;  %s3891_s20 = sphi %s3940_s20, %s6955_s20   ;;  %s3887_s19 = sphi %s3938_s19, %s6954_s19   ;;  %s3883_s18 = sphi %s3936_s18, %s6953_s18  }
   0x7   : > { %p6717_p1 = scmp.eq.s32.totalorder %s3955_s22, 0  ;;  %p3274_p2 = scmp.ge.s32.totalorder %s3895_s21, 1 }
   0x8   : > { %p162_p3 = scmp.lt.s32.totalorder %s3895_s21, 3  ;;  %s186_s26 = sshll.u32 %s6713_s2, 4  ;;  %s187_s26 = int_to_ptr.vmem [resolvable:$true] %s186_s26 }
   0x9   : > { %p3963_p4 = por %p6717_p1, %p41_p0  ;;  %s175_s30 = sshll.u32 %s6712_s1, 4  ;;  %s176_s30 = int_to_ptr.vmem [resolvable:$true] %s175_s30 }
   0xa   : > { %p3970_p5 = pnand %p3274_p2, %p162_p3  ;;  %s197_s9 = sshll.u32 %s6714_s3, 4  ;;  %s3988_s9 = int_to_ptr.vmem [resolvable:$true] %s197_s9 }
   0xb   : > { %s6734_s23 = scalar_select %p3963_p4, 1, 0 }
   0xc   : > { %s6735_s27 = scalar_select %p3970_p5, 1, 0 }
   0xd   : > { %p3645_p6 = pneg %p3970_p5  ;;  %s208_s12 = sshll.u32 %s6715_s4, 4  ;;  %s209_s12 = int_to_ptr.vmem [resolvable:$true] %s208_s12 }
   0xe   : > { %s3759_s13 = scalar_lea.vmem %s187_s26, 16  ;;  %p3767_p12 = scmp.lt.s32.totalorder %s187_s26, %s187_s26 }
   0xf   : > { %p3981_p7 = pnand %p3645_p6, %p6717_p1  ;;  %p3760_p8 = scmp.ne.s32.totalorder %s187_s26, %s3759_s13 }
  0x10   : > { %p3768_p13 = scmp.lt.s32.totalorder %s3759_s13, %s3759_s13 }
  0x11   : > { %p3761_p9 = pneg %p3981_p7 }
  0x12   : > { %p3769_p0 = por %p3768_p13, %p3767_p12 }
  0x13   : > { %p3762_p10 = pnand %p3761_p9, %p3760_p8 }
  0x15   : > { %p3763_p11 = pneg %p3762_p10 }
  0x17   : > { %p3770_p2 = pnand %p3769_p0, %p3763_p11 }
  0x19   : > { %3773 = shalt.err (!%p3770_p2)
}
  0x1a   : > { %s3897_s14 = smov [#allocation6]   ;;  %s3774_s15 = scalar_lea.vmem %s176_s30, 16 }
  0x1b   : > { %3651 = dma.vmem_to_smem (!%p3981_p7), %s187_s26, 16, %s3897_s14, [#allocation7]  }
  0x1c   : > { %p3775_p3 = scmp.ne.s32.totalorder %s176_s30, %s3774_s15  ;;  %p3782_p4 = scmp.lt.s32.totalorder %s176_s30, %s176_s30 }
  0x1d   : > { %p3783_p5 = scmp.lt.s32.totalorder %s3774_s15, %s3774_s15 }
  0x1e   : > { %p3777_p6 = pnand %p3775_p3, %p3761_p9 }
  0x1f   : > { %p3784_p8 = por %p3783_p5, %p3782_p4 }
  0x20   : > { %p3778_p1 = pneg %p3777_p6 }
  0x22   : > { %p3785_p10 = pnand %p3784_p8, %p3778_p1 }
  0x24   : > { %3788 = shalt.err (!%p3785_p10)
}
  0x25   : > { %s3898_s16 = smov [#allocation5]   ;;  %s3789_s17 = scalar_lea.vmem %s3988_s9, 32 }
  0x26   : > { %3648 = dma.vmem_to_smem (!%p3981_p7), %s176_s30, 16, %s3898_s16, [#allocation4]  }
  0x27   : > { %p3790_p11 = scmp.ne.s32.totalorder %s3988_s9, %s3789_s17  ;;  %p3797_p0 = scmp.lt.s32.totalorder %s3988_s9, %s3988_s9 }
  0x28   : > { %p3798_p2 = scmp.lt.s32.totalorder %s3789_s17, %s3789_s17 }
  0x29   : > { %p3792_p12 = pnand %p3790_p11, %p3761_p9 }
  0x2a   : > { %p3799_p4 = por %p3798_p2, %p3797_p0 }
  0x2b   : > { %p3793_p13 = pneg %p3792_p12 }
  0x2d   : > { %p3800_p1 = pnand %p3799_p4, %p3793_p13 }
  0x2f   : > { %3803 = shalt.err (!%p3800_p1)
}
  0x30   : > { %s3899_s18 = smov [#allocation8]   ;;  %s3804_s26 = scalar_lea.vmem %s209_s12, 16 }
  0x31   : > { %3654 = dma.vmem_to_smem (!%p3981_p7), %s3988_s9, 32, %s3899_s18, [#allocation7]  }
  0x32   : > { %p3805_p5 = scmp.ne.s32.totalorder %s209_s12, %s3804_s26  ;;  %p3812_p8 = scmp.lt.s32.totalorder %s209_s12, %s209_s12 }
  0x33   : > { %p3813_p10 = scmp.lt.s32.totalorder %s3804_s26, %s3804_s26 }
  0x34   : > { %p3807_p3 = pnand %p3805_p5, %p3761_p9 }
  0x35   : > { %p3814_p11 = por %p3813_p10, %p3812_p8 }
  0x36   : > { %p3808_p6 = pneg %p3807_p3 }
  0x38   : > { %p3815_p12 = pnand %p3814_p11, %p3808_p6 }
  0x3a   : > { %3818 = shalt.err (!%p3815_p12)
}
  0x3b   : > { %s3900_s28 = smov [#allocation9]   ;;  %s4025_s29 = sadd.s32 1, %s3895_s21  }
  0x3c   : > { %3657 = dma.vmem_to_smem (!%p3981_p7), %s209_s12, 16, %s3900_s28, [#allocation10]  }
  0x3d   : > { %s25_s30 = ssub.s32 %s3895_s21, %s4025_s29  ;;  %s28_s7 = sadd.s32 1, %s3891_s20 }
  0x3e   : > { %p26_p9 = scmp.eq.s32.totalorder %s25_s30, 0  ;;  %p35_p13 = scmp.ne.s32.totalorder %s3891_s20, %s3887_s19 }
  0x3f   : > { %p36_p0 = scmp.eq.s32.totalorder %s3895_s21, 0  ;;  %p3666_p4 = scmp.lt.s32.totalorder %s3895_s21, 2 }
  0x40   : > { %s4034_s6 = scalar_select %p26_p9, %s3891_s20, %s28_s7  }
  0x41   : > { %p37_p2 = por %p36_p0, %p35_p13  ;;  %s219_s8 = sand.u32 1, %s3891_s20  }
  0x42   : > { %s3625_s9 = sshll.u32 %s3895_s21, 10  ;;  %s3280_s10 = sshll.u32 %s219_s8, 6 }
  0x43   : > { %s4042_s14 = scalar_lea.hbm %s6711_s0, %s3625_s9  ;;  %s223_s12 = scalar_lea.vmem [#allocation2], %s3280_s10 }
  0x44   : > { %s230_s15 = sshll.u32 %s223_s12, 4  ;;  %p4044_p7 = pnand %p3666_p4, %p37_p2  ;;  %s4048_s15 = int_to_ptr.vmem [resolvable:$true] %s230_s15 }
  0x45   : > { %s4050_s21 = scalar_lea.sflag [#allocation3], %s219_s8  ;;  %s3819_s17 = scalar_lea.hbm %s4042_s14, 1024 }
  0x46   : > { %p3820_p1 = scmp.ne.s32.totalorder %s4042_s14, %s3819_s17  ;;  %p3821_p5 = pneg %p4044_p7 }
  0x47   : > { %s3824_s25 = scalar_lea.hbm %s6711_s0, 2048  ;;  %p3825_p8 = scmp.lt.u32.totalorder %s4042_s14, %s6711_s0 }
  0x48   : > { %p3822_p3 = pnand %p3821_p5, %p3820_p1  ;;  %p3826_p10 = scmp.lt.u32.totalorder %s3824_s25, %s3819_s17 }
  0x49   : > { %p3828_p12 = scmp.lt.u32.totalorder %s3819_s17, %s4042_s14 }
  0x4a   : > { %p3823_p6 = pneg %p3822_p3  ;;  %p3827_p11 = por %p3826_p10, %p3825_p8 }
  0x4c   : > { %p3829_p9 = por %p3828_p12, %p3827_p11 }
  0x4e   : > { %p3830_p13 = pnand %p3829_p9, %p3823_p6 }
  0x50   : > { %3833 = shalt.err (!%p3830_p13)
}
  0x51   : > { %s3834_s30 = scalar_lea.vmem %s4048_s15, 1024  ;;  %s3901_s7 = smov [#allocation2]  }
  0x52   : > { %p3835_p0 = scmp.ne.s32.totalorder %s4048_s15, %s3834_s30  ;;  %s3839_s8 = sshll.u32 %s3901_s7, 4  ;;  %s3840_s8 = int_to_ptr.vmem [resolvable:$false] %s3839_s8 }
  0x53   : > { %s3841_s9 = scalar_lea.vmem %s3840_s8, 2048  ;;  %p3842_p1 = scmp.lt.s32.totalorder %s4048_s15, %s3840_s8 }
  0x54   : > { %p3837_p2 = pnand %p3835_p0, %p3821_p5  ;;  %p3843_p3 = scmp.lt.s32.totalorder %s3841_s9, %s3834_s30 }
  0x56   : > { %p3838_p4 = pneg %p3837_p2  ;;  %p3844_p8 = por %p3843_p3, %p3842_p1 }
  0x58   : > { %p3845_p10 = pnand %p3844_p8, %p3838_p4 }
  0x5a   : > { %3848 = shalt.err (!%p3845_p10)
}
  0x5b   : > { %s3902_s10 = smov 128   ;;  %s3903_s11 = smov 8  }
  0x5c   : > { %3661 = dma.hbm_to_vmem [thread:$0]  (!%p4044_p7), %s4042_s14, 1024, %s4048_s15, %s4050_s21, %s3902_s10, %s3902_s10, %s3903_s11  }
  0x5d   : > { %p6738_p5 = scmp.ne.s32.totalorder %s6735_s27, 0 }
  0x5f   : > { %242 = sbr.rel (%p6738_p5) target bundleno = 785 (0x311), region = 40 }
  0x66   : > { %s244_s13 = sand.u32 1, %s3887_s19   ;;  %p6739_p6 = scmp.ne.s32.totalorder %s6734_s23, 0 }
  0x67   : > { %s3284_s12 = sshll.u32 %s244_s13, 6  ;;  %s245_s17 = scalar_lea.sflag [#allocation3], %s244_s13 }
  0x68   : > { %s4081_s18 = scalar_lea.vmem [#allocation2], %s3284_s12 }
  0x69   : > { %3866 = dma.done.wait (%p6739_p6), %s245_s17, 1024  }
  0x6a   : > { %3868 = vsyncadd (%p6739_p6), %s245_s17, 4294966272  ;;  %p6740_p11 = scmp.eq.s32.totalorder %s3955_s22, 0 }
  0x6c   : > { %3870 = dma.done.wait (%p6740_p11), [#allocation4], 16   ;;  %p6741_p7 = pmov %p6740_p11 }
  0x6e   : > { %3872 = vsyncadd (%p6741_p7), [#allocation4], 4294967280  ;;  %p6742_p12 = pmov %p6741_p7 }
  0x6f   : > { %p6743_p9 = pmov %p6741_p7 }
  0x70   : > { %3874 = dma.done.wait (%p6742_p12), [#allocation7], 48  }
  0x71   : > { %3876 = vsyncadd (%p6743_p9), [#allocation7], 4294967248  ;;  %p6744_p13 = pmov %p6741_p7 }
  0x72   : > { %p6745_p0 = pmov %p6741_p7 }
  0x73   : > { %3878 = dma.done.wait (%p6744_p13), [#allocation10], 16  }
  0x74   : > { %3880 = vsyncadd (%p6745_p0), [#allocation10], 4294967280 }
  0x75   : > { %269 = sfence }
  0x76   : > { %s297_s23 = sld [smem:[#allocation6]]  ;;  %s3298_s14 = sld [smem:[#allocation5 + $0x1]]  ;;  %v4102_v0 = vld [vmem:[%s4081_s18 + $0x8] sm:$0x3f]  ;;  %v4107_v1 = vld [vmem:[%s4081_s18] sm:$0xff]  ;;  %v4130_v14 = vld [vmem:[%s4081_s18 + $0x10] sm:$0xff] }
  0x77   : > { %s319_s27 = sld [smem:[#allocation5]]  ;;  %s3299_s15 = sld [smem:[#allocation5 + $0x2]]  ;;  %v4110_v2 = vld [vmem:[%s4081_s18 + $0x1] sm:$0xff]  ;;  %v4113_v3 = vld [vmem:[%s4081_s18 + $0x9] sm:$0x3f]  ;;  %v4141_v21 = vld [vmem:[%s4081_s18 + $0x11] sm:$0xff] }
  0x78   : > { %s4099_s16 = sld [smem:[#allocation5 + $0x3]]  ;;  %s4104_s21 = sld [smem:[#allocation5 + $0x4]]  ;;  %v4118_v4 = vld [vmem:[%s4081_s18 + $0x2] sm:$0xff]  ;;  %v4121_v6 = vld [vmem:[%s4081_s18 + $0xa] sm:$0x3f]  ;;  %v4152_v28 = vld [vmem:[%s4081_s18 + $0x12] sm:$0xff] }
  0x79   : > { %s4115_s24 = sld [smem:[#allocation5 + $0x5]]  ;;  %s4123_s25 = sld [smem:[#allocation5 + $0x6]]  ;;  %v4133_v15 = vld [vmem:[%s4081_s18 + $0x18] sm:$0x3f]  ;;  %v4163_v35 = vld [vmem:[%s4081_s18 + $0x20] sm:$0xff]  ;;  %v4194_v56 = vld [vmem:[%s4081_s18 + $0x30] sm:$0xff] }
  0x7a   : > { %s4136_s26 = sld [smem:[#allocation5 + $0x7]]  ;;  %v4144_v22 = vld [vmem:[%s4081_s18 + $0x19] sm:$0x3f]  ;;  %s4147_s28 = sld [smem:[#allocation5 + $0x8]]  ;;  %v4166_v36 = vld [vmem:[%s4081_s18 + $0x28] sm:$0x3f] }
  0x7b   : > { %v4155_v29 = vld [vmem:[%s4081_s18 + $0x1a] sm:$0x3f]  ;;  %s4158_s30 = sld [smem:[#allocation5 + $0x9]]  ;;  %s4169_s7 = sld [smem:[#allocation5 + $0xa]]  ;;  %v4174_v42 = vld [vmem:[%s4081_s18 + $0x21] sm:$0xff]  ;;  %v4203_v63 = vld [vmem:[%s4081_s18 + $0x31] sm:$0xff] }
  0x7c   : > { %v298_v5 = vstv %s297_s23  ;;  %v326_v8 = vstv %s3298_s14  ;;  %v4177_v43 = vld [vmem:[%s4081_s18 + $0x29] sm:$0x3f]  ;;  %s4180_s8 = sld [smem:[#allocation5 + $0xb]]  ;;  %v4197_v57 = vld [vmem:[%s4081_s18 + $0x38] sm:$0x3f]  ;;  %s3419_s9 = sld [smem:[#allocation8 + $0x2]] }
  0x7d   : > { %v320_v7 = vstv %s319_s27  ;;  %v327_v11 = vmul.f32 %v326_v8, %v4110_v2  ;;  %v328_v12 = vmul.f32 %v326_v8, %v4113_v3  ;;  %v332_v13 = vstv %s3299_s15  ;;  %v4185_v49 = vld [vmem:[%s4081_s18 + $0x22] sm:$0xff]  ;;  %v4188_v50 = vld [vmem:[%s4081_s18 + $0x2a] sm:$0x3f]  ;;  %s3418_s10 = sld [smem:[#allocation8 + $0x1]]  ;;  %s4222_s11 = sld [smem:[#allocation5 + $0xc]] }
  0x7e   : > { %v321_v9 = vmul.f32 %v320_v7, %v4107_v1  ;;  %v322_v10 = vmul.f32 %v320_v7, %v4102_v0  ;;  %v471_v16 = vstv %s4099_s16  ;;  %v333_v19 = vmul.f32 %v332_v13, %v4118_v4  ;;  %s3421_s13 = sld [smem:[#allocation8 + $0x19]]  ;;  %s3301_s17 = sld [smem:[#allocation5 + $0xd]] }
  0x7f   : > { %v334_v20 = vmul.f32 %v332_v13, %v4121_v6  ;;  %v477_v23 = vstv %s4104_s21  ;;  %v472_v26 = vmul.f32 %v4130_v14, %v471_v16  ;;  %v473_v27 = vmul.f32 %v4133_v15, %v471_v16  ;;  %v4215_v13 = vld [vmem:[%s4081_s18 + $0x3a] sm:$0x3f]  ;;  %s4224_s12 = sld [smem:[#allocation6 + $0x1]]  ;;  %s4230_s23 = sld [smem:[#allocation8 + $0x1a]] }
  0x80   : > { %v323_v17 = vadd.f32 %v321_v9, %v298_v5  ;;  %v324_v18 = vadd.f32 %v322_v10, %v298_v5  ;;  %v483_v30 = vstv %s4115_s24  ;;  %v478_v33 = vmul.f32 %v4141_v21, %v477_v23  ;;  %v4206_v5 = vld [vmem:[%s4081_s18 + $0x39] sm:$0x3f]  ;;  %s3904_s27 = smov 126   ;;  %s3905_s14 = smov 127  }
  0x81   : > { %v479_v34 = vmul.f32 %v4144_v22, %v477_v23  ;;  %v622_v37 = vstv %s4123_s25  ;;  %v484_v40 = vmul.f32 %v4152_v28, %v483_v30  ;;  %v485_v41 = vmul.f32 %v4155_v29, %v483_v30  ;;  %v4210_v10 = vld [vmem:[%s4081_s18 + $0x32] sm:$0xff]  ;;  %s3302_s15 = sld [smem:[#allocation5 + $0xe]]  ;;  %s4239_s16 = sld [smem:[#allocation8 + $0x31]] }
  0x82   : > { %v329_v24 = vadd.f32 %v327_v11, %v323_v17  ;;  %v330_v25 = vadd.f32 %v328_v12, %v324_v18  ;;  %v628_v44 = vstv %s4136_s26  ;;  %v623_v47 = vmul.f32 %v4163_v35, %v622_v37  ;;  %s4247_s21 = sld [smem:[#allocation5 + $0xf]]  ;;  %s4251_s24 = sld [smem:[#allocation8 + $0x32]] }
  0x83   : > { %v624_v48 = vmul.f32 %v4166_v36, %v622_v37  ;;  %v634_v51 = vstv %s4147_s28  ;;  %v629_v54 = vmul.f32 %v4174_v42, %v628_v44  ;;  %v630_v55 = vmul.f32 %v4177_v43, %v628_v44  ;;  %s4253_s25 = sld [smem:[#allocation8 + $0x49]]  ;;  %s4261_s26 = sld [smem:[#allocation5 + $0x10]] }
  0x84   : > { %v335_v31 = vadd.f32 %v333_v19, %v329_v24  ;;  %v336_v32 = vadd.f32 %v334_v20, %v330_v25  ;;  %v773_v58 = vstv %s4158_s30  ;;  %v635_v61 = vmul.f32 %v4185_v49, %v634_v51  ;;  %s4264_s28 = sld [smem:[#allocation8 + $0x4a]]  ;;  %s4273_s30 = sld [smem:[#allocation5 + $0x11]] }
  0x85   : > { %v636_v62 = vmul.f32 %v4188_v50, %v634_v51  ;;  %v779_v7 = vstv %s4169_s7  ;;  %v774_v11 = vmul.f32 %v4194_v56, %v773_v58  ;;  %v775_v12 = vmul.f32 %v4197_v57, %v773_v58  ;;  %s4277_s7 = sld [smem:[#allocation8 + $0x61]]  ;;  %p292_p2 = scmp.lt.s32.totalorder %s3955_s22, 1 }
  0x86   : > { %v474_v38 = vadd.f32 %v472_v26, %v335_v31  ;;  %v475_v39 = vadd.f32 %v473_v27, %v336_v32  ;;  %v785_v16 = vstv %s4180_s8  ;;  %v780_v19 = vmul.f32 %v4203_v63, %v779_v7  ;;  %s4286_s8 = sld [smem:[#allocation5 + $0x12]] }
  0x87   : > { %v781_v20 = vmul.f32 %v4206_v5, %v779_v7  ;;  %v786_v25 = vmul.f32 %v4210_v10, %v785_v16  ;;  %v787_v26 = vmul.f32 %v4215_v13, %v785_v16  ;;  %v350_v7 = vstv %s3302_s15  ;;  %s4333_s15 = sld [smem:[#allocation5 + $0x16]]  ;;  %s6958_s22 = smov (!%p292_p2, %s3955_s22), 1 }
  0x88   : > { %v480_v45 = vadd.f32 %v478_v33, %v474_v38  ;;  %v481_v46 = vadd.f32 %v479_v34, %v475_v39  ;;  %v969_v33 = vstv %s3419_s9  ;;  %v955_v34 = vstv %s3418_s10  ;;  %s4290_s9 = sld [smem:[#allocation8 + $0x62]]  ;;  %s4297_s10 = sld [smem:[#allocation5 + $0x13]] }
  0x89   : > { %v351_v16 = vmul.f32 %v350_v7, %v4118_v4  ;;  %vm3128_vm0 = vcmask 111616   ;;  %vm3126_vm1 = vcmask 113664  }
  0x8a   : > { %v486_v52 = vadd.f32 %v484_v40, %v480_v45  ;;  %v487_v53 = vadd.f32 %v485_v41, %v481_v46  ;;  %v338_v45 = vstv %s4222_s11  ;;  %v989_v46 = vstv %s3421_s13  ;;  %s4303_s11 = sld [smem:[#allocation8 + $0x79]]  ;;  %s4309_s13 = sld [smem:[#allocation5 + $0x14]] }
  0x8c   : > { %v625_v59 = vadd.f32 %v623_v47, %v486_v52  ;;  %v626_v60 = vadd.f32 %v624_v48, %v487_v53  ;;  %v300_v47 = vstv %s4224_s12  ;;  %v340_v48 = vmul.f32 %v338_v45, %v4102_v0  ;;  %s4315_s12 = sld [smem:[#allocation8 + $0x7a]] }
  0x8d   : > { %v344_v53 = vstv %s3301_s17  ;;  %s4321_s17 = sld [smem:[#allocation5 + $0x15]] }
  0x8e   : > { %v631_v8 = vadd.f32 %v629_v54, %v625_v59  ;;  %v632_v9 = vadd.f32 %v630_v55, %v626_v60  ;;  %v339_v54 = vmul.f32 %v338_v45, %v4107_v1  ;;  %v1003_v55 = vstv %s4230_s23  ;;  %s4327_s23 = sld [smem:[#allocation8 + $0x91]] }
  0x8f   : > { %v342_v58 = vadd.f32 %v340_v48, %v300_v47  ;;  %v346_v59 = vmul.f32 %v344_v53, %v4113_v3  ;;  %v345_v60 = vmul.f32 %v344_v53, %v4110_v2  ;;  %v501_v45 = vstv %s4273_s30  ;;  %s3303_s30 = sld [smem:[#allocation5 + $0x18]] }
  0x90   : > { %v637_v17 = vadd.f32 %v635_v61, %v631_v8  ;;  %v638_v18 = vadd.f32 %v636_v62, %v632_v9  ;;  %v341_v8 = vadd.f32 %v339_v54, %v300_v47  ;;  %v1023_v9 = vstv %s4239_s16  ;;  %s4339_s16 = sld [smem:[#allocation8 + $0x92]] }
  0x91   : > { %v503_v53 = vmul.f32 %v4155_v29, %v501_v45 }
  0x92   : > { %v776_v23 = vadd.f32 %v774_v11, %v637_v17  ;;  %v777_v24 = vadd.f32 %v775_v12, %v638_v18  ;;  %v348_v11 = vadd.f32 %v346_v59, %v342_v58  ;;  %v352_v12 = vmul.f32 %v350_v7, %v4121_v6 }
  0x93   : > { %v502_v59 = vmul.f32 %v4152_v28, %v501_v45 }
  0x94   : > { %v782_v27 = vadd.f32 %v780_v19, %v776_v23  ;;  %v783_v30 = vadd.f32 %v781_v20, %v777_v24  ;;  %v489_v19 = vstv %s4247_s21  ;;  %v347_v20 = vadd.f32 %v345_v60, %v341_v8  ;;  %s4345_s21 = sld [smem:[#allocation5 + $0x17]] }
  0x95   : > { %v1037_v23 = vstv %s4251_s24  ;;  %v1057_v24 = vstv %s4253_s25  ;;  %s3439_s24 = sld [smem:[#allocation8 + $0xa9]]  ;;  %s3440_s25 = sld [smem:[#allocation8 + $0xaa]] }
  0x96   : > { %v788_v31 = vadd.f32 %v786_v25, %v782_v27  ;;  %v789_v32 = vadd.f32 %v787_v26, %v783_v30  ;;  %v354_v25 = vadd.f32 %v352_v12, %v348_v11  ;;  %v491_v26 = vmul.f32 %v4133_v15, %v489_v19 }
  0x97   : > { %v490_v27 = vmul.f32 %v4130_v14, %v489_v19 }
  0x98   : > { %v4226_v37 = vmax.f32 %v788_v31, 0.0  ;;  %v4228_v38 = vmax.f32 %v789_v32, 0.0  ;;  %v495_v32 = vstv %s4261_s26  ;;  %s3442_s26 = sld [smem:[#allocation8 + $0x4]] }
  0x99   : > { %v496_v47 = vmul.f32 %v4141_v21, %v495_v32 }
  0x9a   : > { %v970_v39 = vmul.f32 %v969_v33, %v4226_v37  ;;  %v956_v40 = vmul.f32 %v955_v34, %v4226_v37  ;;  %v971_v41 = vmul.f32 %v969_v33, %v4228_v38  ;;  %v957_v44 = vmul.f32 %v955_v34, %v4228_v38 }
  0x9b   : > { %v991_v51 = vmul.f32 %v989_v46, %v4228_v38  ;;  %v990_v52 = vmul.f32 %v989_v46, %v4226_v37  ;;  %v1005_v61 = vmul.f32 %v1003_v55, %v4228_v38  ;;  %v1004_v62 = vmul.f32 %v1003_v55, %v4226_v37 }
  0x9c   : > { %974 = vrot.lane.b32.xlu1 %v970_v39, %s3904_s27  ;;  %960 = vrot.lane.b32.xlu0 %v956_v40, %s3905_s14  ;;  %v1025_v17 = vmul.f32 %v1023_v9, %v4228_v38  ;;  %v1024_v18 = vmul.f32 %v1023_v9, %v4226_v37  ;;  %v1039_v30 = vmul.f32 %v1037_v23, %v4228_v38  ;;  %v1071_v39 = vstv %s4264_s28  ;;  %s3443_s28 = sld [smem:[#allocation8 + $0x5]] }
  0x9d   : > { %v1038_v31 = vmul.f32 %v1037_v23, %v4226_v37  ;;  %v353_v33 = vadd.f32 %v351_v16, %v347_v20  ;;  %v1059_v34 = vmul.f32 %v1057_v24, %v4228_v38  ;;  %v493_v40 = vadd.f32 %v491_v26, %v354_v25 }
  0x9e   : > { %v1073_v48 = vmul.f32 %v1071_v39, %v4228_v38  ;;  %v640_v55 = vstv %s4286_s8  ;;  %v646_v9 = vstv %s4297_s10  ;;  %v652_v23 = vstv %s4309_s13  ;;  %s4382_s8 = sld [smem:[#allocation8 + $0x1d]]  ;;  %s4390_s10 = sld [smem:[#allocation5 + $0x19]] }
  0x9f   : > { %v492_v46 = vadd.f32 %v490_v27, %v353_v33  ;;  %v642_v7 = vmul.f32 %v4166_v36, %v640_v55  ;;  %v641_v12 = vmul.f32 %v4163_v35, %v640_v55  ;;  %v648_v19 = vmul.f32 %v4177_v43, %v646_v9  ;;  %s4398_s13 = sld [smem:[#allocation5 + $0x1a]] }
  0xa0   : > { %976 = vrot.lane.b32.xlu1 %v971_v41, %s3904_s27  ;;  %962 = vrot.lane.b32.xlu0 %v957_v44, %s3905_s14  ;;  %v497_v41 = vmul.f32 %v4144_v22, %v495_v32  ;;  %v1058_v44 = vmul.f32 %v1057_v24, %v4226_v37  ;;  %v647_v25 = vmul.f32 %v4174_v42, %v646_v9  ;;  %v791_v33 = vstv %s4321_s17  ;;  %s4410_s17 = sld [smem:[#allocation5 + $0x1b]] }
  0xa1   : > { %v498_v58 = vadd.f32 %v496_v47, %v492_v46  ;;  %v793_v45 = vmul.f32 %v4197_v57, %v791_v33  ;;  %v797_v47 = vstv %s4333_s15  ;;  %v1193_v9 = vstv %s3439_s24  ;;  %s4422_s15 = sld [smem:[#allocation5 + $0x1c]] }
  0xa2   : > { %v499_v54 = vadd.f32 %v497_v41, %v493_v40  ;;  %v799_v55 = vmul.f32 %v4206_v5, %v797_v47  ;;  %s4439_s24 = sld [smem:[#allocation8 + $0x64]] }
  0xa3   : > { %v504_v11 = vadd.f32 %v502_v59, %v498_v58  ;;  %v803_v59 = vstv %s4345_s21  ;;  %s4434_s21 = sld [smem:[#allocation5 + $0x1d]] }
  0xa4   : > { %996 = vrot.lane.b32.xlu1 %v991_v51, %s3905_s14  ;;  %994 = vrot.lane.b32.xlu0 %v990_v52, %s3905_s14  ;;  %v1072_v51 = vmul.f32 %v1071_v39, %v4226_v37  ;;  %v1091_v52 = vstv %s4277_s7  ;;  %v505_v8 = vadd.f32 %v503_v53, %v499_v54  ;;  %v653_v39 = vmul.f32 %v4185_v49, %v652_v23  ;;  %s3445_s7 = sld [smem:[#allocation8 + $0x1c]] }
  0xa5   : > { %v1093_v60 = vmul.f32 %v1091_v52, %v4228_v38  ;;  %v643_v24 = vadd.f32 %v641_v12, %v504_v11  ;;  %v1173_v54 = vstv %s4339_s16  ;;  %s4427_s16 = sld [smem:[#allocation8 + $0x4d]] }
  0xa6   : > { %v644_v20 = vadd.f32 %v642_v7, %v505_v8  ;;  %v1174_v7 = vmul.f32 %v1173_v54, %v4226_v37  ;;  %v805_v8 = vmul.f32 %v4215_v13, %v803_v59 }
  0xa8   : > { %1010 = vrot.lane.b32.xlu1 %v1005_v61, %s3904_s27  ;;  %1008 = vrot.lane.b32.xlu0 %v1004_v62, %s3904_s27  ;;  %v1092_v61 = vmul.f32 %v1091_v52, %v4226_v37  ;;  %v1105_v62 = vstv %s4290_s9  ;;  %v650_v32 = vadd.f32 %v648_v19, %v644_v20  ;;  %s4384_s9 = sld [smem:[#allocation6 + $0x2]] }
  0xa9   : > { %v1107_v16 = vmul.f32 %v1105_v62, %v4228_v38 }
  0xac   : > { %1030 = vrot.lane.b32.xlu1 %v1025_v17, %s3905_s14  ;;  %1028 = vrot.lane.b32.xlu0 %v1024_v18, %s3905_s14  ;;  %v1106_v17 = vmul.f32 %v1105_v62, %v4226_v37  ;;  %v1125_v18 = vstv %s4303_s11  ;;  %v1175_v62 = vmul.f32 %v1173_v54, %v4228_v38  ;;  %s4392_s11 = sld [smem:[#allocation8 + $0x34]] }
  0xad   : > { %v1127_v26 = vmul.f32 %v1125_v18, %v4228_v38  ;;  %v1126_v27 = vmul.f32 %v1125_v18, %v4226_v37  ;;  %v1194_v18 = vmul.f32 %v1193_v9, %v4226_v37 }
  0xb0   : > { %1044 = vrot.lane.b32.xlu1 %v1039_v30, %s3904_s27  ;;  %1042 = vrot.lane.b32.xlu0 %v1038_v31, %s3904_s27  ;;  %v1139_v30 = vstv %s4315_s12  ;;  %v654_v31 = vmul.f32 %v4188_v50, %v652_v23  ;;  %v1207_v23 = vstv %s3440_s25  ;;  %s4401_s12 = sld [smem:[#allocation8 + $0x35]]  ;;  %s4446_s25 = sld [smem:[#allocation5 + $0x1e]] }
  0xb1   : > { %v1141_v40 = vmul.f32 %v1139_v30, %v4228_v38  ;;  %v1140_v41 = vmul.f32 %v1139_v30, %v4226_v37  ;;  %v1227_v30 = vstv %s3442_s26  ;;  %s4451_s26 = sld [smem:[#allocation8 + $0x65]] }
  0xb2   : > { %v656_v46 = vadd.f32 %v654_v31, %v650_v32  ;;  %v1295_v54 = vstv %s4392_s11  ;;  %s4490_s11 = sld [smem:[#allocation8]] }
  0xb4   : > { %1064 = vrot.lane.b32.xlu1 %v1059_v34, %s3905_s14  ;;  %1062 = vrot.lane.b32.xlu0 %v1058_v44, %s3905_s14  ;;  %v649_v34 = vadd.f32 %v647_v25, %v643_v24  ;;  %v1159_v44 = vstv %s4327_s23  ;;  %v795_v58 = vadd.f32 %v793_v45, %v656_v46  ;;  %v1209_v24 = vmul.f32 %v1207_v23, %v4228_v38  ;;  %s4415_s23 = sld [smem:[#allocation8 + $0x4c]] }
  0xb5   : > { %v1161_v52 = vmul.f32 %v1159_v44, %v4228_v38  ;;  %v1160_v53 = vmul.f32 %v1159_v44, %v4226_v37  ;;  %v1208_v25 = vmul.f32 %v1207_v23, %v4226_v37  ;;  %v1275_v44 = vstv %s4382_s8  ;;  %s4476_s8 = sld [smem:[#allocation8 + $0x7d]] }
  0xb6   : > { %v801_v11 = vadd.f32 %v799_v55, %v795_v58  ;;  %v302_v45 = vstv %s4384_s9  ;;  %s4482_s9 = sld [smem:[#allocation5 + $0x21]] }
  0xb8   : > { %1078 = vrot.lane.b32.xlu1 %v1073_v48, %s3904_s27  ;;  %1076 = vrot.lane.b32.xlu0 %v1072_v51, %s3904_s27  ;;  %v655_v48 = vadd.f32 %v653_v39, %v649_v34  ;;  %v792_v51 = vmul.f32 %v4194_v56, %v791_v33  ;;  %v807_v19 = vadd.f32 %v805_v8, %v801_v11  ;;  %v1241_v33 = vstv %s3443_s28  ;;  %s4458_s28 = sld [smem:[#allocation5 + $0x1f]] }
  0xbc   : > { %1098 = vrot.lane.b32.xlu1 %v1093_v60, %s3905_s14  ;;  %1096 = vrot.lane.b32.xlu0 %v1092_v61, %s3905_s14  ;;  %v794_v60 = vadd.f32 %v792_v51, %v655_v48  ;;  %v798_v61 = vmul.f32 %v4203_v63, %v797_v47  ;;  %v362_v51 = vstv %s4390_s10  ;;  %s4485_s10 = sld [smem:[#allocation8 + $0x94]] }
  0xbd   : > { %v364_v55 = vmul.f32 %v362_v51, %v4113_v3 }
  0xbe   : > { %v800_v12 = vadd.f32 %v798_v61, %v794_v60  ;;  %v363_v60 = vmul.f32 %v362_v51, %v4110_v2  ;;  %v664_v51 = vstv %s4458_s28  ;;  %s4553_s28 = sld [smem:[#allocation8 + $0x7]] }
  0xc0   : > { %1112 = vrot.lane.b32.xlu1 %v1107_v16, %s3904_s27  ;;  %1110 = vrot.lane.b32.xlu0 %v1106_v17, %s3904_s27  ;;  %v804_v16 = vmul.f32 %v4210_v10, %v803_v59  ;;  %v1195_v17 = vmul.f32 %v1193_v9, %v4228_v38  ;;  %v368_v59 = vstv %s4398_s13  ;;  %v507_v9 = vstv %s4410_s17  ;;  %s4496_s13 = sld [smem:[#allocation5 + $0x22]]  ;;  %s4501_s17 = sld [smem:[#allocation8 + $0x95]] }
  0xc1   : > { %v369_v11 = vmul.f32 %v368_v59, %v4118_v4 }
  0xc2   : > { %v806_v20 = vadd.f32 %v804_v16, %v800_v12  ;;  %v1329_v16 = vstv %s4415_s23  ;;  %s4510_s23 = sld [smem:[#allocation5 + $0x23]] }
  0xc4   : > { %1132 = vrot.lane.b32.xlu1 %v1127_v26, %s3905_s14  ;;  %1130 = vrot.lane.b32.xlu0 %v1126_v27, %s3905_s14  ;;  %v4378_v26 = vmax.f32 %v807_v19, 0.0  ;;  %v4380_v27 = vmax.f32 %v806_v20, 0.0  ;;  %v513_v19 = vstv %s4422_s15  ;;  %v508_v20 = vmul.f32 %v4130_v14, %v507_v9  ;;  %s4514_s15 = sld [smem:[#allocation8 + $0xac]] }
  0xc5   : > { %v514_v14 = vmul.f32 %v4141_v21, %v513_v19 }
  0xc6   : > { %v1229_v31 = vmul.f32 %v1227_v30, %v4378_v26  ;;  %v1228_v32 = vmul.f32 %v1227_v30, %v4380_v27  ;;  %v1243_v34 = vmul.f32 %v1241_v33, %v4378_v26  ;;  %v1242_v39 = vmul.f32 %v1241_v33, %v4380_v27 }
  0xc7   : > { %v1276_v58 = vmul.f32 %v1275_v44, %v4380_v27  ;;  %v1297_v61 = vmul.f32 %v1295_v54, %v4378_v26  ;;  %v1296_v8 = vmul.f32 %v1295_v54, %v4380_v27  ;;  %v1331_v23 = vmul.f32 %v1329_v16, %v4378_v26 }
  0xc8   : > { %1146 = vrot.lane.b32.xlu1 %v1141_v40, %s3904_s27  ;;  %1144 = vrot.lane.b32.xlu0 %v1140_v41, %s3904_s27  ;;  %v356_v40 = vstv %s3303_s30  ;;  %v1261_v41 = vstv %s3445_s7  ;;  %v1330_v30 = vmul.f32 %v1329_v16, %v4380_v27  ;;  %s4463_s30 = sld [smem:[#allocation8 + $0x7c]]  ;;  %s4470_s7 = sld [smem:[#allocation5 + $0x20]] }
  0xc9   : > { %v358_v46 = vmul.f32 %v356_v40, %v4102_v0  ;;  %v1263_v47 = vmul.f32 %v1261_v41, %v4378_v26  ;;  %v1262_v48 = vmul.f32 %v1261_v41, %v4380_v27  ;;  %v658_v41 = vstv %s4446_s25  ;;  %s4542_s25 = sld [smem:[#allocation9 + $0x1]] }
  0xca   : > { %v815_v16 = vstv %s4496_s13  ;;  %s4590_s13 = sld [smem:[#allocation8 + $0x20]] }
  0xcb   : > { %v360_v0 = vadd.f32 %v358_v46, %v302_v45 }
  0xcc   : > { %1166 = vrot.lane.b32.xlu1 %v1161_v52, %s3905_s14  ;;  %1164 = vrot.lane.b32.xlu0 %v1160_v53, %s3905_s14  ;;  %v357_v52 = vmul.f32 %v356_v40, %v4107_v1  ;;  %v1277_v53 = vmul.f32 %v1275_v44, %v4378_v26 }
  0xcd   : > { %v366_v3 = vadd.f32 %v364_v55, %v360_v0  ;;  %v666_v0 = vmul.f32 %v4177_v43, %v664_v51 }
  0xce   : > { %v359_v1 = vadd.f32 %v357_v52, %v302_v45  ;;  %v659_v52 = vmul.f32 %v4163_v35, %v658_v41 }
  0xd0   : > { %1180 = vrot.lane.b32.xlu1 %v1175_v62, %s3904_s27  ;;  %1178 = vrot.lane.b32.xlu0 %v1174_v7, %s3904_s27  ;;  %v1309_v62 = vstv %s4401_s12  ;;  %v370_v7 = vmul.f32 %v368_v59, %v4121_v6  ;;  %v365_v2 = vadd.f32 %v363_v60, %v359_v1  ;;  %v665_v59 = vmul.f32 %v4174_v42, %v664_v51  ;;  %s4499_s12 = sld [smem:[#allocation9]] }
  0xd1   : > { %v1311_v12 = vmul.f32 %v1309_v62, %v4378_v26  ;;  %v1411_v60 = vstv %s4476_s8  ;;  %s4566_s8 = sld [smem:[#allocation8 + $0x8]] }
  0xd2   : > { %v372_v6 = vadd.f32 %v370_v7, %v366_v3  ;;  %v371_v4 = vadd.f32 %v369_v11, %v365_v2  ;;  %v809_v3 = vstv %s4482_s9  ;;  %v949_v2 = vstv %s4490_s11  ;;  %s4572_s9 = sld [smem:[#allocation8 + $0x1f]]  ;;  %s4588_s11 = sld [smem:[#allocation5 + $0x24]] }
  0xd3   : > { %v811_v11 = vmul.f32 %v4197_v57, %v809_v3 }
  0xd4   : > { %1200 = vrot.lane.b32.xlu1 %v1195_v17, %s3905_s14  ;;  %1198 = vrot.lane.b32.xlu0 %v1194_v18, %s3905_s14  ;;  %v509_v17 = vmul.f32 %v4133_v15, %v507_v9  ;;  %v1310_v18 = vmul.f32 %v1309_v62, %v4380_v27  ;;  %v1413_v9 = vmul.f32 %v1411_v60, %v4378_v26 }
  0xd6   : > { %v511_v15 = vadd.f32 %v509_v17, %v372_v6  ;;  %v933_v17 = vstv %s4499_s12  ;;  %s4593_s12 = sld [smem:[#allocation8 + $0x33]] }
  0xd8   : > { %1214 = vrot.lane.b32.xlu1 %v1209_v24, %s3904_s27  ;;  %1212 = vrot.lane.b32.xlu0 %v1208_v25, %s3904_s27  ;;  %v1343_v24 = vstv %s4427_s16  ;;  %v515_v25 = vmul.f32 %v4144_v22, %v513_v19  ;;  %s4524_s16 = sld [smem:[#allocation8 + $0x3]] }
  0xd9   : > { %v1345_v33 = vmul.f32 %v1343_v24, %v4378_v26  ;;  %v1344_v40 = vmul.f32 %v1343_v24, %v4380_v27 }
  0xda   : > { %v517_v22 = vadd.f32 %v515_v25, %v511_v15  ;;  %v816_v15 = vmul.f32 %v4203_v63, %v815_v16  ;;  %v951_v25 = vmul.f32 %v949_v2, %v4228_v38 }
  0xdc   : > { %1234 = vrot.lane.b32.xlu1 %v1229_v31, %s3905_s14  ;;  %1232 = vrot.lane.b32.xlu0 %v1228_v32, %s3905_s14  ;;  %v519_v31 = vstv %s4434_s21  ;;  %v510_v32 = vadd.f32 %v508_v20, %v371_v4  ;;  %s4528_s21 = sld [smem:[#allocation8 + $0x18]]  ;;  %v950_v4 = vmul.f32 %v949_v2, %v4226_v37  ;;  %v817_v20 = vmul.f32 %v4206_v5, %v815_v16 }
  0xdd   : > { %v520_v21 = vmul.f32 %v4152_v28, %v519_v31 }
  0xde   : > { %v516_v44 = vadd.f32 %v514_v14, %v510_v32 }
  0xe0   : > { %1248 = vrot.lane.b32.xlu1 %v1243_v34, %s3904_s27  ;;  %1246 = vrot.lane.b32.xlu0 %v1242_v39, %s3904_s27  ;;  %v1363_v34 = vstv %s4439_s24  ;;  %v521_v39 = vmul.f32 %v4155_v29, %v519_v31  ;;  %v660_v29 = vmul.f32 %v4166_v36, %v658_v41  ;;  %v522_v28 = vadd.f32 %v520_v21, %v516_v44  ;;  %s4536_s24 = sld [smem:[#allocation8 + $0xad]] }
  0xe1   : > { %v1365_v45 = vmul.f32 %v1363_v34, %v4378_v26  ;;  %v1364_v46 = vmul.f32 %v1363_v34, %v4380_v27  ;;  %v1397_v36 = vstv %s4463_s30  ;;  %v952_v31 = vadd.f32 %v950_v4, %v933_v17  ;;  %s4556_s30 = sld [smem:[#allocation8 + $0x1b]] }
  0xe2   : > { %v661_v35 = vadd.f32 %v659_v52, %v522_v28  ;;  %v1399_v43 = vmul.f32 %v1397_v36, %v4378_v26  ;;  %v1398_v1 = vmul.f32 %v1397_v36, %v4380_v27  ;;  %v983_v41 = vstv %s4528_s21  ;;  %s4615_s21 = sld [smem:[#allocation8 + $0x60]] }
  0xe3   : > { %v953_v44 = vadd.f32 %v951_v25, %v933_v17  ;;  %v985_v51 = vmul.f32 %v983_v41, %v4228_v38  ;;  %v984_v28 = vmul.f32 %v983_v41, %v4226_v37 }
  0xe4   : > { %1268 = vrot.lane.b32.xlu1 %v1263_v47, %s3905_s14  ;;  %1266 = vrot.lane.b32.xlu0 %v1262_v48, %s3905_s14  ;;  %v1377_v47 = vstv %s4451_s26  ;;  %v523_v48 = vadd.f32 %v521_v39, %v517_v22  ;;  %v667_v42 = vadd.f32 %v665_v59, %v661_v35  ;;  %s4550_s26 = sld [smem:[#allocation8 + $0x30]]  ;;  %v1221_v22 = vstv %s4524_s16  ;;  %s4613_s16 = sld [smem:[#allocation8 + $0x37]] }
  0xe5   : > { %v1378_v54 = vmul.f32 %v1377_v47, %v4380_v27 }
  0xe6   : > { %v662_v55 = vadd.f32 %v660_v29, %v523_v48 }
  0xe8   : > { %1282 = vrot.lane.b32.xlu1 %v1277_v53, %s3904_s27  ;;  %1280 = vrot.lane.b32.xlu0 %v1276_v58, %s3904_s27  ;;  %v1379_v53 = vmul.f32 %v1377_v47, %v4378_v26  ;;  %v670_v58 = vstv %s4470_s7  ;;  %v668_v62 = vadd.f32 %v666_v0, %v662_v55  ;;  %s4559_s7 = sld [smem:[#allocation9 + $0x2]]  ;;  %v1223_v55 = vmul.f32 %v1221_v22, %v4378_v26 }
  0xe9   : > { %v671_v7 = vmul.f32 %v4185_v49, %v670_v58  ;;  %v810_v49 = vmul.f32 %v4194_v56, %v809_v3  ;;  %v1499_v3 = vstv %s4553_s28  ;;  %s4648_s28 = sld [smem:[#allocation5 + $0x27]] }
  0xeb   : > { %v673_v6 = vadd.f32 %v671_v7, %v667_v42 }
  0xec   : > { %1302 = vrot.lane.b32.xlu1 %v1297_v61, %s3905_s14  ;;  %1300 = vrot.lane.b32.xlu0 %v1296_v8, %s3905_s14  ;;  %v672_v61 = vmul.f32 %v4188_v50, %v670_v58  ;;  %v1431_v8 = vstv %s4485_s10  ;;  %v1412_v50 = vmul.f32 %v1411_v60, %v4380_v27  ;;  %s4585_s10 = sld [smem:[#allocation8 + $0x48]] }
  0xed   : > { %v1433_v19 = vmul.f32 %v1431_v8, %v4378_v26  ;;  %v1432_v57 = vmul.f32 %v1431_v8, %v4380_v27  ;;  %v812_v24 = vadd.f32 %v810_v49, %v673_v6  ;;  %v1255_v8 = vstv %s4556_s30  ;;  %s4654_s30 = sld [smem:[#allocation9 + $0x4]] }
  0xee   : > { %v1513_v6 = vstv %s4566_s8  ;;  %s4664_s8 = sld [smem:[#allocation8 + $0x78]] }
  0xef   : > { %v818_v34 = vadd.f32 %v816_v15, %v812_v24 }
  0xf0   : > { %1316 = vrot.lane.b32.xlu1 %v1311_v12, %s3904_s27  ;;  %1314 = vrot.lane.b32.xlu0 %v1310_v18, %s3904_s27  ;;  %v674_v12 = vadd.f32 %v672_v61, %v668_v62  ;;  %v1445_v18 = vstv %s4501_s17  ;;  %s4599_s17 = sld [smem:[#allocation6 + $0x3]] }
  0xf1   : > { %v1447_v5 = vmul.f32 %v1445_v18, %v4378_v26  ;;  %v1446_v32 = vmul.f32 %v1445_v18, %v4380_v27  ;;  %v1257_v18 = vmul.f32 %v1255_v8, %v4378_v26 }
  0xf2   : > { %v813_v56 = vadd.f32 %v811_v11, %v674_v12 }
  0xf4   : > { %1336 = vrot.lane.b32.xlu1 %v1331_v23, %s3905_s14  ;;  %1334 = vrot.lane.b32.xlu0 %v1330_v30, %s3905_s14  ;;  %v821_v23 = vstv %s4510_s23  ;;  %v1465_v30 = vstv %s4514_s15  ;;  %s4607_s23 = sld [smem:[#allocation5 + $0x25]]  ;;  %s4609_s15 = sld [smem:[#allocation9 + $0x3]] }
  0xf5   : > { %v823_v14 = vmul.f32 %v4215_v13, %v821_v23  ;;  %v822_v63 = vmul.f32 %v4210_v10, %v821_v23  ;;  %v1467_v21 = vmul.f32 %v1465_v30, %v4378_v26  ;;  %v1222_v10 = vmul.f32 %v1221_v22, %v4380_v27 }
  0xf6   : > { %v1533_v23 = vstv %s4572_s9  ;;  %v1289_v22 = vstv %s4593_s12  ;;  %s4674_s9 = sld [smem:[#allocation5 + $0x28]]  ;;  %s4707_s12 = sld [smem:[#allocation9 + $0x5]] }
  0xf7   : > { %v824_v29 = vadd.f32 %v822_v63, %v818_v34  ;;  %v1547_v63 = vstv %s4590_s13  ;;  %s4701_s13 = sld [smem:[#allocation5 + $0x29]] }
  0xf8   : > { %1350 = vrot.lane.b32.xlu1 %v1345_v33, %s3904_s27  ;;  %1348 = vrot.lane.b32.xlu0 %v1344_v40, %s3904_s27  ;;  %v819_v33 = vadd.f32 %v817_v20, %v813_v56 }
  0xfa   : > { %v825_v47 = vadd.f32 %v823_v14, %v819_v33  ;;  %v374_v14 = vstv %s4588_s11  ;;  %s4689_s11 = sld [smem:[#allocation8 + $0x63]] }
  0xfc   : > { %1370 = vrot.lane.b32.xlu1 %v1365_v45, %s3905_s14  ;;  %1368 = vrot.lane.b32.xlu0 %v1364_v46, %s3905_s14  ;;  %v1466_v45 = vmul.f32 %v1465_v30, %v4380_v27  ;;  %v1479_v46 = vstv %s4536_s24  ;;  %v4580_v59 = vmax.f32 %v825_v47, 0.0  ;;  %v1051_v30 = vstv %s4585_s10  ;;  %s4623_s24 = sld [smem:[#allocation5 + $0x26]]  ;;  %s4686_s10 = sld [smem:[#allocation8 + $0x50]] }
  0xfd   : > { %v1481_v0 = vmul.f32 %v1479_v46, %v4378_v26  ;;  %v1480_v35 = vmul.f32 %v1479_v46, %v4380_v27  ;;  %v1052_v41 = vmul.f32 %v1051_v30, %v4226_v37  ;;  %v4651_v46 = vld [vmem:[%s4081_s18] sm:$0xff] }
  0xfe   : > { %v1501_v11 = vmul.f32 %v1499_v3, %v4580_v59  ;;  %v1515_v15 = vmul.f32 %v1513_v6, %v4580_v59  ;;  %v375_v47 = vmul.f32 %v4651_v46, %v374_v14 }
 0x100   : > { %1384 = vrot.lane.b32.xlu1 %v1379_v53, %s3904_s27  ;;  %1382 = vrot.lane.b32.xlu0 %v1378_v54, %s3904_s27  ;;  %v935_v54 = vstv %s4542_s25  ;;  %s4631_s25 = sld [smem:[#allocation8 + $0x38]] }
 0x101   : > { %v987_v61 = vadd.f32 %v985_v51, %v935_v54  ;;  %v986_v62 = vadd.f32 %v984_v28, %v935_v54  ;;  %v1291_v51 = vmul.f32 %v1289_v22, %v4378_v26  ;;  %v1290_v28 = vmul.f32 %v1289_v22, %v4380_v27 }
 0x102   : > { %v939_v54 = vstv %s4609_s15  ;;  %s4727_s15 = sld [smem:[#allocation5 + $0x2a]] }
 0x104   : > { %1404 = vrot.lane.b32.xlu1 %v1399_v43, %s3905_s14  ;;  %1402 = vrot.lane.b32.xlu0 %v1398_v1, %s3905_s14  ;;  %v4582_v43 = vmax.f32 %v824_v29, 0.0  ;;  %v1017_v1 = vstv %s4550_s26  ;;  %s4634_s26 = sld [smem:[#allocation8 + $0x4b]] }
 0x105   : > { %v1018_v16 = vmul.f32 %v1017_v1, %v4226_v37 }
 0x106   : > { %v1500_v12 = vmul.f32 %v1499_v3, %v4582_v43  ;;  %v1514_v25 = vmul.f32 %v1513_v6, %v4582_v43 }
 0x108   : > { %1418 = vrot.lane.b32.xlu1 %v1413_v9, %s3904_s27  ;;  %1416 = vrot.lane.b32.xlu0 %v1412_v50, %s3904_s27  ;;  %v937_v9 = vstv %s4559_s7  ;;  %v1019_v50 = vmul.f32 %v1017_v1, %v4228_v38  ;;  %s4662_s7 = sld [smem:[#allocation8 + $0x4f]] }
 0x10a   : > { %v1021_v24 = vadd.f32 %v1019_v50, %v937_v9 }
 0x10c   : > { %1438 = vrot.lane.b32.xlu1 %v1433_v19, %s3905_s14  ;;  %1436 = vrot.lane.b32.xlu0 %v1432_v57, %s3905_s14  ;;  %v1256_v19 = vmul.f32 %v1255_v8, %v4380_v27  ;;  %v4677_v8 = vld [vmem:[%s4081_s18 + $0x1] sm:$0xff] }
 0x10e   : > { %v975_v39 = vpop.permute.xlu1 %974  ;;  %v961_v40 = vpop.permute.xlu0 %960 }
 0x10f   : > { %v966_v13 = vadd.f32 %v961_v40, %v952_v31  ;;  %v1020_v31 = vadd.f32 %v1018_v16, %v937_v9  ;;  %v1053_v40 = vmul.f32 %v1051_v30, %v4228_v38  ;;  %v4704_v30 = vld [vmem:[%s4081_s18 + $0x2] sm:$0xff] }
 0x110   : > { %1452 = vrot.lane.b32.xlu1 %v1447_v5, %s3904_s27  ;;  %1450 = vrot.lane.b32.xlu0 %v1446_v32, %s3904_s27 }
 0x111   : > { %v980_v48 = vadd.f32 %v975_v39, %v966_v13  ;;  %v1535_v39 = vmul.f32 %v1533_v23, %v4580_v59  ;;  %v304_v13 = vstv %s4599_s17  ;;  %v1055_v50 = vadd.f32 %v1053_v40, %v939_v54  ;;  %s4715_s17 = sld [smem:[#allocation8 + $0x67]] }
 0x112   : > { %v977_v52 = vpop.permute.xlu1 %976  ;;  %v963_v53 = vpop.permute.xlu0 %962  ;;  %v941_v40 = vstv %s4654_s30  ;;  %s4780_s30 = sld [smem:[#allocation5 + $0x2c]] }
 0x113   : > { %v967_v36 = vadd.f32 %v963_v53, %v953_v44  ;;  %v4575_v58 = vadd.f32 %v1222_v10, %v980_v48  ;;  %v1534_v44 = vmul.f32 %v1533_v23, %v4582_v43 }
 0x114   : > { %1472 = vrot.lane.b32.xlu1 %v1467_v21, %s3905_s14  ;;  %1470 = vrot.lane.b32.xlu0 %v1466_v45, %s3905_s14  ;;  %v4644_v21 = vld [vmem:[%s4081_s18 + $0x8] sm:$0x3f]  ;;  %v380_v45 = vstv %s4607_s23  ;;  %s4717_s23 = sld [smem:[#allocation8 + $0x90]] }
 0x115   : > { %v981_v60 = vadd.f32 %v977_v52, %v967_v36  ;;  %v376_v10 = vmul.f32 %v4644_v21, %v374_v14  ;;  %v1549_v36 = vmul.f32 %v1547_v63, %v4580_v59  ;;  %v381_v9 = vmul.f32 %v4677_v8, %v380_v45 }
 0x116   : > { %v997_v42 = vpop.permute.xlu1 %996  ;;  %v995_v7 = vpop.permute.xlu0 %994 }
 0x117   : > { %v4597_v2 = vadd.f32 %v1223_v55, %v981_v60  ;;  %v1001_v49 = vadd.f32 %v997_v42, %v987_v61  ;;  %v1000_v17 = vadd.f32 %v995_v7, %v986_v62  ;;  %v1085_v55 = vstv %s4615_s21  ;;  %v4668_v61 = vld [vmem:[%s4081_s18 + $0x9] sm:$0x3f]  ;;  %s4742_s21 = sld [smem:[#allocation8 + $0x7b]] }
 0x118   : > { %1486 = vrot.lane.b32.xlu1 %v1481_v0, %s3904_s27  ;;  %1484 = vrot.lane.b32.xlu0 %v1480_v35, %s3904_s27  ;;  %v1567_v0 = vstv %s4613_s16  ;;  %v1548_v60 = vmul.f32 %v1547_v63, %v4582_v43  ;;  %v382_v62 = vmul.f32 %v4668_v61, %v380_v45  ;;  %v378_v3 = vadd.f32 %v376_v10, %v304_v13  ;;  %s4739_s16 = sld [smem:[#allocation8 + $0x68]] }
 0x119   : > { %v386_v42 = vstv %s4623_s24  ;;  %v377_v7 = vadd.f32 %v375_v47, %v304_v13  ;;  %v1601_v13 = vstv %s4662_s7  ;;  %s4754_s24 = sld [smem:[#allocation5 + $0x2b]] }
 0x11a   : > { %v1011_v57 = vpop.permute.xlu1 %1010  ;;  %v1009_v4 = vpop.permute.xlu0 %1008  ;;  %s4793_s7 = sld [smem:[#allocation8 + $0x93]] }
 0x11b   : > { %v1015_v20 = vadd.f32 %v1011_v57, %v1001_v49  ;;  %v1014_v56 = vadd.f32 %v1009_v4, %v1000_v17  ;;  %v1087_v17 = vmul.f32 %v1085_v55, %v4228_v38  ;;  %v1569_v57 = vmul.f32 %v1567_v0, %v4580_v59 }
 0x11c   : > { %1506 = vrot.lane.b32.xlu1 %v1501_v11, %s3905_s14  ;;  %1504 = vrot.lane.b32.xlu0 %v1500_v12, %s3905_s14  ;;  %v1054_v11 = vadd.f32 %v1052_v41, %v939_v54  ;;  %v1568_v4 = vmul.f32 %v1567_v0, %v4582_v43 }
 0x11d   : > { %v4625_v5 = vadd.f32 %v1257_v18, %v1015_v20  ;;  %v4627_v32 = vadd.f32 %v1256_v19, %v1014_v56  ;;  %v1581_v18 = vstv %s4631_s25  ;;  %v1323_v19 = vstv %s4634_s26  ;;  %v4695_v56 = vld [vmem:[%s4081_s18 + $0xa] sm:$0x3f]  ;;  %s4760_s25 = sld [smem:[#allocation9 + $0x6]]  ;;  %s4768_s26 = sld [smem:[#allocation8 + $0x7f]] }
 0x11e   : > { %v1031_v33 = vpop.permute.xlu1 %1030  ;;  %v1029_v34 = vpop.permute.xlu0 %1028  ;;  %v1086_v20 = vmul.f32 %v1085_v55, %v4226_v37  ;;  %v388_v23 = vmul.f32 %v4695_v56, %v386_v42  ;;  %v1324_v63 = vmul.f32 %v1323_v19, %v4380_v27  ;;  %v1583_v41 = vmul.f32 %v1581_v18, %v4580_v59 }
 0x11f   : > { %v1035_v29 = vadd.f32 %v1031_v33, %v1021_v24  ;;  %v1034_v48 = vadd.f32 %v1029_v34, %v1020_v31  ;;  %v384_v24 = vadd.f32 %v382_v62, %v378_v3  ;;  %v387_v31 = vmul.f32 %v4704_v30, %v386_v42 }
 0x120   : > { %1520 = vrot.lane.b32.xlu1 %v1515_v15, %s3904_s27  ;;  %1518 = vrot.lane.b32.xlu0 %v1514_v25, %s3904_s27  ;;  %v525_v15 = vstv %s4648_s28  ;;  %v383_v25 = vadd.f32 %v381_v9, %v377_v7  ;;  %v1325_v34 = vmul.f32 %v1323_v19, %v4378_v26  ;;  %v1582_v47 = vmul.f32 %v1581_v18, %v4582_v43  ;;  %v4757_v19 = vld [vmem:[%s4081_s18 + $0x11] sm:$0xff]  ;;  %s4770_s28 = sld [smem:[#allocation8 + $0xa8]] }
 0x121   : > { %v1088_v0 = vadd.f32 %v1086_v20, %v941_v40  ;;  %v1615_v3 = vstv %s4686_s10  ;;  %v1357_v42 = vstv %s4689_s11  ;;  %v1603_v7 = vmul.f32 %v1601_v13, %v4580_v59  ;;  %s4818_s10 = sld [smem:[#allocation9 + $0x7]] }
 0x122   : > { %v1045_v52 = vpop.permute.xlu1 %1044  ;;  %v1043_v53 = vpop.permute.xlu0 %1042  ;;  %v1602_v9 = vmul.f32 %v1601_v13, %v4582_v43  ;;  %s4821_s11 = sld [smem:[#allocation8 + $0x97]] }
 0x123   : > { %v1049_v35 = vadd.f32 %v1045_v52, %v1035_v29  ;;  %v1048_v1 = vadd.f32 %v1043_v53, %v1034_v48  ;;  %v4721_v29 = vld [vmem:[%s4081_s18 + $0x18] sm:$0x3f]  ;;  %v389_v52 = vadd.f32 %v387_v31, %v383_v25  ;;  %v4730_v53 = vld [vmem:[%s4081_s18 + $0x10] sm:$0xff]  ;;  %v943_v31 = vstv %s4707_s12  ;;  %s4844_s12 = sld [smem:[#allocation8 + $0xab]] }
 0x124   : > { %1540 = vrot.lane.b32.xlu1 %v1535_v39, %s3905_s14  ;;  %1538 = vrot.lane.b32.xlu0 %v1534_v44, %s3905_s14  ;;  %v1119_v44 = vstv %s4664_s8  ;;  %v527_v48 = vmul.f32 %v4721_v29, %v525_v15  ;;  %v526_v54 = vmul.f32 %v4730_v53, %v525_v15  ;;  %s4798_s8 = sld [smem:[#allocation8 + $0x80]] }
 0x125   : > { %v4680_v12 = vadd.f32 %v1291_v51, %v1049_v35  ;;  %v4682_v16 = vadd.f32 %v1290_v28, %v1048_v1  ;;  %v390_v51 = vadd.f32 %v388_v23, %v384_v24  ;;  %v531_v28 = vstv %s4674_s9  ;;  %s4807_s9 = sld [smem:[#allocation5 + $0x2d]] }
 0x126   : > { %v1065_v6 = vpop.permute.xlu1 %1064  ;;  %v1063_v49 = vpop.permute.xlu0 %1062  ;;  %v1121_v62 = vmul.f32 %v1119_v44, %v4228_v38  ;;  %v528_v18 = vadd.f32 %v526_v54, %v389_v52  ;;  %v1359_v23 = vmul.f32 %v1357_v42, %v4378_v26  ;;  %v1358_v24 = vmul.f32 %v1357_v42, %v4380_v27 }
 0x127   : > { %v1069_v14 = vadd.f32 %v1065_v6, %v1055_v50  ;;  %v1068_v33 = vadd.f32 %v1063_v49, %v1054_v11  ;;  %v1120_v50 = vmul.f32 %v1119_v44, %v4226_v37  ;;  %v4748_v11 = vld [vmem:[%s4081_s18 + $0x19] sm:$0x3f]  ;;  %v529_v49 = vadd.f32 %v527_v48, %v390_v51 }
 0x128   : > { %1554 = vrot.lane.b32.xlu1 %v1549_v36, %s3904_s27  ;;  %1552 = vrot.lane.b32.xlu0 %v1548_v60, %s3904_s27  ;;  %v1089_v36 = vadd.f32 %v1087_v17, %v941_v40  ;;  %v533_v6 = vmul.f32 %v4748_v11, %v531_v28  ;;  %v537_v17 = vstv %s4701_s13  ;;  %v4774_v40 = vld [vmem:[%s4081_s18 + $0x1a] sm:$0x3f]  ;;  %v1123_v48 = vadd.f32 %v1121_v62, %v943_v31  ;;  %s4831_s13 = sld [smem:[#allocation5 + $0x2e]] }
 0x129   : > { %v676_v44 = vstv %s4727_s15  ;;  %v1122_v51 = vadd.f32 %v1120_v50, %v943_v31  ;;  %s4876_s15 = sld [smem:[#allocation8 + $0xaf]] }
 0x12a   : > { %v1079_v22 = vpop.permute.xlu1 %1078  ;;  %v1077_v39 = vpop.permute.xlu0 %1076  ;;  %v535_v13 = vadd.f32 %v533_v6, %v529_v49  ;;  %v682_v6 = vstv %s4754_s24  ;;  %s4921_s24 = sld [smem:[#allocation8 + $0xa]] }
 0x12b   : > { %v1083_v10 = vadd.f32 %v1079_v22, %v1069_v14  ;;  %v1082_v45 = vadd.f32 %v1077_v39, %v1068_v33  ;;  %v1617_v14 = vmul.f32 %v1615_v3, %v4580_v59  ;;  %v1635_v33 = vstv %s4715_s17  ;;  %s4849_s17 = sld [smem:[#allocation8 + $0x98]] }
 0x12c   : > { %1574 = vrot.lane.b32.xlu1 %v1569_v57, %s3905_s14  ;;  %1572 = vrot.lane.b32.xlu0 %v1568_v4, %s3905_s14  ;;  %v532_v57 = vmul.f32 %v4757_v19, %v531_v28  ;;  %v1616_v39 = vmul.f32 %v1615_v3, %v4582_v43  ;;  %v1637_v3 = vmul.f32 %v1635_v33, %v4580_v59 }
 0x12d   : > { %v4733_v55 = vadd.f32 %v1325_v34, %v1083_v10  ;;  %v4735_v35 = vadd.f32 %v1324_v63, %v1082_v45  ;;  %v1153_v34 = vstv %s4717_s23  ;;  %v4783_v45 = vld [vmem:[%s4081_s18 + $0x12] sm:$0xff]  ;;  %v1636_v42 = vmul.f32 %v1635_v33, %v4582_v43  ;;  %s4858_s23 = sld [smem:[#allocation5 + $0x2f]] }
 0x12e   : > { %v1099_v1 = vpop.permute.xlu1 %1098  ;;  %v1097_v60 = vpop.permute.xlu0 %1096  ;;  %v534_v10 = vadd.f32 %v532_v57, %v528_v18  ;;  %v1154_v62 = vmul.f32 %v1153_v34, %v4226_v37  ;;  %v1187_v33 = vstv %s4770_s28  ;;  %s4949_s28 = sld [smem:[#allocation8 + $0x22]] }
 0x12f   : > { %v1103_v4 = vadd.f32 %v1099_v1, %v1089_v36  ;;  %v1102_v20 = vadd.f32 %v1097_v60, %v1088_v0  ;;  %v1155_v0 = vmul.f32 %v1153_v34, %v4228_v38  ;;  %v1649_v1 = vstv %s4739_s16  ;;  %s4888_s16 = sld [smem:[#allocation8 + $0x6]] }
 0x130   : > { %1588 = vrot.lane.b32.xlu1 %v1583_v41, %s3904_s27  ;;  %1586 = vrot.lane.b32.xlu0 %v1582_v47, %s3904_s27  ;;  %v539_v41 = vmul.f32 %v4774_v40, %v537_v17  ;;  %v538_v47 = vmul.f32 %v4783_v45, %v537_v17  ;;  %v1391_v60 = vstv %s4742_s21  ;;  %v4810_v17 = vld [vmem:[%s4081_s18 + $0x20] sm:$0xff]  ;;  %v1651_v31 = vmul.f32 %v1649_v1, %v4580_v59  ;;  %s4899_s21 = sld [smem:[#allocation8 + $0xb0]] }
 0x131   : > { %v677_v18 = vmul.f32 %v4810_v17, %v676_v44 }
 0x132   : > { %v1113_v15 = vpop.permute.xlu1 %1112  ;;  %v1111_v25 = vpop.permute.xlu0 %1110  ;;  %v541_v50 = vadd.f32 %v539_v41, %v535_v13  ;;  %v540_v49 = vadd.f32 %v538_v47, %v534_v10  ;;  %v4834_v47 = vld [vmem:[%s4081_s18 + $0x21] sm:$0xff] }
 0x133   : > { %v1117_v63 = vadd.f32 %v1113_v15, %v1103_v4  ;;  %v1116_v22 = vadd.f32 %v1111_v25, %v1102_v20  ;;  %v1393_v20 = vmul.f32 %v1391_v60, %v4378_v26  ;;  %v945_v25 = vstv %s4760_s25  ;;  %s4928_s25 = sld [smem:[#allocation8 + $0x1e]] }
 0x134   : > { %1608 = vrot.lane.b32.xlu1 %v1603_v7, %s3905_s14  ;;  %1606 = vrot.lane.b32.xlu0 %v1602_v9, %s3905_s14  ;;  %v4801_v7 = vld [vmem:[%s4081_s18 + $0x28] sm:$0x3f]  ;;  %v679_v10 = vadd.f32 %v677_v18, %v540_v49 }
 0x135   : > { %v4786_v28 = vadd.f32 %v1359_v23, %v1117_v63  ;;  %v4788_v52 = vadd.f32 %v1358_v24, %v1116_v22  ;;  %v678_v9 = vmul.f32 %v4801_v7, %v676_v44  ;;  %v1392_v23 = vmul.f32 %v1391_v60, %v4380_v27 }
 0x136   : > { %v1133_v54 = vpop.permute.xlu1 %1132  ;;  %v1131_v36 = vpop.permute.xlu0 %1130  ;;  %v1650_v22 = vmul.f32 %v1649_v1, %v4582_v43  ;;  %v688_v44 = vstv %s4780_s30  ;;  %s4951_s30 = sld [smem:[#allocation8 + $0x36]] }
 0x137   : > { %v1137_v57 = vadd.f32 %v1133_v54, %v1123_v48  ;;  %v1136_v4 = vadd.f32 %v1131_v36, %v1122_v51  ;;  %v680_v13 = vadd.f32 %v678_v9, %v541_v50  ;;  %v683_v48 = vmul.f32 %v4834_v47, %v682_v6 }
 0x138   : > { %1622 = vrot.lane.b32.xlu1 %v1617_v14, %s3904_s27  ;;  %1620 = vrot.lane.b32.xlu0 %v1616_v39, %s3904_s27  ;;  %v1669_v14 = vstv %s4768_s26  ;;  %v4825_v39 = vld [vmem:[%s4081_s18 + $0x29] sm:$0x3f]  ;;  %v1157_v51 = vadd.f32 %v1155_v0, %v945_v25  ;;  %v1156_v54 = vadd.f32 %v1154_v62, %v945_v25  ;;  %v1189_v9 = vmul.f32 %v1187_v33, %v4228_v38  ;;  %s4935_s26 = sld [smem:[#allocation8 + $0xb]] }
 0x139   : > { %v684_v41 = vmul.f32 %v4825_v39, %v682_v6  ;;  %v1425_v50 = vstv %s4793_s7  ;;  %v1670_v49 = vmul.f32 %v1669_v14, %v4582_v43  ;;  %v1188_v0 = vmul.f32 %v1187_v33, %v4226_v37  ;;  %v4852_v6 = vld [vmem:[%s4081_s18 + $0x2a] sm:$0x3f]  ;;  %v4861_v37 = vld [vmem:[%s4081_s18 + $0x22] sm:$0xff]  ;;  %s4958_s7 = sld [smem:[#allocation5 + $0x30]] }
 0x13a   : > { %v1147_v24 = vpop.permute.xlu1 %1146  ;;  %v1145_v15 = vpop.permute.xlu0 %1144  ;;  %v1683_v62 = vstv %s4798_s8  ;;  %v690_v18 = vmul.f32 %v4852_v6, %v688_v44  ;;  %v1426_v25 = vmul.f32 %v1425_v50, %v4380_v27  ;;  %v947_v33 = vstv %s4818_s10  ;;  %s4961_s8 = sld [smem:[#allocation8 + $0x23]]  ;;  %s4974_s10 = sld [smem:[#allocation6 + $0x4]] }
 0x13b   : > { %v1151_v34 = vadd.f32 %v1147_v24, %v1137_v57  ;;  %v1150_v63 = vadd.f32 %v1145_v15, %v1136_v4  ;;  %v686_v38 = vadd.f32 %v684_v41, %v680_v13  ;;  %v827_v57 = vstv %s4807_s9  ;;  %s4968_s9 = sld [smem:[#allocation5 + $0x31]] }
 0x13c   : > { %1642 = vrot.lane.b32.xlu1 %v1637_v3, %s3905_s14  ;;  %1640 = vrot.lane.b32.xlu0 %v1636_v42, %s3905_s14  ;;  %v1671_v42 = vmul.f32 %v1669_v14, %v4580_v59  ;;  %v685_v4 = vadd.f32 %v683_v48, %v679_v10  ;;  %v1427_v15 = vmul.f32 %v1425_v50, %v4378_v26  ;;  %v4871_v10 = vld [vmem:[%s4081_s18 + $0x38] sm:$0x3f] }
 0x13d   : > { %v4837_v36 = vadd.f32 %v1393_v20, %v1151_v34  ;;  %v4839_v1 = vadd.f32 %v1392_v23, %v1150_v63  ;;  %v689_v20 = vmul.f32 %v4861_v37, %v688_v44  ;;  %v1685_v34 = vmul.f32 %v1683_v62, %v4580_v59 }
 0x13e   : > { %v1167_v60 = vpop.permute.xlu1 %1166  ;;  %v1165_v3 = vpop.permute.xlu0 %1164  ;;  %v1703_v63 = vstv %s4821_s11  ;;  %v1684_v13 = vmul.f32 %v1683_v62, %v4582_v43  ;;  %v829_v44 = vmul.f32 %v4871_v10, %v827_v57  ;;  %v692_v48 = vadd.f32 %v690_v18, %v686_v38  ;;  %s4976_s11 = sld [smem:[#allocation8 + $0x3a]] }
 0x13f   : > { %v1171_v23 = vadd.f32 %v1167_v60, %v1157_v51  ;;  %v1170_v24 = vadd.f32 %v1165_v3, %v1156_v54  ;;  %v833_v51 = vstv %s4831_s13  ;;  %v691_v54 = vadd.f32 %v689_v20, %v685_v4  ;;  %v4880_v60 = vld [vmem:[%s4081_s18 + $0x30] sm:$0xff]  ;;  %v4894_v20 = vld [vmem:[%s4081_s18 + $0x39] sm:$0x3f]  ;;  %s4983_s13 = sld [smem:[#allocation5 + $0x32]] }
 0x140   : > { %1656 = vrot.lane.b32.xlu1 %v1651_v31, %s3904_s27  ;;  %1654 = vrot.lane.b32.xlu0 %v1650_v22, %s3904_s27  ;;  %6746 = vst [vmem:[#allocation15_spill] sm:$0xff] %v4880_v60  ;;  %v828_v3 = vmul.f32 %v4880_v60, %v827_v57  ;;  %v1191_v50 = vadd.f32 %v1189_v9, %v947_v33  ;;  %v1717_v4 = vstv %s4849_s17  ;;  %6747 = vst [vmem:[#allocation16_spill] sm:$0xff] %v4894_v20  ;;  %s4995_s17 = sld [smem:[#allocation8 + $0x3b]] }
 0x141   : > { %v1190_v62 = vadd.f32 %v1188_v0, %v947_v33  ;;  %v1705_v18 = vmul.f32 %v1703_v63, %v4580_v59  ;;  %v1704_v38 = vmul.f32 %v1703_v63, %v4582_v43  ;;  %v835_v9 = vmul.f32 %v4894_v20, %v833_v51 }
 0x142   : > { %v1181_v31 = vpop.permute.xlu1 %1180  ;;  %v1179_v14 = vpop.permute.xlu0 %1178  ;;  %v831_v0 = vadd.f32 %v829_v44, %v692_v48  ;;  %v839_v57 = vstv %s4858_s23  ;;  %v1719_v20 = vmul.f32 %v1717_v4, %v4580_v59  ;;  %v1718_v48 = vmul.f32 %v1717_v4, %v4582_v43  ;;  %s5003_s23 = sld [smem:[#allocation5 + $0x33]] }
 0x143   : > { %v1185_v22 = vadd.f32 %v1181_v31, %v1171_v23  ;;  %v1184_v41 = vadd.f32 %v1179_v14, %v1170_v24  ;;  %v1459_v31 = vstv %s4844_s12  ;;  %s4991_s12 = sld [smem:[#allocation8 + $0x4e]] }
 0x144   : > { %1676 = vrot.lane.b32.xlu1 %v1671_v42, %s3905_s14  ;;  %1674 = vrot.lane.b32.xlu0 %v1670_v49, %s3905_s14 }
 0x145   : > { %v4883_v23 = vadd.f32 %v1427_v15, %v1185_v22  ;;  %v4885_v24 = vadd.f32 %v1426_v25, %v1184_v41  ;;  %v830_v15 = vadd.f32 %v828_v3, %v691_v54  ;;  %v4903_v25 = vld [vmem:[%s4081_s18 + $0x31] sm:$0xff]  ;;  %v1461_v22 = vmul.f32 %v1459_v31, %v4378_v26  ;;  %v4911_v54 = vld [vmem:[%s4081_s18 + $0x3a] sm:$0x3f] }
 0x146   : > { %v1201_v42 = vpop.permute.xlu1 %1200  ;;  %v1199_v49 = vpop.permute.xlu0 %1198  ;;  %v834_v14 = vmul.f32 %v4903_v25, %v833_v51  ;;  %v841_v51 = vmul.f32 %v4911_v54, %v839_v57  ;;  %v1737_v26 = vstv %s4876_s15  ;;  %s5012_s15 = sld [smem:[#allocation8 + $0x52]] }
 0x147   : > { %v1205_v33 = vadd.f32 %v1201_v42, %v1191_v50  ;;  %v1204_v63 = vadd.f32 %v1199_v49, %v1190_v62  ;;  %v4918_v50 = vld [vmem:[%s4081_s18 + $0x32] sm:$0xff] }
 0x148   : > { %1690 = vrot.lane.b32.xlu1 %v1685_v34, %s3904_s27  ;;  %1688 = vrot.lane.b32.xlu0 %v1684_v13, %s3904_s27  ;;  %v1460_v34 = vmul.f32 %v1459_v31, %v4380_v27  ;;  %v837_v27 = vadd.f32 %v835_v9, %v831_v0  ;;  %v836_v3 = vadd.f32 %v834_v14, %v830_v15  ;;  %v1751_v9 = vstv %s4899_s21  ;;  %s5027_s21 = sld [smem:[#allocation8 + $0x66]] }
 0x149   : > { %v840_v62 = vmul.f32 %v4918_v50, %v839_v57 }
 0x14a   : > { %v1215_v41 = vpop.permute.xlu1 %1214  ;;  %v1213_v13 = vpop.permute.xlu0 %1212  ;;  %v843_v0 = vadd.f32 %v841_v51, %v837_v27 }
 0x14b   : > { %v1219_v60 = vadd.f32 %v1215_v41, %v1205_v33  ;;  %v1218_v44 = vadd.f32 %v1213_v13, %v1204_v63  ;;  %v1493_v33 = vstv %s4888_s16  ;;  %v842_v57 = vadd.f32 %v840_v62, %v836_v3  ;;  %s5019_s16 = sld [smem:[#allocation5 + $0x34]] }
 0x14c   : > { %1710 = vrot.lane.b32.xlu1 %v1705_v18, %s3905_s14  ;;  %1708 = vrot.lane.b32.xlu0 %v1704_v38, %s3905_s14  ;;  %v1739_v18 = vmul.f32 %v1737_v26, %v4580_v59  ;;  %v1738_v38 = vmul.f32 %v1737_v26, %v4582_v43  ;;  %v1495_v14 = vmul.f32 %v1493_v33, %v4580_v59  ;;  %v1527_v62 = vstv %s4928_s25  ;;  %s5038_s25 = sld [smem:[#allocation5 + $0x35]] }
 0x14d   : > { %v4923_v42 = vadd.f32 %v1461_v22, %v1219_v60  ;;  %v4925_v49 = vadd.f32 %v1460_v34, %v1218_v44  ;;  %v1494_v63 = vmul.f32 %v1493_v33, %v4582_v43  ;;  %v1753_v13 = vmul.f32 %v1751_v9, %v4580_v59 }
 0x14e   : > { %v1235_v31 = vpop.permute.xlu1 %1234  ;;  %v1233_v4 = vpop.permute.xlu0 %1232  ;;  %v4945_v44 = vmax.f32 %v843_v0, 0.0  ;;  %v1785_v33 = vstv %s4935_s26  ;;  %v1528_v0 = vmul.f32 %v1527_v62, %v4582_v43  ;;  %s5047_s26 = sld [smem:[#allocation8 + $0x6a]] }
 0x14f   : > { %v1239_v60 = vadd.f32 %v1235_v31, %v4597_v2  ;;  %v1238_v15 = vadd.f32 %v1233_v4, %v4575_v58  ;;  %v1752_v2 = vmul.f32 %v1751_v9, %v4582_v43  ;;  %v4947_v58 = vmax.f32 %v842_v57, 0.0 }
 0x150   : > { %1724 = vrot.lane.b32.xlu1 %v1719_v20, %s3904_s27  ;;  %1722 = vrot.lane.b32.xlu0 %v1718_v48, %s3904_s27  ;;  %v1771_v48 = vstv %s4921_s24  ;;  %v1529_v9 = vmul.f32 %v1527_v62, %v4580_v59  ;;  %s5032_s24 = sld [smem:[#allocation8 + $0x53]] }
 0x151   : > { %v1773_v31 = vmul.f32 %v1771_v48, %v4945_v44  ;;  %v1772_v4 = vmul.f32 %v1771_v48, %v4947_v58 }
 0x152   : > { %v1249_v22 = vpop.permute.xlu1 %1248  ;;  %v1247_v20 = vpop.permute.xlu0 %1246 }
 0x153   : > { %v1253_v34 = vadd.f32 %v1249_v22, %v1239_v60  ;;  %v1252_v41 = vadd.f32 %v1247_v20, %v1238_v15  ;;  %v1561_v22 = vstv %s4951_s30  ;;  %s5062_s30 = sld [smem:[#allocation8 + $0x7e]] }
 0x154   : > { %1744 = vrot.lane.b32.xlu1 %v1739_v18, %s3905_s14  ;;  %1742 = vrot.lane.b32.xlu0 %v1738_v38, %s3905_s14 }
 0x155   : > { %v4954_v51 = vadd.f32 %v1495_v14, %v1253_v34  ;;  %v4956_v26 = vadd.f32 %v1494_v63, %v1252_v41  ;;  %v1805_v63 = vstv %s4949_s28  ;;  %v392_v41 = vstv %s4958_s7  ;;  %s5054_s28 = sld [smem:[#allocation5 + $0x36]]  ;;  %s5067_s7 = sld [smem:[#allocation8 + $0x6b]] }
 0x156   : > { %v1269_v27 = vpop.permute.xlu1 %1268  ;;  %v1267_v3 = vpop.permute.xlu0 %1266  ;;  %v1807_v48 = vmul.f32 %v1805_v63, %v4945_v44  ;;  %v1806_v62 = vmul.f32 %v1805_v63, %v4947_v58 }
 0x157   : > { %v1273_v18 = vadd.f32 %v1269_v27, %v4625_v5  ;;  %v1272_v38 = vadd.f32 %v1267_v3, %v4627_v32  ;;  %v1787_v5 = vmul.f32 %v1785_v33, %v4945_v44  ;;  %v1786_v32 = vmul.f32 %v1785_v33, %v4947_v58 }
 0x158   : > { %1758 = vrot.lane.b32.xlu1 %v1753_v13, %s3904_s27  ;;  %1756 = vrot.lane.b32.xlu0 %v1752_v2, %s3904_s27  ;;  %v1819_v27 = vstv %s4961_s8  ;;  %v1563_v3 = vmul.f32 %v1561_v22, %v4580_v59  ;;  %v393_v33 = vmul.f32 %v4651_v46, %v392_v41  ;;  %s5073_s8 = sld [smem:[#allocation5 + $0x37]] }
 0x159   : > { %v1820_v46 = vmul.f32 %v1819_v27, %v4947_v58 }
 0x15a   : > { %v1283_v57 = vpop.permute.xlu1 %1282  ;;  %v1281_v60 = vpop.permute.xlu0 %1280 }
 0x15b   : > { %v1287_v15 = vadd.f32 %v1283_v57, %v1273_v18  ;;  %v1286_v14 = vadd.f32 %v1281_v60, %v1272_v38 }
 0x15c   : > { %1778 = vrot.lane.b32.xlu1 %v1773_v31, %s3905_s14  ;;  %1776 = vrot.lane.b32.xlu0 %v1772_v4, %s3905_s14  ;;  %v394_v31 = vmul.f32 %v4644_v21, %v392_v41  ;;  %v398_v4 = vstv %s4968_s9  ;;  %s5083_s9 = sld [smem:[#allocation8 + $0x82]] }
 0x15d   : > { %v4986_v20 = vadd.f32 %v1529_v9, %v1287_v15  ;;  %v4988_v34 = vadd.f32 %v1528_v0, %v1286_v14  ;;  %v306_v9 = vstv %s4974_s10  ;;  %v1562_v0 = vmul.f32 %v1561_v22, %v4582_v43  ;;  %s5089_s10 = sld [smem:[#allocation5 + $0x38]] }
 0x15e   : > { %v1303_v13 = vpop.permute.xlu1 %1302  ;;  %v1301_v2 = vpop.permute.xlu0 %1300  ;;  %v1821_v15 = vmul.f32 %v1819_v27, %v4945_v44  ;;  %v1839_v14 = vstv %s4976_s11  ;;  %v395_v63 = vadd.f32 %v393_v33, %v306_v9  ;;  %v399_v22 = vmul.f32 %v4677_v8, %v398_v4  ;;  %s5097_s11 = sld [smem:[#allocation8 + $0x96]] }
 0x15f   : > { %v1307_v18 = vadd.f32 %v1303_v13, %v4680_v12  ;;  %v1306_v38 = vadd.f32 %v1301_v2, %v4682_v16  ;;  %v400_v12 = vmul.f32 %v4668_v61, %v398_v4  ;;  %v396_v16 = vadd.f32 %v394_v31, %v306_v9 }
 0x160   : > { %1792 = vrot.lane.b32.xlu1 %v1787_v5, %s3904_s27  ;;  %1790 = vrot.lane.b32.xlu0 %v1786_v32, %s3904_s27  ;;  %v404_v32 = vstv %s4983_s13  ;;  %v1595_v61 = vstv %s4991_s12  ;;  %v401_v4 = vadd.f32 %v399_v22, %v395_v63  ;;  %s5102_s13 = sld [smem:[#allocation8 + $0x83]]  ;;  %s5108_s12 = sld [smem:[#allocation5 + $0x39]] }
 0x161   : > { %v1853_v31 = vstv %s4995_s17  ;;  %v406_v33 = vmul.f32 %v4695_v56, %v404_v32  ;;  %v402_v8 = vadd.f32 %v400_v12, %v396_v16  ;;  %v1596_v56 = vmul.f32 %v1595_v61, %v4582_v43  ;;  %s5118_s17 = sld [smem:[#allocation8 + $0x9a]] }
 0x162   : > { %v1317_v57 = vpop.permute.xlu1 %1316  ;;  %v1315_v60 = vpop.permute.xlu0 %1314 }
 0x163   : > { %v1321_v21 = vadd.f32 %v1317_v57, %v1307_v18  ;;  %v1320_v5 = vadd.f32 %v1315_v60, %v1306_v38  ;;  %v405_v18 = vmul.f32 %v4704_v30, %v404_v32  ;;  %v1854_v30 = vmul.f32 %v1853_v31, %v4947_v58 }
 0x164   : > { %1812 = vrot.lane.b32.xlu1 %v1807_v48, %s3905_s14  ;;  %1810 = vrot.lane.b32.xlu0 %v1806_v62, %s3905_s14  ;;  %v1841_v48 = vmul.f32 %v1839_v14, %v4945_v44  ;;  %v1840_v62 = vmul.f32 %v1839_v14, %v4947_v58  ;;  %v1873_v14 = vstv %s5012_s15  ;;  %s5132_s15 = sld [smem:[#allocation8 + $0xae]] }
 0x165   : > { %v5022_v41 = vadd.f32 %v1563_v3, %v1321_v21  ;;  %v5024_v13 = vadd.f32 %v1562_v0, %v1320_v5  ;;  %v543_v3 = vstv %s5003_s23  ;;  %v1597_v0 = vmul.f32 %v1595_v61, %v4580_v59  ;;  %s5124_s23 = sld [smem:[#allocation5 + $0x3a]] }
 0x166   : > { %v1337_v2 = vpop.permute.xlu1 %1336  ;;  %v1335_v27 = vpop.permute.xlu0 %1334  ;;  %v407_v12 = vadd.f32 %v405_v18, %v401_v4  ;;  %v544_v16 = vmul.f32 %v4730_v53, %v543_v3  ;;  %v1874_v61 = vmul.f32 %v1873_v14, %v4947_v58 }
 0x167   : > { %6748 = vst [vmem:[#allocation17_spill] sm:$0xff] %v5024_v13  ;;  %v1341_v38 = vadd.f32 %v1337_v2, %v4733_v55  ;;  %v1340_v9 = vadd.f32 %v1335_v27, %v4735_v35  ;;  %v545_v55 = vmul.f32 %v4721_v29, %v543_v3  ;;  %v408_v35 = vadd.f32 %v406_v33, %v402_v8 }
 0x168   : > { %1826 = vrot.lane.b32.xlu1 %v1821_v15, %s3904_s27  ;;  %1824 = vrot.lane.b32.xlu0 %v1820_v46, %s3904_s27  ;;  %v1855_v15 = vmul.f32 %v1853_v31, %v4945_v44  ;;  %v549_v46 = vstv %s5019_s16  ;;  %v1629_v29 = vstv %s5027_s21  ;;  %v1875_v27 = vmul.f32 %v1873_v14, %v4945_v44  ;;  %s5137_s16 = sld [smem:[#allocation8 + $0x9b]] }
 0x169   : > { %v547_v53 = vadd.f32 %v545_v55, %v408_v35  ;;  %v555_v31 = vstv %s5038_s25  ;;  %v546_v33 = vadd.f32 %v544_v16, %v407_v12  ;;  %v550_v8 = vmul.f32 %v4757_v19, %v549_v46  ;;  %s5143_s21 = sld [smem:[#allocation5 + $0x3b]] }
 0x16a   : > { %v1351_v57 = vpop.permute.xlu1 %1350  ;;  %v1349_v60 = vpop.permute.xlu0 %1348  ;;  %v1631_v18 = vmul.f32 %v1629_v29, %v4580_v59  ;;  %v557_v19 = vmul.f32 %v4774_v40, %v555_v31  ;;  %v1663_v40 = vstv %s5062_s30  ;;  %v1921_v16 = vstv %s5067_s7  ;;  %s5175_s25 = sld [smem:[#allocation8 + $0xb3]]  ;;  %s5211_s30 = sld [smem:[#allocation8 + $0x25]] }
 0x16b   : > { %v1355_v21 = vadd.f32 %v1351_v57, %v1341_v38  ;;  %v1354_v5 = vadd.f32 %v1349_v60, %v1340_v9  ;;  %v552_v14 = vadd.f32 %v550_v8, %v546_v33  ;;  %v1923_v33 = vmul.f32 %v1921_v16, %v4945_v44  ;;  %s5213_s7 = sld [smem:[#allocation5 + $0x3c]] }
 0x16c   : > { %1846 = vrot.lane.b32.xlu1 %v1841_v48, %s3905_s14  ;;  %1844 = vrot.lane.b32.xlu0 %v1840_v62, %s3905_s14  ;;  %v1887_v48 = vstv %s5032_s24  ;;  %v551_v62 = vmul.f32 %v4748_v11, %v549_v46  ;;  %v1630_v11 = vmul.f32 %v1629_v29, %v4582_v43  ;;  %v1922_v8 = vmul.f32 %v1921_v16, %v4947_v58  ;;  %s5156_s24 = sld [smem:[#allocation8 + $0xb2]] }
 0x16d   : > { %v5057_v32 = vadd.f32 %v1597_v0, %v1355_v21  ;;  %v5059_v63 = vadd.f32 %v1596_v56, %v1354_v5  ;;  %v1889_v0 = vmul.f32 %v1887_v48, %v4945_v44  ;;  %v1907_v56 = vstv %s5047_s26  ;;  %s3514_s26 = sld [smem:[#allocation8 + $0xd]] }
 0x16e   : > { %v1371_v22 = vpop.permute.xlu1 %1370  ;;  %v1369_v2 = vpop.permute.xlu0 %1368  ;;  %v556_v21 = vmul.f32 %v4783_v45, %v555_v31  ;;  %v1909_v46 = vmul.f32 %v1907_v56, %v4945_v44  ;;  %v1908_v12 = vmul.f32 %v1907_v56, %v4947_v58 }
 0x16f   : > { %6749 = vst [vmem:[#allocation18_spill] sm:$0xff] %v5057_v32  ;;  %6750 = vst [vmem:[#allocation19_spill] sm:$0xff] %v5059_v63  ;;  %v1375_v3 = vadd.f32 %v1371_v22, %v4786_v28  ;;  %v1374_v4 = vadd.f32 %v1369_v2, %v4788_v52  ;;  %v553_v28 = vadd.f32 %v551_v62, %v547_v53  ;;  %v694_v52 = vstv %s5054_s28  ;;  %s3515_s28 = sld [smem:[#allocation8 + $0xe]] }
 0x170   : > { %1860 = vrot.lane.b32.xlu1 %v1855_v15, %s3904_s27  ;;  %1858 = vrot.lane.b32.xlu0 %v1854_v30, %s3904_s27  ;;  %v1888_v15 = vmul.f32 %v1887_v48, %v4947_v58  ;;  %v696_v22 = vmul.f32 %v4801_v7, %v694_v52  ;;  %v700_v2 = vstv %s5073_s8  ;;  %v558_v29 = vadd.f32 %v556_v21, %v552_v14  ;;  %s5219_s8 = sld [smem:[#allocation8 + $0x26]] }
 0x171   : > { %v559_v45 = vadd.f32 %v557_v19, %v553_v28  ;;  %v1665_v62 = vmul.f32 %v1663_v40, %v4580_v59  ;;  %v1664_v7 = vmul.f32 %v1663_v40, %v4582_v43  ;;  %v1955_v19 = vstv %s5102_s13  ;;  %s5241_s13 = sld [smem:[#allocation5 + $0x3e]] }
 0x172   : > { %v1385_v38 = vpop.permute.xlu1 %1384  ;;  %v1383_v9 = vpop.permute.xlu0 %1382 }
 0x173   : > { %v1389_v57 = vadd.f32 %v1385_v38, %v1375_v3  ;;  %v1388_v60 = vadd.f32 %v1383_v9, %v1374_v4  ;;  %v701_v38 = vmul.f32 %v4834_v47, %v700_v2 }
 0x174   : > { %1880 = vrot.lane.b32.xlu1 %v1875_v27, %s3905_s14  ;;  %1878 = vrot.lane.b32.xlu0 %v1874_v61, %s3905_s14  ;;  %v695_v27 = vmul.f32 %v4810_v17, %v694_v52  ;;  %v702_v17 = vmul.f32 %v4825_v39, %v700_v2  ;;  %v1697_v39 = vstv %s5097_s11  ;;  %v845_v52 = vstv %s5108_s12  ;;  %s5238_s11 = sld [smem:[#allocation8 + $0x3d]]  ;;  %s5256_s12 = sld [smem:[#allocation8 + $0x3e]] }
 0x175   : > { %v5092_v5 = vadd.f32 %v1631_v18, %v1389_v57  ;;  %v5094_v30 = vadd.f32 %v1630_v11, %v1388_v60  ;;  %v1941_v18 = vstv %s5083_s9  ;;  %v1699_v40 = vmul.f32 %v1697_v39, %v4580_v59  ;;  %s5225_s9 = sld [smem:[#allocation6 + $0x5]] }
 0x176   : > { %v1405_v55 = vpop.permute.xlu1 %1404  ;;  %v1403_v35 = vpop.permute.xlu0 %1402  ;;  %v697_v11 = vadd.f32 %v695_v27, %v558_v29  ;;  %v1943_v60 = vmul.f32 %v1941_v18, %v4945_v44  ;;  %v1975_v27 = vstv %s5118_s17  ;;  %s5260_s17 = sld [smem:[#allocation5 + $0x3f]] }
 0x177   : > { %6751 = vst [vmem:[#allocation20_spill] sm:$0xff] %v5092_v5  ;;  %6752 = vst [vmem:[#allocation21_spill] sm:$0xff] %v5094_v30  ;;  %v1409_v61 = vadd.f32 %v1405_v55, %v4837_v36  ;;  %v1408_v48 = vadd.f32 %v1403_v35, %v4839_v1  ;;  %v698_v36 = vadd.f32 %v696_v22, %v559_v45  ;;  %v706_v1 = vstv %s5089_s10  ;;  %s5227_s10 = sld [smem:[#allocation5 + $0x3d]]  ;;  %v5339_v30 = vld [vmem:[%s4081_s18 + $0x19] sm:$0x3f] }
 0x178   : > { %1894 = vrot.lane.b32.xlu1 %v1889_v0, %s3904_s27  ;;  %1892 = vrot.lane.b32.xlu0 %v1888_v15, %s3904_s27  ;;  %v1942_v15 = vmul.f32 %v1941_v18, %v4947_v58  ;;  %v708_v28 = vmul.f32 %v4852_v6, %v706_v1  ;;  %v703_v14 = vadd.f32 %v701_v38, %v697_v11  ;;  %v857_v38 = vstv %s5143_s21  ;;  %s5304_s21 = sld [smem:[#allocation5 + $0x41]] }
 0x179   : > { %v704_v47 = vadd.f32 %v702_v17, %v698_v36  ;;  %v707_v21 = vmul.f32 %v4861_v37, %v706_v1  ;;  %v1957_v22 = vmul.f32 %v1955_v19, %v4945_v44  ;;  %v1956_v45 = vmul.f32 %v1955_v19, %v4947_v58  ;;  %v6758_v36 = vld [vmem:[#allocation16_spill] sm:$0xff] }
 0x17a   : > { %v1419_v53 = vpop.permute.xlu1 %1418  ;;  %v1417_v31 = vpop.permute.xlu0 %1416  ;;  %v1976_v18 = vmul.f32 %v1975_v27, %v4947_v58  ;;  %v1989_v17 = vstv %s5137_s16  ;;  %s5301_s16 = sld [smem:[#allocation8 + $0x56]] }
 0x17b   : > { %v1423_v3 = vadd.f32 %v1419_v53, %v1409_v61  ;;  %v1422_v4 = vadd.f32 %v1417_v31, %v1408_v48  ;;  %v851_v61 = vstv %s5124_s23  ;;  %v709_v48 = vadd.f32 %v707_v21, %v703_v14  ;;  %s5279_s23 = sld [smem:[#allocation8 + $0x55]] }
 0x17c   : > { %1914 = vrot.lane.b32.xlu1 %v1909_v46, %s3905_s14  ;;  %1912 = vrot.lane.b32.xlu0 %v1908_v12, %s3905_s14  ;;  %v1698_v46 = vmul.f32 %v1697_v39, %v4582_v43  ;;  %v853_v1 = vmul.f32 %v6758_v36, %v851_v61 }
 0x17d   : > { %v5127_v9 = vadd.f32 %v1665_v62, %v1423_v3  ;;  %v5129_v0 = vadd.f32 %v1664_v7, %v1422_v4  ;;  %v6755_v62 = vld [vmem:[#allocation15_spill] sm:$0xff]  ;;  %v1731_v3 = vstv %s5132_s15  ;;  %v1977_v4 = vmul.f32 %v1975_v27, %v4945_v44  ;;  %s5282_s15 = sld [smem:[#allocation5 + $0x40]] }
 0x17e   : > { %v1439_v56 = vpop.permute.xlu1 %1438  ;;  %v1437_v57 = vpop.permute.xlu0 %1436  ;;  %v846_v7 = vmul.f32 %v6755_v62, %v845_v52  ;;  %v1732_v19 = vmul.f32 %v1731_v3, %v4582_v43  ;;  %v858_v43 = vmul.f32 %v4918_v50, %v857_v38  ;;  %v2023_v27 = vstv %s5175_s25  ;;  %s5326_s25 = sld [smem:[#allocation5 + $0x42]] }
 0x17f   : > { %6753 = vst [vmem:[#allocation22_spill] sm:$0xff] %v5127_v9  ;;  %6754 = vst [vmem:[#allocation23_spill] sm:$0xff] %v5129_v0  ;;  %v1443_v55 = vadd.f32 %v1439_v56, %v4883_v23  ;;  %v1442_v35 = vadd.f32 %v1437_v57, %v4885_v24  ;;  %v847_v23 = vmul.f32 %v4871_v10, %v845_v52 }
 0x180   : > { %1928 = vrot.lane.b32.xlu1 %v1923_v33, %s3904_s27  ;;  %1926 = vrot.lane.b32.xlu0 %v1922_v8, %s3904_s27  ;;  %v710_v24 = vadd.f32 %v708_v28, %v704_v47  ;;  %v848_v56 = vadd.f32 %v846_v7, %v709_v48  ;;  %v852_v57 = vmul.f32 %v4903_v25, %v851_v61 }
 0x181   : > { %v1991_v52 = vmul.f32 %v1989_v17, %v4945_v44  ;;  %v2025_v61 = vmul.f32 %v2023_v27, %v4945_v44  ;;  %v2024_v48 = vmul.f32 %v2023_v27, %v4947_v58 }
 0x182   : > { %v1453_v12 = vpop.permute.xlu1 %1452  ;;  %v1451_v16 = vpop.permute.xlu0 %1450  ;;  %v849_v11 = vadd.f32 %v847_v23, %v710_v24 }
 0x183   : > { %v1457_v2 = vadd.f32 %v1453_v12, %v1443_v55  ;;  %v1456_v29 = vadd.f32 %v1451_v16, %v1442_v35  ;;  %v1990_v55 = vmul.f32 %v1989_v17, %v4947_v58  ;;  %v859_v35 = vmul.f32 %v4911_v54, %v857_v38 }
 0x184   : > { %1948 = vrot.lane.b32.xlu1 %v1943_v60, %s3905_s14  ;;  %1946 = vrot.lane.b32.xlu0 %v1942_v15, %s3905_s14  ;;  %v1733_v15 = vmul.f32 %v1731_v3, %v4580_v59  ;;  %v854_v59 = vadd.f32 %v852_v57, %v848_v56 }
 0x185   : > { %v5160_v53 = vadd.f32 %v1699_v40, %v1457_v2  ;;  %v5162_v31 = vadd.f32 %v1698_v46, %v1456_v29 }
 0x186   : > { %v1473_v33 = vpop.permute.xlu1 %1472  ;;  %v1471_v8 = vpop.permute.xlu0 %1470  ;;  %v860_v29 = vadd.f32 %v858_v43, %v854_v59 }
 0x187   : > { %6756 = vst [vmem:[#allocation15_spill] sm:$0xff] %v5160_v53  ;;  %6757 = vst [vmem:[#allocation24_spill] sm:$0xff] %v5162_v31  ;;  %v1477_v39 = vadd.f32 %v1473_v33, %v4923_v42  ;;  %v1476_v60 = vadd.f32 %v1471_v8, %v4925_v49  ;;  %v2009_v42 = vstv %s5156_s24  ;;  %v855_v49 = vadd.f32 %v853_v1, %v849_v11  ;;  %v5317_v31 = vld [vmem:[%s4081_s18 + $0x18] sm:$0x3f]  ;;  %s5323_s24 = sld [smem:[#allocation8 + $0x6d]] }
 0x188   : > { %1962 = vrot.lane.b32.xlu1 %v1957_v22, %s3904_s27  ;;  %1960 = vrot.lane.b32.xlu0 %v1956_v45, %s3904_s27  ;;  %v2011_v22 = vmul.f32 %v2009_v42, %v4945_v44  ;;  %v2010_v45 = vmul.f32 %v2009_v42, %v4947_v58  ;;  %v5209_v33 = vmax.f32 %v860_v29, 0.0  ;;  %v2043_v8 = vstv %s3514_s26  ;;  %v5263_v42 = vld [vmem:[%s4081_s18] sm:$0xff]  ;;  %s5345_s26 = sld [smem:[#allocation8 + $0x6e]] }
 0x189   : > { %v861_v2 = vadd.f32 %v859_v35, %v855_v49  ;;  %v2057_v1 = vstv %s3515_s28  ;;  %v416_v35 = vstv %s5227_s10  ;;  %v5273_v29 = vld [vmem:[%s4081_s18 + $0x9] sm:$0x3f]  ;;  %s5348_s28 = sld [smem:[#allocation5 + $0x43]]  ;;  %s5411_s10 = sld [smem:[#allocation8 + $0x9d]] }
 0x18a   : > { %v1487_v28 = vpop.permute.xlu1 %1486  ;;  %v1485_v47 = vpop.permute.xlu0 %1484  ;;  %v2044_v17 = vmul.f32 %v2043_v8, %v5209_v33  ;;  %v2058_v57 = vmul.f32 %v2057_v1, %v5209_v33  ;;  %v418_v27 = vmul.f32 %v5273_v29, %v416_v35 }
 0x18b   : > { %v1491_v14 = vadd.f32 %v1487_v28, %v1477_v39  ;;  %v1490_v21 = vadd.f32 %v1485_v47, %v1476_v60  ;;  %v5207_v7 = vmax.f32 %v861_v2, 0.0  ;;  %v2077_v39 = vstv %s5211_s30  ;;  %s5367_s30 = sld [smem:[#allocation8 + $0x85]] }
 0x18c   : > { %1982 = vrot.lane.b32.xlu1 %v1977_v4, %s3905_s14  ;;  %1980 = vrot.lane.b32.xlu0 %v1976_v18, %s3905_s14  ;;  %v410_v60 = vstv %s5213_s7  ;;  %v2091_v47 = vstv %s5219_s8  ;;  %s5370_s7 = sld [smem:[#allocation5 + $0x44]]  ;;  %s5389_s8 = sld [smem:[#allocation8 + $0x86]] }
 0x18d   : > { %v5186_v40 = vadd.f32 %v1733_v15, %v1491_v14  ;;  %v5188_v46 = vadd.f32 %v1732_v19, %v1490_v21  ;;  %v2045_v18 = vmul.f32 %v2043_v8, %v5207_v7  ;;  %v2059_v56 = vmul.f32 %v2057_v1, %v5207_v7 }
 0x18e   : > { %v5190_v12 = vpop.permute.xlu1 %1506  ;;  %v5192_v16 = vpop.permute.xlu0 %1504  ;;  %v2079_v28 = vmul.f32 %v2077_v39, %v5207_v7  ;;  %v2078_v21 = vmul.f32 %v2077_v39, %v5209_v33  ;;  %v411_v49 = vmul.f32 %v5263_v42, %v410_v60 }
 0x190   : > { %1996 = vrot.lane.b32.xlu1 %v1991_v52, %s3904_s27  ;;  %1994 = vrot.lane.b32.xlu0 %v1990_v55, %s3904_s27  ;;  %v5250_v52 = vld [vmem:[%s4081_s18 + $0x8] sm:$0x3f]  ;;  %v308_v55 = vstv %s5225_s9  ;;  %s5392_s9 = sld [smem:[#allocation5 + $0x45]] }
 0x191   : > { %v412_v14 = vmul.f32 %v5250_v52, %v410_v60  ;;  %v413_v8 = vadd.f32 %v411_v49, %v308_v55 }
 0x192   : > { %v5199_v23 = vpop.permute.xlu1 %1520  ;;  %v5201_v24 = vpop.permute.xlu0 %1518 }
 0x193   : > { %v414_v2 = vadd.f32 %v412_v14, %v308_v55  ;;  %v2125_v14 = vstv %s5256_s12  ;;  %s5434_s12 = sld [smem:[#allocation5 + $0x47]] }
 0x194   : > { %2016 = vrot.lane.b32.xlu1 %v2011_v22, %s3905_s14  ;;  %2014 = vrot.lane.b32.xlu0 %v2010_v45, %s3905_s14  ;;  %v2093_v22 = vmul.f32 %v2091_v47, %v5207_v7  ;;  %v2092_v45 = vmul.f32 %v2091_v47, %v5209_v33 }
 0x195   : > { %v420_v60 = vadd.f32 %v418_v27, %v414_v2 }
 0x196   : > { %v5215_v3 = vpop.permute.xlu1 %1540  ;;  %v5217_v4 = vpop.permute.xlu0 %1538 }
 0x198   : > { %2030 = vrot.lane.b32.xlu1 %v2025_v61, %s3904_s27  ;;  %2028 = vrot.lane.b32.xlu0 %v2024_v48, %s3904_s27  ;;  %v2111_v61 = vstv %s5238_s11  ;;  %v422_v48 = vstv %s5241_s13  ;;  %s5414_s11 = sld [smem:[#allocation5 + $0x46]] }
 0x199   : > { %v2112_v39 = vmul.f32 %v2111_v61, %v5209_v33  ;;  %s5430_s13 = sld [smem:[#allocation8 + $0x9e]] }
 0x19a   : > { %v5229_v11 = vpop.permute.xlu1 %1554  ;;  %v5231_v38 = vpop.permute.xlu0 %1552 }
 0x19c   : > { %2050 = vrot.lane.b32.xlu1 %v2045_v18, %s3905_s14  ;;  %2048 = vrot.lane.b32.xlu0 %v2044_v17, %s3905_s14  ;;  %v5285_v18 = vld [vmem:[%s4081_s18 + $0x1] sm:$0xff] }
 0x19d   : > { %v417_v17 = vmul.f32 %v5285_v18, %v416_v35  ;;  %v5307_v35 = vld [vmem:[%s4081_s18 + $0x2] sm:$0xff] }
 0x19e   : > { %v5243_v15 = vpop.permute.xlu1 %1574  ;;  %v5245_v19 = vpop.permute.xlu0 %1572  ;;  %v423_v49 = vmul.f32 %v5307_v35, %v422_v48 }
 0x19f   : > { %6759 = vst [vmem:[#allocation16_spill] sm:$0xff] %v5245_v19  ;;  %v419_v55 = vadd.f32 %v417_v17, %v413_v8  ;;  %v2145_v8 = vstv %s5279_s23  ;;  %s3536_s23 = sld [smem:[#allocation8 + $0xb6]] }
 0x1a0   : > { %2064 = vrot.lane.b32.xlu1 %v2059_v56, %s3904_s27  ;;  %2062 = vrot.lane.b32.xlu0 %v2058_v57, %s3904_s27  ;;  %v2113_v57 = vmul.f32 %v2111_v61, %v5207_v7 }
 0x1a1   : > { %v425_v17 = vadd.f32 %v423_v49, %v419_v55  ;;  %v2159_v55 = vstv %s5301_s16  ;;  %s3539_s16 = sld [smem:[#allocation8 + $0x11]] }
 0x1a2   : > { %v5266_v59 = vpop.permute.xlu1 %1588  ;;  %v5268_v43 = vpop.permute.xlu0 %1586 }
 0x1a3   : > { %6760 = vst [vmem:[#allocation25_spill] sm:$0xff] %v5268_v43 }
 0x1a4   : > { %2084 = vrot.lane.b32.xlu1 %v2079_v28, %s3905_s14  ;;  %2082 = vrot.lane.b32.xlu0 %v2078_v21, %s3905_s14  ;;  %v5295_v28 = vld [vmem:[%s4081_s18 + $0xa] sm:$0x3f]  ;;  %v561_v21 = vstv %s5260_s17  ;;  %s5446_s17 = sld [smem:[#allocation8 + $0xb5]] }
 0x1a5   : > { %v424_v47 = vmul.f32 %v5295_v28, %v422_v48  ;;  %v563_v53 = vmul.f32 %v5317_v31, %v561_v21  ;;  %v567_v48 = vstv %s5282_s15  ;;  %s3538_s15 = sld [smem:[#allocation8 + $0x10]] }
 0x1a6   : > { %v5288_v1 = vpop.permute.xlu1 %1608  ;;  %v5290_v56 = vpop.permute.xlu0 %1606  ;;  %v569_v5 = vmul.f32 %v5339_v30, %v567_v48 }
 0x1a7   : > { %6761 = vst [vmem:[#allocation26_spill] sm:$0xff] %v5288_v1  ;;  %6762 = vst [vmem:[#allocation27_spill] sm:$0xff] %v5290_v56  ;;  %v426_v61 = vadd.f32 %v424_v47, %v420_v60  ;;  %v5383_v56 = vld [vmem:[%s4081_s18 + $0x28] sm:$0x3f] }
 0x1a8   : > { %2098 = vrot.lane.b32.xlu1 %v2093_v22, %s3904_s27  ;;  %2096 = vrot.lane.b32.xlu0 %v2092_v45, %s3904_s27  ;;  %v2127_v22 = vmul.f32 %v2125_v14, %v5207_v7  ;;  %v2126_v45 = vmul.f32 %v2125_v14, %v5209_v33  ;;  %v5329_v14 = vld [vmem:[%s4081_s18 + $0x10] sm:$0xff]  ;;  %v5405_v1 = vld [vmem:[%s4081_s18 + $0x29] sm:$0x3f] }
 0x1a9   : > { %v562_v60 = vmul.f32 %v5329_v14, %v561_v21  ;;  %v565_v9 = vadd.f32 %v563_v53, %v426_v61  ;;  %v573_v21 = vstv %s5304_s21  ;;  %s5493_s21 = sld [smem:[#allocation8 + $0x28]] }
 0x1aa   : > { %v5310_v2 = vpop.permute.xlu1 %1622  ;;  %v5312_v27 = vpop.permute.xlu0 %1620 }
 0x1ab   : > { %6763 = vst [vmem:[#allocation28_spill] sm:$0xff] %v5310_v2  ;;  %6764 = vst [vmem:[#allocation29_spill] sm:$0xff] %v5312_v27  ;;  %v564_v49 = vadd.f32 %v562_v60, %v425_v17  ;;  %v5361_v27 = vld [vmem:[%s4081_s18 + $0x1a] sm:$0x3f]  ;;  %v2179_v17 = vstv %s5323_s24  ;;  %s5495_s24 = sld [smem:[#allocation5 + $0x48]] }
 0x1ac   : > { %2118 = vrot.lane.b32.xlu1 %v2113_v57, %s3905_s14  ;;  %2116 = vrot.lane.b32.xlu0 %v2112_v39, %s3905_s14  ;;  %v2147_v57 = vmul.f32 %v2145_v8, %v5207_v7  ;;  %v2146_v39 = vmul.f32 %v2145_v8, %v5209_v33  ;;  %v5351_v8 = vld [vmem:[%s4081_s18 + $0x11] sm:$0xff]  ;;  %v575_v2 = vmul.f32 %v5361_v27, %v573_v21 }
 0x1ad   : > { %v568_v53 = vmul.f32 %v5351_v8, %v567_v48  ;;  %v712_v48 = vstv %s5326_s25  ;;  %s5501_s25 = sld [smem:[#allocation8 + $0x29]] }
 0x1ae   : > { %v5332_v47 = vpop.permute.xlu1 %1642  ;;  %v5334_v0 = vpop.permute.xlu0 %1640  ;;  %v714_v63 = vmul.f32 %v5383_v56, %v712_v48 }
 0x1af   : > { %6765 = vst [vmem:[#allocation30_spill] sm:$0xff] %v5332_v47  ;;  %6766 = vst [vmem:[#allocation31_spill] sm:$0xff] %v5334_v0  ;;  %v571_v47 = vadd.f32 %v569_v5, %v565_v9  ;;  %v570_v60 = vadd.f32 %v568_v53, %v564_v49  ;;  %v2193_v49 = vstv %s5345_s26  ;;  %s5507_s26 = sld [smem:[#allocation6 + $0x6]] }
 0x1b0   : > { %2132 = vrot.lane.b32.xlu1 %v2127_v22, %s3904_s27  ;;  %2130 = vrot.lane.b32.xlu0 %v2126_v45, %s3904_s27  ;;  %v2161_v22 = vmul.f32 %v2159_v55, %v5207_v7  ;;  %v2160_v45 = vmul.f32 %v2159_v55, %v5209_v33  ;;  %v5373_v55 = vld [vmem:[%s4081_s18 + $0x12] sm:$0xff] }
 0x1b1   : > { %v574_v5 = vmul.f32 %v5373_v55, %v573_v21  ;;  %v718_v21 = vstv %s5348_s28  ;;  %s5509_s28 = sld [smem:[#allocation5 + $0x49]] }
 0x1b2   : > { %v5354_v61 = vpop.permute.xlu1 %1656  ;;  %v5356_v0 = vpop.permute.xlu0 %1654  ;;  %v720_v32 = vmul.f32 %v5405_v1, %v718_v21 }
 0x1b3   : > { %6767 = vst [vmem:[#allocation32_spill] sm:$0xff] %v5354_v61  ;;  %6768 = vst [vmem:[#allocation33_spill] sm:$0xff] %v5356_v0  ;;  %v577_v61 = vadd.f32 %v575_v2, %v571_v47  ;;  %v576_v53 = vadd.f32 %v574_v5, %v570_v60  ;;  %v2213_v60 = vstv %s5367_s30  ;;  %s5520_s30 = sld [smem:[#allocation8 + $0x40]] }
 0x1b4   : > { %2152 = vrot.lane.b32.xlu1 %v2147_v57, %s3905_s14  ;;  %2150 = vrot.lane.b32.xlu0 %v2146_v39, %s3905_s14  ;;  %v2181_v57 = vmul.f32 %v2179_v17, %v5207_v7  ;;  %v2180_v39 = vmul.f32 %v2179_v17, %v5209_v33  ;;  %v5395_v17 = vld [vmem:[%s4081_s18 + $0x20] sm:$0xff] }
 0x1b5   : > { %v713_v2 = vmul.f32 %v5395_v17, %v712_v48  ;;  %v724_v48 = vstv %s5370_s7  ;;  %s5523_s7 = sld [smem:[#allocation5 + $0x4a]] }
 0x1b6   : > { %v5376_v9 = vpop.permute.xlu1 %1676  ;;  %v5378_v0 = vpop.permute.xlu0 %1674  ;;  %v726_v43 = vmul.f32 %v4852_v6, %v724_v48 }
 0x1b7   : > { %6769 = vst [vmem:[#allocation34_spill] sm:$0xff] %v5376_v9  ;;  %6770 = vst [vmem:[#allocation35_spill] sm:$0xff] %v5378_v0  ;;  %v716_v9 = vadd.f32 %v714_v63, %v577_v61  ;;  %v715_v5 = vadd.f32 %v713_v2, %v576_v53  ;;  %v2227_v53 = vstv %s5389_s8  ;;  %s5535_s8 = sld [smem:[#allocation8 + $0x41]] }
 0x1b8   : > { %2166 = vrot.lane.b32.xlu1 %v2161_v22, %s3904_s27  ;;  %2164 = vrot.lane.b32.xlu0 %v2160_v45, %s3904_s27  ;;  %v2195_v22 = vmul.f32 %v2193_v49, %v5207_v7  ;;  %v2194_v45 = vmul.f32 %v2193_v49, %v5209_v33  ;;  %v2229_v6 = vmul.f32 %v2227_v53, %v5207_v7 }
 0x1ba   : > { %v5398_v47 = vpop.permute.xlu1 %1690  ;;  %v5400_v0 = vpop.permute.xlu0 %1688 }
 0x1bb   : > { %6771 = vst [vmem:[#allocation36_spill] sm:$0xff] %v5398_v47  ;;  %6772 = vst [vmem:[#allocation37_spill] sm:$0xff] %v5400_v0  ;;  %v5417_v0 = vld [vmem:[%s4081_s18 + $0x21] sm:$0xff]  ;;  %v722_v47 = vadd.f32 %v720_v32, %v716_v9  ;;  %v2228_v9 = vmul.f32 %v2227_v53, %v5209_v33  ;;  %v875_v53 = vstv %s5434_s12  ;;  %s5571_s12 = sld [smem:[#allocation5 + $0x4d]] }
 0x1bc   : > { %2186 = vrot.lane.b32.xlu1 %v2181_v57, %s3905_s14  ;;  %2184 = vrot.lane.b32.xlu0 %v2180_v39, %s3905_s14  ;;  %6773 = vst [vmem:[#allocation38_spill] sm:$0xff] %v5417_v0  ;;  %v719_v63 = vmul.f32 %v5417_v0, %v718_v21  ;;  %v2215_v57 = vmul.f32 %v2213_v60, %v5207_v7  ;;  %v863_v21 = vstv %s5392_s9  ;;  %s5539_s9 = sld [smem:[#allocation5 + $0x4b]] }
 0x1bd   : > { %v2214_v39 = vmul.f32 %v2213_v60, %v5209_v33  ;;  %v2247_v60 = vstv %s5411_s10  ;;  %s5552_s10 = sld [smem:[#allocation8 + $0x58]] }
 0x1be   : > { %v5420_v61 = vpop.permute.xlu1 %1710  ;;  %v5422_v49 = vpop.permute.xlu0 %1708  ;;  %v721_v2 = vadd.f32 %v719_v63, %v715_v5  ;;  %v864_v5 = vmul.f32 %v6755_v62, %v863_v21 }
 0x1bf   : > { %6774 = vst [vmem:[#allocation39_spill] sm:$0xff] %v5420_v61  ;;  %6775 = vst [vmem:[#allocation40_spill] sm:$0xff] %v5422_v49  ;;  %v725_v49 = vmul.f32 %v4861_v37, %v724_v48  ;;  %v869_v37 = vstv %s5414_s11  ;;  %s5555_s11 = sld [smem:[#allocation5 + $0x4c]] }
 0x1c0   : > { %2200 = vrot.lane.b32.xlu1 %v2195_v22, %s3904_s27  ;;  %2198 = vrot.lane.b32.xlu0 %v2194_v45, %s3904_s27  ;;  %v728_v22 = vadd.f32 %v726_v43, %v722_v47  ;;  %v865_v45 = vmul.f32 %v4871_v10, %v863_v21  ;;  %v2249_v43 = vmul.f32 %v2247_v60, %v5207_v7 }
 0x1c1   : > { %v727_v48 = vadd.f32 %v725_v49, %v721_v2  ;;  %v871_v47 = vmul.f32 %v6758_v36, %v869_v37  ;;  %v870_v62 = vmul.f32 %v4903_v25, %v869_v37  ;;  %v876_v25 = vmul.f32 %v4918_v50, %v875_v53 }
 0x1c2   : > { %v5436_v61 = vpop.permute.xlu1 %1724  ;;  %v5438_v32 = vpop.permute.xlu0 %1722  ;;  %v867_v10 = vadd.f32 %v865_v45, %v728_v22 }
 0x1c3   : > { %6776 = vst [vmem:[#allocation41_spill] sm:$0xff] %v5436_v61  ;;  %6777 = vst [vmem:[#allocation42_spill] sm:$0xff] %v5438_v32  ;;  %v866_v49 = vadd.f32 %v864_v5, %v727_v48  ;;  %v310_v61 = vstv %s5507_s26  ;;  %s5635_s26 = sld [smem:[#allocation5 + $0x51]] }
 0x1c4   : > { %2220 = vrot.lane.b32.xlu1 %v2215_v57, %s3905_s14  ;;  %2218 = vrot.lane.b32.xlu0 %v2214_v39, %s3905_s14  ;;  %v2248_v57 = vmul.f32 %v2247_v60, %v5209_v33  ;;  %v2261_v39 = vstv %s5430_s13  ;;  %v873_v45 = vadd.f32 %v871_v47, %v867_v10  ;;  %s5568_s13 = sld [smem:[#allocation8 + $0x59]] }
 0x1c5   : > { %v2263_v22 = vmul.f32 %v2261_v39, %v5207_v7  ;;  %v2262_v36 = vmul.f32 %v2261_v39, %v5209_v33  ;;  %v872_v60 = vadd.f32 %v870_v62, %v866_v49 }
 0x1c6   : > { %v5450_v63 = vpop.permute.xlu1 %1744  ;;  %v5452_v32 = vpop.permute.xlu0 %1742 }
 0x1c7   : > { %v878_v47 = vadd.f32 %v876_v25, %v872_v60  ;;  %v2329_v60 = vstv %s3539_s16  ;;  %s5603_s16 = sld [smem:[#allocation5 + $0x4f]] }
 0x1c8   : > { %2234 = vrot.lane.b32.xlu1 %v2229_v6, %s3904_s27  ;;  %2232 = vrot.lane.b32.xlu0 %v2228_v9, %s3904_s27  ;;  %v2281_v6 = vstv %s5446_s17  ;;  %v877_v9 = vmul.f32 %v4911_v54, %v875_v53  ;;  %s5584_s17 = sld [smem:[#allocation8 + $0x70]] }
 0x1c9   : > { %v2283_v5 = vmul.f32 %v2281_v6, %v5207_v7  ;;  %v5491_v53 = vmax.f32 %v878_v47, 0.0  ;;  %v2349_v47 = vstv %s5493_s21  ;;  %s5616_s21 = sld [smem:[#allocation8 + $0x88]] }
 0x1ca   : > { %v5462_v21 = vpop.permute.xlu1 %1758  ;;  %v5464_v2 = vpop.permute.xlu0 %1756  ;;  %v879_v10 = vadd.f32 %v877_v9, %v873_v45 }
 0x1cb   : > { %6778 = vst [vmem:[#allocation43_spill] sm:$0xff] %v5462_v21  ;;  %6779 = vst [vmem:[#allocation44_spill] sm:$0xff] %v5464_v2 }
 0x1cc   : > { %2254 = vrot.lane.b32.xlu1 %v2249_v43, %s3905_s14  ;;  %2252 = vrot.lane.b32.xlu0 %v2248_v57, %s3905_s14  ;;  %v2282_v43 = vmul.f32 %v2281_v6, %v5209_v33  ;;  %v2295_v57 = vstv %s3536_s23  ;;  %v5489_v62 = vmax.f32 %v879_v10, 0.0  ;;  %v2330_v10 = vmul.f32 %v2329_v60, %v5491_v53  ;;  %s5587_s23 = sld [smem:[#allocation5 + $0x4e]] }
 0x1cd   : > { %v2297_v39 = vmul.f32 %v2295_v57, %v5207_v7  ;;  %v2296_v49 = vmul.f32 %v2295_v57, %v5209_v33  ;;  %v428_v57 = vstv %s5495_s24  ;;  %s5619_s24 = sld [smem:[#allocation5 + $0x50]] }
 0x1ce   : > { %v5473_v37 = vpop.permute.xlu1 %1778  ;;  %v5475_v48 = vpop.permute.xlu0 %1776 }
 0x1cf   : > { %6780 = vst [vmem:[#allocation45_spill] sm:$0xff] %v5473_v37  ;;  %6781 = vst [vmem:[#allocation46_spill] sm:$0xff] %v5475_v48  ;;  %v2397_v48 = vstv %s5535_s8  ;;  %s5674_s8 = sld [smem:[#allocation5 + $0x53]]  ;;  %v5683_v37 = vld [vmem:[%s4081_s18 + $0x38] sm:$0x3f] }
 0x1d0   : > { %2268 = vrot.lane.b32.xlu1 %v2263_v22, %s3904_s27  ;;  %2266 = vrot.lane.b32.xlu0 %v2262_v36, %s3904_s27  ;;  %v2315_v22 = vstv %s3538_s15  ;;  %s5600_s15 = sld [smem:[#allocation8 + $0x71]]  ;;  %6810 = vst [vmem:[#allocation75_spill] sm:$0xff] %v5683_v37 }
 0x1d1   : > { %v2317_v6 = vmul.f32 %v2315_v22, %v5489_v62  ;;  %v2316_v9 = vmul.f32 %v2315_v22, %v5491_v53  ;;  %v2351_v22 = vmul.f32 %v2349_v47, %v5489_v62 }
 0x1d2   : > { %v5481_v54 = vpop.permute.xlu1 %1792  ;;  %v5483_v50 = vpop.permute.xlu0 %1790 }
 0x1d3   : > { %6782 = vst [vmem:[#allocation47_spill] sm:$0xff] %v5481_v54  ;;  %6783 = vst [vmem:[#allocation48_spill] sm:$0xff] %v5483_v50 }
 0x1d4   : > { %2288 = vrot.lane.b32.xlu1 %v2283_v5, %s3905_s14  ;;  %2286 = vrot.lane.b32.xlu0 %v2282_v43, %s3905_s14  ;;  %v2331_v43 = vmul.f32 %v2329_v60, %v5489_v62  ;;  %v2350_v60 = vmul.f32 %v2349_v47, %v5491_v53 }
 0x1d6   : > { %v5497_v36 = vpop.permute.xlu1 %1812  ;;  %v5499_v45 = vpop.permute.xlu0 %1810 }
 0x1d7   : > { %6784 = vst [vmem:[#allocation49_spill] sm:$0xff] %v5497_v36  ;;  %6785 = vst [vmem:[#allocation50_spill] sm:$0xff] %v5499_v45  ;;  %v2383_v36 = vstv %s5520_s30  ;;  %s5651_s30 = sld [smem:[#allocation5 + $0x52]] }
 0x1d8   : > { %2302 = vrot.lane.b32.xlu1 %v2297_v39, %s3904_s27  ;;  %2300 = vrot.lane.b32.xlu0 %v2296_v49, %s3904_s27 }
 0x1da   : > { %v5511_v25 = vpop.permute.xlu1 %1826  ;;  %v5513_v5 = vpop.permute.xlu0 %1824 }
 0x1db   : > { %6786 = vst [vmem:[#allocation51_spill] sm:$0xff] %v5511_v25  ;;  %6787 = vst [vmem:[#allocation52_spill] sm:$0xff] %v5513_v5  ;;  %v434_v5 = vstv %s5509_s28  ;;  %s5648_s28 = sld [smem:[#allocation8 + $0xa0]] }
 0x1dc   : > { %2322 = vrot.lane.b32.xlu1 %v2317_v6, %s3905_s14  ;;  %2320 = vrot.lane.b32.xlu0 %v2316_v9, %s3905_s14  ;;  %v2363_v6 = vstv %s5501_s25  ;;  %v430_v9 = vmul.f32 %v5250_v52, %v428_v57  ;;  %v436_v47 = vmul.f32 %v5273_v29, %v434_v5  ;;  %s5632_s25 = sld [smem:[#allocation8 + $0x89]] }
 0x1dd   : > { %v2364_v45 = vmul.f32 %v2363_v6, %v5491_v53 }
 0x1de   : > { %v5525_v39 = vpop.permute.xlu1 %1846  ;;  %v5527_v49 = vpop.permute.xlu0 %1844 }
 0x1df   : > { %6788 = vst [vmem:[#allocation53_spill] sm:$0xff] %v5525_v39  ;;  %6789 = vst [vmem:[#allocation54_spill] sm:$0xff] %v5527_v49  ;;  %v429_v49 = vmul.f32 %v5263_v42, %v428_v57  ;;  %v440_v57 = vstv %s5523_s7  ;;  %s5667_s7 = sld [smem:[#allocation8 + $0xa1]] }
 0x1e0   : > { %2336 = vrot.lane.b32.xlu1 %v2331_v43, %s3904_s27  ;;  %2334 = vrot.lane.b32.xlu0 %v2330_v10, %s3904_s27  ;;  %v2365_v43 = vmul.f32 %v2363_v6, %v5489_v62  ;;  %v432_v10 = vadd.f32 %v430_v9, %v310_v61  ;;  %v2385_v9 = vmul.f32 %v2383_v36, %v5489_v62 }
 0x1e2   : > { %v5542_v39 = vpop.permute.xlu1 %1860  ;;  %v5544_v25 = vpop.permute.xlu0 %1858  ;;  %v438_v54 = vadd.f32 %v436_v47, %v432_v10  ;;  %v2399_v10 = vmul.f32 %v2397_v48, %v5489_v62 }
 0x1e3   : > { %6790 = vst [vmem:[#allocation55_spill] sm:$0xff] %v5542_v39  ;;  %6791 = vst [vmem:[#allocation56_spill] sm:$0xff] %v5544_v25  ;;  %v431_v25 = vadd.f32 %v429_v49, %v310_v61  ;;  %v435_v39 = vmul.f32 %v5285_v18, %v434_v5  ;;  %v579_v61 = vstv %s5539_s9  ;;  %v441_v49 = vmul.f32 %v5307_v35, %v440_v57  ;;  %s5689_s9 = sld [smem:[#allocation8 + $0xb8]] }
 0x1e4   : > { %2356 = vrot.lane.b32.xlu1 %v2351_v22, %s3905_s14  ;;  %2354 = vrot.lane.b32.xlu0 %v2350_v60, %s3905_s14  ;;  %v2384_v22 = vmul.f32 %v2383_v36, %v5491_v53  ;;  %v442_v60 = vmul.f32 %v5295_v28, %v440_v57  ;;  %v580_v57 = vmul.f32 %v5329_v14, %v579_v61 }
 0x1e5   : > { %v437_v5 = vadd.f32 %v435_v39, %v431_v25  ;;  %v585_v25 = vstv %s5555_s11  ;;  %s5733_s11 = sld [smem:[#allocation8 + $0x13]] }
 0x1e6   : > { %v5558_v50 = vpop.permute.xlu1 %1880  ;;  %v5560_v6 = vpop.permute.xlu0 %1878  ;;  %v444_v47 = vadd.f32 %v442_v60, %v438_v54 }
 0x1e7   : > { %6792 = vst [vmem:[#allocation57_spill] sm:$0xff] %v5558_v50  ;;  %6793 = vst [vmem:[#allocation58_spill] sm:$0xff] %v5560_v6  ;;  %v2417_v50 = vstv %s5552_s10  ;;  %v443_v39 = vadd.f32 %v441_v49, %v437_v5  ;;  %v586_v49 = vmul.f32 %v5351_v8, %v585_v25  ;;  %s5713_s10 = sld [smem:[#allocation8 + $0xb9]] }
 0x1e8   : > { %2370 = vrot.lane.b32.xlu1 %v2365_v43, %s3904_s27  ;;  %2368 = vrot.lane.b32.xlu0 %v2364_v45, %s3904_s27  ;;  %v2398_v43 = vmul.f32 %v2397_v48, %v5491_v53  ;;  %v581_v45 = vmul.f32 %v5317_v31, %v579_v61  ;;  %v2419_v54 = vmul.f32 %v2417_v50, %v5489_v62  ;;  %v591_v61 = vstv %s5571_s12  ;;  %s5748_s12 = sld [smem:[#allocation8 + $0x9]] }
 0x1e9   : > { %v582_v5 = vadd.f32 %v580_v57, %v443_v39  ;;  %v592_v57 = vmul.f32 %v5373_v55, %v591_v61 }
 0x1ea   : > { %v5574_v6 = vpop.permute.xlu1 %1894  ;;  %v5576_v36 = vpop.permute.xlu0 %1892  ;;  %v583_v60 = vadd.f32 %v581_v45, %v444_v47 }
 0x1eb   : > { %6794 = vst [vmem:[#allocation59_spill] sm:$0xff] %v5574_v6  ;;  %6795 = vst [vmem:[#allocation60_spill] sm:$0xff] %v5576_v36  ;;  %v2431_v6 = vstv %s5568_s13  ;;  %v588_v39 = vadd.f32 %v586_v49, %v582_v5  ;;  %s5746_s13 = sld [smem:[#allocation8 + $0x14]] }
 0x1ec   : > { %2390 = vrot.lane.b32.xlu1 %v2385_v9, %s3905_s14  ;;  %2388 = vrot.lane.b32.xlu0 %v2384_v22, %s3905_s14  ;;  %v2418_v9 = vmul.f32 %v2417_v50, %v5491_v53  ;;  %v587_v22 = vmul.f32 %v5339_v30, %v585_v25  ;;  %v2433_v47 = vmul.f32 %v2431_v6, %v5489_v62  ;;  %v730_v25 = vstv %s5587_s23  ;;  %s5756_s23 = sld [smem:[#allocation8 + $0x39]] }
 0x1ed   : > { %v594_v5 = vadd.f32 %v592_v57, %v588_v39  ;;  %v731_v49 = vmul.f32 %v5395_v17, %v730_v25  ;;  %v2485_v39 = vstv %s5616_s21  ;;  %s5770_s21 = sld [smem:[#allocation5 + $0x55]] }
 0x1ee   : > { %v5590_v36 = vpop.permute.xlu1 %1914  ;;  %v5592_v48 = vpop.permute.xlu0 %1912  ;;  %v589_v45 = vadd.f32 %v587_v22, %v583_v60 }
 0x1ef   : > { %6796 = vst [vmem:[#allocation61_spill] sm:$0xff] %v5590_v36  ;;  %6797 = vst [vmem:[#allocation62_spill] sm:$0xff] %v5592_v48  ;;  %v2451_v36 = vstv %s5584_s17  ;;  %v733_v57 = vadd.f32 %v731_v49, %v594_v5  ;;  %v2499_v5 = vstv %s5632_s25  ;;  %s5750_s17 = sld [smem:[#allocation8 + $0x21]] }
 0x1f0   : > { %2404 = vrot.lane.b32.xlu1 %v2399_v10, %s3904_s27  ;;  %2402 = vrot.lane.b32.xlu0 %v2398_v43, %s3904_s27  ;;  %v2432_v10 = vmul.f32 %v2431_v6, %v5491_v53  ;;  %v593_v43 = vmul.f32 %v5361_v27, %v591_v61  ;;  %v2453_v60 = vmul.f32 %v2451_v36, %v5489_v62  ;;  %v736_v61 = vstv %s5603_s16  ;;  %s5768_s16 = sld [smem:[#allocation6 + $0x7]]  ;;  %s5775_s25 = sld [smem:[#allocation8 + $0x69]] }
 0x1f2   : > { %v5606_v48 = vpop.permute.xlu1 %1928  ;;  %v5608_v50 = vpop.permute.xlu0 %1926  ;;  %v595_v22 = vadd.f32 %v593_v43, %v589_v45  ;;  %v738_v43 = vmul.f32 %v5405_v1, %v736_v61 }
 0x1f3   : > { %6798 = vst [vmem:[#allocation63_spill] sm:$0xff] %v5606_v48  ;;  %6799 = vst [vmem:[#allocation64_spill] sm:$0xff] %v5608_v50  ;;  %v2465_v48 = vstv %s5600_s15  ;;  %s5758_s15 = sld [smem:[#allocation8 + $0x2b]] }
 0x1f4   : > { %2424 = vrot.lane.b32.xlu1 %v2419_v54, %s3905_s14  ;;  %2422 = vrot.lane.b32.xlu0 %v2418_v9, %s3905_s14  ;;  %v2452_v54 = vmul.f32 %v2451_v36, %v5491_v53  ;;  %v732_v9 = vmul.f32 %v5383_v56, %v730_v25  ;;  %v2467_v45 = vmul.f32 %v2465_v48, %v5489_v62  ;;  %v742_v25 = vstv %s5619_s24  ;;  %s5773_s24 = sld [smem:[#allocation8 + $0x51]] }
 0x1f6   : > { %v5622_v50 = vpop.permute.xlu1 %1948  ;;  %v5624_v6 = vpop.permute.xlu0 %1946 }
 0x1f7   : > { %6800 = vst [vmem:[#allocation65_spill] sm:$0xff] %v5622_v50  ;;  %6801 = vst [vmem:[#allocation66_spill] sm:$0xff] %v5624_v6 }
 0x1f8   : > { %2438 = vrot.lane.b32.xlu1 %v2433_v47, %s3904_s27  ;;  %2436 = vrot.lane.b32.xlu0 %v2432_v10, %s3904_s27  ;;  %v2466_v47 = vmul.f32 %v2465_v48, %v5491_v53  ;;  %v734_v10 = vadd.f32 %v732_v9, %v595_v22  ;;  %v737_v48 = vmul.f32 %v5417_v0, %v736_v61  ;;  %v881_v61 = vstv %s5635_s26  ;;  %s5781_s26 = sld [smem:[#allocation8 + $0x81]] }
 0x1f9   : > { %v1901_v0 = vstv %s5775_s25  ;;  %s5929_s25 = sld [smem:[#allocation8 + $0x5c]] }
 0x1fa   : > { %v5638_v6 = vpop.permute.xlu1 %1962  ;;  %v5640_v36 = vpop.permute.xlu0 %1960  ;;  %v740_v9 = vadd.f32 %v738_v43, %v734_v10  ;;  %v739_v49 = vadd.f32 %v737_v48, %v733_v57  ;;  %v883_v57 = vmul.f32 %v5683_v37, %v881_v61  ;;  %v887_v48 = vstv %s5651_s30  ;;  %s5790_s30 = sld [smem:[#allocation5 + $0x56]] }
 0x1fb   : > { %6802 = vst [vmem:[#allocation67_spill] sm:$0xff] %v5638_v6  ;;  %6803 = vst [vmem:[#allocation68_spill] sm:$0xff] %v5640_v36  ;;  %v5661_v6 = vld [vmem:[%s4081_s18 + $0x2a] sm:$0x3f] }
 0x1fc   : > { %2458 = vrot.lane.b32.xlu1 %v2453_v60, %s3905_s14  ;;  %2456 = vrot.lane.b32.xlu0 %v2452_v54, %s3905_s14  ;;  %v2487_v60 = vmul.f32 %v2485_v39, %v5489_v62  ;;  %v2486_v54 = vmul.f32 %v2485_v39, %v5491_v53  ;;  %6806 = vst [vmem:[#allocation71_spill] sm:$0xff] %v5661_v6 }
 0x1fd   : > { %v744_v50 = vmul.f32 %v5661_v6, %v742_v25 }
 0x1fe   : > { %v5654_v36 = vpop.permute.xlu1 %1982  ;;  %v5656_v22 = vpop.permute.xlu0 %1980 }
 0x1ff   : > { %6804 = vst [vmem:[#allocation69_spill] sm:$0xff] %v5654_v36  ;;  %6805 = vst [vmem:[#allocation70_spill] sm:$0xff] %v5656_v22  ;;  %v5671_v22 = vld [vmem:[%s4081_s18 + $0x22] sm:$0xff]  ;;  %v746_v36 = vadd.f32 %v744_v50, %v740_v9 }
 0x200   : > { %2472 = vrot.lane.b32.xlu1 %v2467_v45, %s3904_s27  ;;  %2470 = vrot.lane.b32.xlu0 %v2466_v47, %s3904_s27  ;;  %6807 = vst [vmem:[#allocation72_spill] sm:$0xff] %v5671_v22  ;;  %v743_v10 = vmul.f32 %v5671_v22, %v742_v25  ;;  %v2501_v45 = vmul.f32 %v2499_v5, %v5489_v62  ;;  %v2519_v25 = vstv %s5648_s28  ;;  %s5787_s28 = sld [smem:[#allocation8 + $0x2c]] }
 0x201   : > { %v2500_v47 = vmul.f32 %v2499_v5, %v5491_v53  ;;  %v885_v22 = vadd.f32 %v883_v57, %v746_v36  ;;  %v893_v36 = vstv %s5674_s8  ;;  %s5797_s8 = sld [smem:[#allocation8 + $0xb1]] }
 0x202   : > { %v5676_v43 = vpop.permute.xlu1 %1996  ;;  %v5678_v39 = vpop.permute.xlu0 %1994 }
 0x203   : > { %6808 = vst [vmem:[#allocation73_spill] sm:$0xff] %v5676_v43  ;;  %6809 = vst [vmem:[#allocation74_spill] sm:$0xff] %v5678_v39  ;;  %v745_v39 = vadd.f32 %v743_v10, %v739_v49  ;;  %v5693_v43 = vld [vmem:[%s4081_s18 + $0x30] sm:$0xff]  ;;  %v2520_v49 = vmul.f32 %v2519_v25, %v5491_v53 }
 0x204   : > { %2492 = vrot.lane.b32.xlu1 %v2487_v60, %s3905_s14  ;;  %2490 = vrot.lane.b32.xlu0 %v2486_v54, %s3905_s14  ;;  %6811 = vst [vmem:[#allocation76_spill] sm:$0xff] %v5693_v43  ;;  %v882_v50 = vmul.f32 %v5693_v43, %v881_v61  ;;  %v2521_v60 = vmul.f32 %v2519_v25, %v5489_v62  ;;  %v5702_v54 = vld [vmem:[%s4081_s18 + $0x39] sm:$0x3f]  ;;  %v2533_v61 = vstv %s5667_s7  ;;  %s5792_s7 = sld [smem:[#allocation8 + $0x99]] }
 0x205   : > { %6814 = vst [vmem:[#allocation79_spill] sm:$0xff] %v5702_v54  ;;  %v889_v37 = vmul.f32 %v5702_v54, %v887_v48  ;;  %v5710_v43 = vld [vmem:[%s4081_s18 + $0x31] sm:$0xff]  ;;  %v5726_v25 = vld [vmem:[%s4081_s18 + $0x3a] sm:$0x3f] }
 0x206   : > { %v5696_v9 = vpop.permute.xlu1 %2016  ;;  %v5698_v5 = vpop.permute.xlu0 %2014  ;;  %v884_v10 = vadd.f32 %v882_v50, %v745_v39  ;;  %6815 = vst [vmem:[#allocation80_spill] sm:$0xff] %v5710_v43  ;;  %v2553_v39 = vstv %s5689_s9  ;;  %6818 = vst [vmem:[#allocation83_spill] sm:$0xff] %v5726_v25  ;;  %s5799_s9 = sld [smem:[#allocation8 + $0xc]] }
 0x207   : > { %6812 = vst [vmem:[#allocation77_spill] sm:$0xff] %v5696_v9  ;;  %6813 = vst [vmem:[#allocation78_spill] sm:$0xff] %v5698_v5  ;;  %v888_v5 = vmul.f32 %v5710_v43, %v887_v48  ;;  %v891_v9 = vadd.f32 %v889_v37, %v885_v22  ;;  %v895_v48 = vmul.f32 %v5726_v25, %v893_v36  ;;  %v5730_v43 = vld [vmem:[%s4081_s18 + $0x32] sm:$0xff]  ;;  %s5743_s18 = sld [smem:[#allocation5 + $0x54]]  ;;  %v2003_v13 = vstv %s5797_s8  ;;  %s5970_s8 = sld [smem:[#allocation5 + $0x5b]] }
 0x208   : > { %2506 = vrot.lane.b32.xlu1 %v2501_v45, %s3904_s27  ;;  %2504 = vrot.lane.b32.xlu0 %v2500_v47, %s3904_s27  ;;  %v2535_v45 = vmul.f32 %v2533_v61, %v5489_v62  ;;  %v2534_v47 = vmul.f32 %v2533_v61, %v5491_v53  ;;  %6819 = vst [vmem:[#allocation84_spill] sm:$0xff] %v5730_v43  ;;  %v2567_v61 = vstv %s5713_s10  ;;  %s5812_s10 = sld [smem:[#allocation8 + $0x43]] }
 0x209   : > { %v890_v50 = vadd.f32 %v888_v5, %v884_v10  ;;  %v2555_v22 = vmul.f32 %v2553_v39, %v5489_v62 }
 0x20a   : > { %v5716_v57 = vpop.permute.xlu1 %2030  ;;  %v5718_v54 = vpop.permute.xlu0 %2028  ;;  %v1969_v19 = vstv %s5792_s7  ;;  %s5963_s7 = sld [smem:[#allocation8 + $0x73]] }
 0x20b   : > { %6816 = vst [vmem:[#allocation81_spill] sm:$0xff] %v5716_v57  ;;  %6817 = vst [vmem:[#allocation82_spill] sm:$0xff] %v5718_v54  ;;  %v894_v54 = vmul.f32 %v5730_v43, %v893_v36 }
 0x20c   : > { %2526 = vrot.lane.b32.xlu1 %v2521_v60, %s3905_s14  ;;  %2524 = vrot.lane.b32.xlu0 %v2520_v49, %s3905_s14  ;;  %v2554_v60 = vmul.f32 %v2553_v39, %v5491_v53  ;;  %v897_v49 = vadd.f32 %v895_v48, %v891_v9  ;;  %v2569_v9 = vmul.f32 %v2567_v61, %v5489_v62  ;;  %v2587_v39 = vstv %s5733_s11  ;;  %s5816_s11 = sld [smem:[#allocation5 + $0x57]] }
 0x20d   : > { %v896_v5 = vadd.f32 %v894_v54, %v890_v50  ;;  %v2568_v54 = vmul.f32 %v2567_v61, %v5491_v53  ;;  %v1765_v61 = vstv %s5748_s12  ;;  %s5853_s12 = sld [smem:[#allocation8 + $0x44]] }
 0x20e   : > { %v5735_v57 = vpop.permute.xlu1 %2050  ;;  %v5737_v37 = vpop.permute.xlu0 %2048 }
 0x20f   : > { %6820 = vst [vmem:[#allocation85_spill] sm:$0xff] %v5735_v57  ;;  %6821 = vst [vmem:[#allocation86_spill] sm:$0xff] %v5737_v37  ;;  %v1867_v57 = vstv %s5773_s24  ;;  %s5921_s24 = sld [smem:[#allocation8 + $0xb4]] }
 0x210   : > { %2540 = vrot.lane.b32.xlu1 %v2535_v45, %s3904_s27  ;;  %2538 = vrot.lane.b32.xlu0 %v2534_v47, %s3904_s27  ;;  %v5764_v45 = vmax.f32 %v897_v49, 0.0  ;;  %v5766_v47 = vmax.f32 %v896_v5, 0.0  ;;  %v446_v49 = vstv %s5743_s18  ;;  %v2601_v5 = vstv %s5746_s13  ;;  %s5838_s18 = sld [smem:[#allocation8 + $0x24]] }
 0x211   : > { %v448_v43 = vmul.f32 %v5250_v52, %v446_v49  ;;  %v5822_v52 = vmul.f32 %v1765_v61, %v4947_v58  ;;  %s5840_s13 = sld [smem:[#allocation8 + $0x3c]] }
 0x212   : > { %v5752_v10 = vpop.permute.xlu1 %2064  ;;  %v5754_v36 = vpop.permute.xlu0 %2062  ;;  %v2603_v25 = vmul.f32 %v2601_v5, %v5764_v45 }
 0x213   : > { %6822 = vst [vmem:[#allocation87_spill] sm:$0xff] %v5752_v10  ;;  %6823 = vst [vmem:[#allocation88_spill] sm:$0xff] %v5754_v36  ;;  %v2602_v36 = vmul.f32 %v2601_v5, %v5766_v47  ;;  %v452_v10 = vstv %s5770_s21  ;;  %s5894_s21 = sld [smem:[#allocation5 + $0x59]] }
 0x214   : > { %2560 = vrot.lane.b32.xlu1 %v2555_v22, %s3905_s14  ;;  %2558 = vrot.lane.b32.xlu0 %v2554_v60, %s3905_s14  ;;  %v2589_v22 = vmul.f32 %v2587_v39, %v5764_v45  ;;  %v2588_v60 = vmul.f32 %v2587_v39, %v5766_v47  ;;  %v1833_v39 = vstv %s5756_s23  ;;  %s5881_s23 = sld [smem:[#allocation8 + $0x54]] }
 0x215   : > { %v5831_v5 = vmul.f32 %v1833_v39, %v4945_v44  ;;  %v5834_v37 = vmul.f32 %v1833_v39, %v4947_v58  ;;  %v454_v39 = vmul.f32 %v5273_v29, %v452_v10  ;;  %v5863_v29 = vmul.f32 %v1867_v57, %v4947_v58 }
 0x216   : > { %v5777_v48 = vpop.permute.xlu1 %2084  ;;  %v5779_v50 = vpop.permute.xlu0 %2082 }
 0x217   : > { %6824 = vst [vmem:[#allocation89_spill] sm:$0xff] %v5777_v48  ;;  %6825 = vst [vmem:[#allocation90_spill] sm:$0xff] %v5779_v50  ;;  %v1799_v50 = vstv %s5750_s17  ;;  %v2621_v48 = vstv %s5758_s15  ;;  %s5856_s17 = sld [smem:[#allocation5 + $0x58]]  ;;  %s5883_s15 = sld [smem:[#allocation8 + $0x6c]] }
 0x218   : > { %2574 = vrot.lane.b32.xlu1 %v2569_v9, %s3904_s27  ;;  %2572 = vrot.lane.b32.xlu0 %v2568_v54, %s3904_s27  ;;  %6828 = vst [vmem:[#allocation93_spill] sm:$0xff] %v5831_v5  ;;  %6829 = vst [vmem:[#allocation94_spill] sm:$0xff] %v5834_v37  ;;  %v2623_v2 = vmul.f32 %v2621_v48, %v5764_v45  ;;  %v2622_v37 = vmul.f32 %v2621_v48, %v5766_v47  ;;  %v2635_v5 = vstv %s5787_s28  ;;  %s5947_s28 = sld [smem:[#allocation8 + $0xf]] }
 0x219   : > { %6833 = vst [vmem:[#allocation98_spill] sm:$0xff] %v5863_v29  ;;  %v453_v29 = vmul.f32 %v5285_v18, %v452_v10  ;;  %v2071_v18 = vstv %s5838_s18  ;;  %v2105_v10 = vstv %s5840_s13  ;;  %s6033_s18 = sld [smem:[#allocation8 + $0x8b]]  ;;  %s6049_s13 = sld [smem:[#allocation5 + $0x5d]] }
 0x21a   : > { %v5801_v9 = vpop.permute.xlu1 %2098  ;;  %v5803_v54 = vpop.permute.xlu0 %2096 }
 0x21b   : > { %6826 = vst [vmem:[#allocation91_spill] sm:$0xff] %v5801_v9  ;;  %6827 = vst [vmem:[#allocation92_spill] sm:$0xff] %v5803_v54  ;;  %v312_v9 = vstv %s5768_s16  ;;  %v5819_v54 = vmul.f32 %v1765_v61, %v4945_v44  ;;  %s5891_s16 = sld [smem:[#allocation8 + $0x5b]] }
 0x21c   : > { %2594 = vrot.lane.b32.xlu1 %v2589_v22, %s3905_s14  ;;  %2592 = vrot.lane.b32.xlu0 %v2588_v60, %s3905_s14  ;;  %v5825_v22 = vmul.f32 %v1799_v50, %v4945_v44  ;;  %v5828_v60 = vmul.f32 %v1799_v50, %v4947_v58  ;;  %v1935_v50 = vstv %s5781_s26  ;;  %v450_v21 = vadd.f32 %v448_v43, %v312_v9  ;;  %s5932_s26 = sld [smem:[#allocation5 + $0x5a]] }
 0x21d   : > { %v5860_v43 = vmul.f32 %v1867_v57, %v4945_v44  ;;  %v5872_v48 = vmul.f32 %v1935_v50, %v4945_v44  ;;  %v2637_v57 = vmul.f32 %v2635_v5, %v5764_v45 }
 0x21e   : > { %v5842_v61 = vpop.permute.xlu1 %2118  ;;  %v5844_v6 = vpop.permute.xlu0 %2116 }
 0x21f   : > { %6830 = vst [vmem:[#allocation95_spill] sm:$0xff] %v5842_v61  ;;  %6831 = vst [vmem:[#allocation96_spill] sm:$0xff] %v5844_v6  ;;  %v458_v61 = vstv %s5790_s30  ;;  %v447_v6 = vmul.f32 %v5263_v42, %v446_v49  ;;  %v2037_v42 = vstv %s5799_s9  ;;  %s5959_s30 = sld [smem:[#allocation8 + $0x27]]  ;;  %s5997_s9 = sld [smem:[#allocation8 + $0x74]] }
 0x220   : > { %2608 = vrot.lane.b32.xlu1 %v2603_v25, %s3904_s27  ;;  %2606 = vrot.lane.b32.xlu0 %v2602_v36, %s3904_s27  ;;  %6832 = vst [vmem:[#allocation97_spill] sm:$0xff] %v5860_v43  ;;  %v5866_v25 = vmul.f32 %v1901_v0, %v4945_v44  ;;  %v5869_v36 = vmul.f32 %v1901_v0, %v4947_v58  ;;  %6836 = vst [vmem:[#allocation101_spill] sm:$0xff] %v5872_v48 }
 0x221   : > { %v2636_v0 = vmul.f32 %v2635_v5, %v5766_v47  ;;  %v460_v48 = vmul.f32 %v5295_v28, %v458_v61  ;;  %v5898_v5 = vmul.f32 %v1935_v50, %v4947_v58  ;;  %v5904_v28 = vmul.f32 %v1969_v19, %v4947_v58 }
 0x222   : > { %6834 = vst [vmem:[#allocation99_spill] sm:$0xff] %v5866_v25  ;;  %6835 = vst [vmem:[#allocation100_spill] sm:$0xff] %v5869_v36  ;;  %v5877_v49 = vpop.permute.xlu1 %2132  ;;  %v5879_v43 = vpop.permute.xlu0 %2130  ;;  %v456_v36 = vadd.f32 %v454_v39, %v450_v21  ;;  %v2655_v25 = vstv %s5812_s10  ;;  %v5901_v21 = vmul.f32 %v1969_v19, %v4945_v44  ;;  %s6004_s10 = sld [smem:[#allocation5 + $0x5c]] }
 0x223   : > { %6837 = vst [vmem:[#allocation102_spill] sm:$0xff] %v5877_v49  ;;  %6838 = vst [vmem:[#allocation103_spill] sm:$0xff] %v5879_v43  ;;  %v597_v43 = vstv %s5816_s11  ;;  %v449_v49 = vadd.f32 %v447_v6, %v312_v9  ;;  %v5913_v6 = vmul.f32 %v2037_v42, %v5207_v7  ;;  %v2657_v19 = vmul.f32 %v2655_v25, %v5764_v45  ;;  %s6029_s11 = sld [smem:[#allocation8 + $0x3f]] }
 0x224   : > { %2628 = vrot.lane.b32.xlu1 %v2623_v2, %s3905_s14  ;;  %2626 = vrot.lane.b32.xlu0 %v2622_v37, %s3905_s14  ;;  %6839 = vst [vmem:[#allocation104_spill] sm:$0xff] %v5898_v5  ;;  %6840 = vst [vmem:[#allocation105_spill] sm:$0xff] %v5901_v21  ;;  %v5907_v2 = vmul.f32 %v2003_v13, %v4945_v44  ;;  %v5910_v37 = vmul.f32 %v2003_v13, %v4947_v58  ;;  %v2669_v58 = vstv %s5853_s12  ;;  %s6058_s12 = sld [smem:[#allocation8 + $0x8c]] }
 0x225   : > { %6841 = vst [vmem:[#allocation106_spill] sm:$0xff] %v5904_v28  ;;  %v2656_v44 = vmul.f32 %v2655_v25, %v5766_v47  ;;  %v462_v39 = vadd.f32 %v460_v48, %v456_v36  ;;  %v599_v28 = vmul.f32 %v5317_v31, %v597_v43  ;;  %v603_v13 = vstv %s5856_s17  ;;  %s6073_s17 = sld [smem:[#allocation8 + $0xa3]] }
 0x226   : > { %v5917_v9 = vpop.permute.xlu1 %2152  ;;  %v5919_v50 = vpop.permute.xlu0 %2150  ;;  %v455_v21 = vadd.f32 %v453_v29, %v449_v49  ;;  %v459_v5 = vmul.f32 %v5307_v35, %v458_v61  ;;  %v5936_v25 = vmul.f32 %v2037_v42, %v5209_v33  ;;  %v5939_v31 = vmul.f32 %v2071_v18, %v5207_v7 }
 0x227   : > { %6842 = vst [vmem:[#allocation107_spill] sm:$0xff] %v5919_v50  ;;  %v5942_v36 = vmul.f32 %v2071_v18, %v5209_v33  ;;  %v5945_v48 = vmul.f32 %v2105_v10, %v5207_v7  ;;  %v1511_v29 = vadd.f32 %v5190_v12, %v4954_v51  ;;  %v1510_v35 = vadd.f32 %v5192_v16, %v4956_v26 }
 0x228   : > { %2642 = vrot.lane.b32.xlu1 %v2637_v57, %s3904_s27  ;;  %2640 = vrot.lane.b32.xlu0 %v2636_v0, %s3904_s27  ;;  %v2139_v61 = vstv %s5881_s23  ;;  %v2173_v57 = vstv %s5883_s15  ;;  %v2671_v0 = vmul.f32 %v2669_v58, %v5764_v45  ;;  %v2670_v18 = vmul.f32 %v2669_v58, %v5766_v47  ;;  %s6098_s23 = sld [smem:[#allocation5 + $0x5e]]  ;;  %s6108_s15 = sld [smem:[#allocation8 + $0xa4]] }
 0x229   : > { %v601_v50 = vadd.f32 %v599_v28, %v462_v39  ;;  %v605_v51 = vmul.f32 %v5339_v30, %v603_v13  ;;  %v2689_v26 = vstv %s5891_s16  ;;  %v609_v12 = vstv %s5894_s21  ;;  %s6133_s16 = sld [smem:[#allocation5 + $0x5f]]  ;;  %s6154_s21 = sld [smem:[#allocation8 + $0xbb]] }
 0x22a   : > { %v5954_v42 = vpop.permute.xlu1 %2166  ;;  %v5956_v49 = vpop.permute.xlu0 %2164  ;;  %v461_v16 = vadd.f32 %v459_v5, %v455_v21  ;;  %v1524_v58 = vadd.f32 %v5201_v24, %v1510_v35  ;;  %v5976_v28 = vmul.f32 %v2105_v10, %v5209_v33  ;;  %v5979_v30 = vmul.f32 %v2139_v61, %v5207_v7 }
 0x22b   : > { %6843 = vst [vmem:[#allocation108_spill] sm:$0xff] %v5954_v42  ;;  %6844 = vst [vmem:[#allocation109_spill] sm:$0xff] %v5956_v49  ;;  %v598_v49 = vmul.f32 %v5329_v14, %v597_v43  ;;  %v1525_v42 = vadd.f32 %v5199_v23, %v1511_v29  ;;  %v5990_v23 = vmul.f32 %v2173_v57, %v5209_v33  ;;  %v2275_v14 = vstv %s5921_s24  ;;  %s6157_s24 = sld [smem:[#allocation8 + $0x84]] }
 0x22c   : > { %2662 = vrot.lane.b32.xlu1 %v2657_v19, %s3905_s14  ;;  %2660 = vrot.lane.b32.xlu0 %v2656_v44, %s3905_s14  ;;  %v5982_v19 = vmul.f32 %v2139_v61, %v5209_v33  ;;  %v5985_v44 = vmul.f32 %v2173_v57, %v5207_v7  ;;  %v2691_v43 = vmul.f32 %v2689_v26, %v5764_v45  ;;  %v2703_v29 = vstv %s5929_s25  ;;  %s6180_s25 = sld [smem:[#allocation8 + $0xbc]] }
 0x22d   : > { %v2690_v21 = vmul.f32 %v2689_v26, %v5766_v47  ;;  %v607_v10 = vadd.f32 %v605_v51, %v601_v50  ;;  %v611_v39 = vmul.f32 %v5361_v27, %v609_v12  ;;  %v748_v35 = vstv %s5932_s26  ;;  %s6190_s26 = sld [smem:[#allocation8 + $0x57]] }
 0x22e   : > { %v5987_v5 = vpop.permute.xlu1 %2186  ;;  %v5992_v24 = vpop.permute.xlu0 %2184  ;;  %v600_v61 = vadd.f32 %v598_v49, %v461_v16  ;;  %v604_v57 = vmul.f32 %v5351_v8, %v603_v13  ;;  %v1545_v26 = vadd.f32 %v5215_v3, %v4986_v20  ;;  %v6010_v50 = vadd.f32 %v5819_v54, %v1525_v42 }
 0x22f   : > { %6845 = vst [vmem:[#allocation110_spill] sm:$0xff] %v5992_v24  ;;  %v6013_v27 = vadd.f32 %v5822_v52, %v1524_v58  ;;  %v6023_v8 = vmul.f32 %v2275_v14, %v5207_v7  ;;  %v6026_v20 = vmul.f32 %v2275_v14, %v5209_v33  ;;  %v2343_v3 = vstv %s5959_s30  ;;  %s6220_s30 = sld [smem:[#allocation8 + $0x2e]] }
 0x230   : > { %2676 = vrot.lane.b32.xlu1 %v2671_v0, %s3904_s27  ;;  %2674 = vrot.lane.b32.xlu0 %v2670_v18, %s3904_s27  ;;  %v2309_v0 = vstv %s5947_s28  ;;  %v1544_v18 = vadd.f32 %v5217_v4, %v4988_v34  ;;  %v2705_v54 = vmul.f32 %v2703_v29, %v5764_v45  ;;  %v2723_v52 = vstv %s5963_s7  ;;  %s6201_s28 = sld [smem:[#allocation8 + $0x16]]  ;;  %s6231_s7 = sld [smem:[#allocation8 + $0x6f]] }
 0x231   : > { %v613_v13 = vadd.f32 %v611_v39, %v607_v10  ;;  %v750_v34 = vmul.f32 %v5383_v56, %v748_v35  ;;  %v2704_v4 = vmul.f32 %v2703_v29, %v5766_v47  ;;  %v754_v42 = vstv %s5970_s8  ;;  %s6248_s8 = sld [smem:[#allocation8 + $0x46]] }
 0x232   : > { %v6018_v51 = vpop.permute.xlu1 %2200  ;;  %v6020_v24 = vpop.permute.xlu0 %2198  ;;  %v606_v49 = vadd.f32 %v604_v57, %v600_v61  ;;  %v610_v16 = vmul.f32 %v5373_v55, %v609_v12  ;;  %v1559_v58 = vadd.f32 %v5229_v11, %v1545_v26  ;;  %v1558_v14 = vadd.f32 %v5231_v38, %v1544_v18 }
 0x233   : > { %6846 = vst [vmem:[#allocation111_spill] sm:$0xff] %v6020_v24  ;;  %v6044_v24 = vmul.f32 %v2309_v0, %v5489_v62  ;;  %v6047_v56 = vmul.f32 %v2309_v0, %v5491_v53  ;;  %v2725_v11 = vmul.f32 %v2723_v52, %v5764_v45  ;;  %v6061_v38 = vmul.f32 %v2343_v3, %v5489_v62 }
 0x234   : > { %2696 = vrot.lane.b32.xlu1 %v2691_v43, %s3905_s14  ;;  %2694 = vrot.lane.b32.xlu0 %v2690_v21, %s3905_s14  ;;  %v1579_v43 = vadd.f32 %v5243_v15, %v5022_v41  ;;  %v6064_v55 = vmul.f32 %v2343_v3, %v5491_v53  ;;  %v2724_v12 = vmul.f32 %v2723_v52, %v5766_v47  ;;  %v2737_v39 = vstv %s5997_s9  ;;  %v6848_v3 = vld [vmem:[#allocation16_spill] sm:$0xff]  ;;  %v6849_v52 = vld [vmem:[#allocation43_spill] sm:$0xff]  ;;  %s6268_s9 = sld [smem:[#allocation8 + $0x5e]] }
 0x235   : > { %v752_v29 = vadd.f32 %v750_v34, %v613_v13  ;;  %v756_v41 = vmul.f32 %v5405_v1, %v754_v42  ;;  %v1749_v15 = vadd.f32 %v5450_v63, %v5186_v40  ;;  %v760_v61 = vstv %s6004_s10  ;;  %v6847_v63 = vld [vmem:[#allocation17_spill] sm:$0xff]  ;;  %s6280_s10 = sld [smem:[#allocation8 + $0x9c]] }
 0x236   : > { %v6053_v21 = vpop.permute.xlu1 %2220  ;;  %v6055_v10 = vpop.permute.xlu0 %2218  ;;  %v612_v57 = vadd.f32 %v610_v16, %v606_v49  ;;  %v749_v26 = vmul.f32 %v5395_v17, %v748_v35  ;;  %v1593_v0 = vadd.f32 %v5266_v59, %v1579_v43  ;;  %v1748_v1 = vadd.f32 %v5452_v32, %v5188_v46  ;;  %v6851_v17 = vld [vmem:[#allocation44_spill] sm:$0xff] }
 0x237   : > { %v6081_v18 = vadd.f32 %v5825_v22, %v1559_v58  ;;  %v6084_v40 = vadd.f32 %v5828_v60, %v1558_v14  ;;  %v1763_v13 = vadd.f32 %v6849_v52, %v1749_v15  ;;  %v2739_v59 = vmul.f32 %v2737_v39, %v5764_v45  ;;  %v6852_v60 = vld [vmem:[#allocation71_spill] sm:$0xff]  ;;  %v6853_v14 = vld [vmem:[#allocation38_spill] sm:$0xff]  ;;  %v6854_v15 = vld [vmem:[#allocation25_spill] sm:$0xff] }
 0x238   : > { %2710 = vrot.lane.b32.xlu1 %v2705_v54, %s3904_s27  ;;  %2708 = vrot.lane.b32.xlu0 %v2704_v4, %s3904_s27  ;;  %v1578_v54 = vadd.f32 %v6848_v3, %v6847_v63  ;;  %v6733_v46 = vstv %s6029_s11  ;;  %v1762_v32 = vadd.f32 %v6851_v17, %v1748_v1  ;;  %v2757_v22 = vstv %s6033_s18  ;;  %v6855_v3 = vld [vmem:[#allocation93_spill] sm:$0xff]  ;;  %v6859_v52 = vld [vmem:[#allocation46_spill] sm:$0xff]  ;;  %s6319_s18 = sld [smem:[#allocation8 + $0x8e]] }
 0x239   : > { %v758_v35 = vadd.f32 %v756_v41, %v752_v29  ;;  %v762_v49 = vmul.f32 %v6852_v60, %v760_v61  ;;  %v2738_v16 = vmul.f32 %v2737_v39, %v5766_v47  ;;  %v751_v58 = vadd.f32 %v749_v26, %v612_v57 }
 0x23a   : > { %v6089_v34 = vpop.permute.xlu1 %2234  ;;  %v6091_v4 = vpop.permute.xlu0 %2232  ;;  %v755_v43 = vmul.f32 %v6853_v14, %v754_v42  ;;  %v1592_v63 = vadd.f32 %v6854_v15, %v1578_v54  ;;  %v6106_v1 = vadd.f32 %v6855_v3, %v1593_v0  ;;  %v899_v29 = vstv %s6049_s13  ;;  %v6858_v0 = vld [vmem:[#allocation45_spill] sm:$0xff]  ;;  %v6861_v3 = vld [vmem:[#allocation72_spill] sm:$0xff]  ;;  %s6337_s13 = sld [smem:[#allocation8 + $0x87]] }
 0x23b   : > { %6850 = vst [vmem:[#allocation17_spill] sm:$0xff] %v6091_v4  ;;  %v6114_v41 = vmul.f32 %v6733_v46, %v5489_v62  ;;  %v2759_v42 = vmul.f32 %v2757_v22, %v5764_v45  ;;  %v2758_v57 = vmul.f32 %v2757_v22, %v5766_v47  ;;  %v2771_v26 = vstv %s6058_s12  ;;  %s6346_s12 = sld [smem:[#allocation8 + $0xa6]] }
 0x23c   : > { %2730 = vrot.lane.b32.xlu1 %v2725_v11, %s3905_s14  ;;  %2728 = vrot.lane.b32.xlu0 %v2724_v12, %s3905_s14  ;;  %v2007_v11 = vadd.f32 %v5907_v2, %v1763_v13  ;;  %v1783_v54 = vadd.f32 %v6858_v0, %v6010_v50  ;;  %v1782_v17 = vadd.f32 %v6859_v52, %v6013_v27  ;;  %v2791_v2 = vstv %s6073_s17  ;;  %v6860_v13 = vld [vmem:[#allocation75_spill] sm:$0xff]  ;;  %v6864_v52 = vld [vmem:[#allocation77_spill] sm:$0xff]  ;;  %s6363_s17 = sld [smem:[#allocation8 + $0xbe]] }
 0x23d   : > { %v2006_v60 = vadd.f32 %v5910_v37, %v1762_v32  ;;  %v764_v14 = vadd.f32 %v762_v49, %v758_v35  ;;  %v901_v15 = vmul.f32 %v6860_v13, %v899_v29  ;;  %v757_v22 = vadd.f32 %v755_v43, %v751_v58  ;;  %v6862_v50 = vld [vmem:[#allocation47_spill] sm:$0xff]  ;;  %v6865_v32 = vld [vmem:[#allocation78_spill] sm:$0xff] }
 0x23e   : > { %v6117_v12 = vpop.permute.xlu1 %2254  ;;  %v6119_v39 = vpop.permute.xlu0 %2252  ;;  %v761_v46 = vmul.f32 %v6861_v3, %v760_v61  ;;  %v1797_v0 = vadd.f32 %v6862_v50, %v1783_v54  ;;  %v2021_v37 = vadd.f32 %v6864_v52, %v2007_v11  ;;  %v6867_v49 = vld [vmem:[#allocation26_spill] sm:$0xff]  ;;  %v2773_v61 = vmul.f32 %v2771_v26, %v5764_v45  ;;  %v6872_v50 = vld [vmem:[#allocation76_spill] sm:$0xff] }
 0x23f   : > { %6856 = vst [vmem:[#allocation16_spill] sm:$0xff] %v6117_v12  ;;  %6857 = vst [vmem:[#allocation43_spill] sm:$0xff] %v6119_v39  ;;  %v6863_v39 = vld [vmem:[#allocation48_spill] sm:$0xff]  ;;  %v2020_v35 = vadd.f32 %v6865_v32, %v2006_v60  ;;  %v6868_v12 = vld [vmem:[#allocation94_spill] sm:$0xff]  ;;  %v2772_v43 = vmul.f32 %v2771_v26, %v5766_v47  ;;  %v2793_v60 = vmul.f32 %v2791_v2, %v5764_v45  ;;  %v905_v3 = vstv %s6098_s23  ;;  %s6384_s23 = sld [smem:[#allocation8 + $0x17]] }
 0x240   : > { %2744 = vrot.lane.b32.xlu1 %v2739_v59, %s3904_s27  ;;  %2742 = vrot.lane.b32.xlu0 %v2738_v16, %s3904_s27  ;;  %v1796_v27 = vadd.f32 %v6863_v39, %v1782_v17  ;;  %v6866_v59 = vld [vmem:[#allocation18_spill] sm:$0xff]  ;;  %v6143_v4 = vadd.f32 %v6868_v12, %v1592_v63  ;;  %v6870_v39 = vld [vmem:[#allocation81_spill] sm:$0xff]  ;;  %v2792_v63 = vmul.f32 %v2791_v2, %v5766_v47  ;;  %v2805_v32 = vstv %s6108_s15  ;;  %s6386_s15 = sld [smem:[#allocation8 + $0x9f]] }
 0x241   : > { %v1613_v16 = vadd.f32 %v6867_v49, %v6866_v59  ;;  %v2035_v54 = vadd.f32 %v6870_v39, %v2021_v37  ;;  %v6871_v11 = vld [vmem:[#allocation82_spill] sm:$0xff]  ;;  %v763_v12 = vadd.f32 %v761_v46, %v757_v22  ;;  %v900_v26 = vmul.f32 %v6872_v50, %v899_v29  ;;  %v6873_v59 = vld [vmem:[#allocation49_spill] sm:$0xff]  ;;  %v6876_v46 = vld [vmem:[#allocation80_spill] sm:$0xff] }
 0x242   : > { %v6145_v13 = vpop.permute.xlu1 %2268  ;;  %v6147_v58 = vpop.permute.xlu0 %2266  ;;  %v2034_v17 = vadd.f32 %v6871_v11, %v2020_v35  ;;  %v2041_v52 = vadd.f32 %v5913_v6, %v1797_v0  ;;  %v2040_v37 = vadd.f32 %v5936_v25, %v1796_v27  ;;  %v903_v35 = vadd.f32 %v901_v15, %v764_v14  ;;  %v6874_v39 = vld [vmem:[#allocation50_spill] sm:$0xff]  ;;  %v6877_v29 = vld [vmem:[#allocation85_spill] sm:$0xff]  ;;  %v6879_v15 = vld [vmem:[#allocation51_spill] sm:$0xff] }
 0x243   : > { %6869 = vst [vmem:[#allocation44_spill] sm:$0xff] %v6147_v58  ;;  %v1817_v49 = vadd.f32 %v6873_v59, %v6081_v18  ;;  %v6875_v58 = vld [vmem:[#allocation79_spill] sm:$0xff]  ;;  %v906_v22 = vmul.f32 %v6876_v46, %v905_v3  ;;  %v6878_v6 = vld [vmem:[#allocation86_spill] sm:$0xff]  ;;  %v2279_v25 = vadd.f32 %v6023_v8, %v2035_v54  ;;  %v6880_v18 = vld [vmem:[#allocation52_spill] sm:$0xff] }
 0x244   : > { %2764 = vrot.lane.b32.xlu1 %v2759_v42, %s3905_s14  ;;  %2762 = vrot.lane.b32.xlu0 %v2758_v57, %s3905_s14  ;;  %v1816_v42 = vadd.f32 %v6874_v39, %v6084_v40  ;;  %v907_v2 = vmul.f32 %v6875_v58, %v905_v3  ;;  %v2055_v50 = vadd.f32 %v6877_v29, %v2041_v52  ;;  %v911_v40 = vstv %s6133_s16  ;;  %v6881_v3 = vld [vmem:[#allocation87_spill] sm:$0xff]  ;;  %s6407_s16 = sld [smem:[#allocation8 + $0x2f]] }
 0x245   : > { %v2054_v0 = vadd.f32 %v6878_v6, %v2040_v37  ;;  %v2278_v14 = vadd.f32 %v6026_v20, %v2034_v17  ;;  %v1831_v27 = vadd.f32 %v6879_v15, %v1817_v49  ;;  %v902_v58 = vadd.f32 %v900_v26, %v763_v12  ;;  %v6882_v37 = vld [vmem:[#allocation88_spill] sm:$0xff]  ;;  %v6883_v17 = vld [vmem:[#allocation19_spill] sm:$0xff] }
 0x246   : > { %v2289_v11 = vpop.permute.xlu1 %2288  ;;  %v2287_v57 = vpop.permute.xlu0 %2286  ;;  %v1830_v59 = vadd.f32 %v6880_v18, %v1816_v42  ;;  %v2069_v52 = vadd.f32 %v6881_v3, %v2055_v50  ;;  %v6884_v49 = vld [vmem:[#allocation27_spill] sm:$0xff]  ;;  %v6885_v42 = vld [vmem:[#allocation28_spill] sm:$0xff]  ;;  %v2806_v6 = vmul.f32 %v2805_v32, %v5766_v47  ;;  %v2825_v50 = vstv %s6154_s21  ;;  %s6419_s21 = sld [smem:[#allocation8 + $0x47]] }
 0x247   : > { %v2068_v8 = vadd.f32 %v6882_v37, %v2054_v0  ;;  %v2293_v54 = vadd.f32 %v2289_v11, %v2279_v25  ;;  %v2292_v20 = vadd.f32 %v2287_v57, %v2278_v14  ;;  %v1612_v39 = vadd.f32 %v6884_v49, %v6883_v17  ;;  %v6887_v14 = vld [vmem:[#allocation84_spill] sm:$0xff] }
 0x248   : > { %2778 = vrot.lane.b32.xlu1 %v2773_v61, %s3904_s27  ;;  %2776 = vrot.lane.b32.xlu0 %v2772_v43, %s3904_s27  ;;  %v1627_v46 = vadd.f32 %v6885_v42, %v1613_v16  ;;  %v2807_v43 = vmul.f32 %v2805_v32, %v5764_v45  ;;  %v909_v11 = vadd.f32 %v907_v2, %v903_v35  ;;  %v2207_v57 = vstv %s6157_s24  ;;  %v6886_v16 = vld [vmem:[#allocation83_spill] sm:$0xff]  ;;  %v6888_v2 = vld [vmem:[#allocation29_spill] sm:$0xff]  ;;  %s6421_s24 = sld [smem:[#allocation8 + $0xb7]] }
 0x249   : > { %v913_v0 = vmul.f32 %v6886_v16, %v911_v40  ;;  %v908_v25 = vadd.f32 %v906_v22, %v902_v58  ;;  %v912_v32 = vmul.f32 %v6887_v14, %v911_v40  ;;  %v2075_v15 = vadd.f32 %v5939_v31, %v1831_v27  ;;  %v6891_v31 = vld [vmem:[#allocation89_spill] sm:$0xff]  ;;  %v6896_v16 = vld [vmem:[#allocation92_spill] sm:$0xff] }
 0x24a   : > { %v2303_v61 = vpop.permute.xlu1 %2302  ;;  %v2301_v29 = vpop.permute.xlu0 %2300  ;;  %v2074_v18 = vadd.f32 %v5942_v36, %v1830_v59  ;;  %v2313_v3 = vadd.f32 %v6044_v24, %v2069_v52  ;;  %v2312_v35 = vadd.f32 %v6047_v56, %v2068_v8  ;;  %v2827_v40 = vmul.f32 %v2825_v50, %v5764_v45  ;;  %v6892_v36 = vld [vmem:[#allocation90_spill] sm:$0xff]  ;;  %v6893_v8 = vld [vmem:[#allocation55_spill] sm:$0xff] }
 0x24b   : > { %v6192_v12 = vadd.f32 %v2303_v61, %v2293_v54  ;;  %v6194_v26 = vadd.f32 %v2301_v29, %v2292_v20  ;;  %v6890_v54 = vld [vmem:[#allocation54_spill] sm:$0xff]  ;;  %v2089_v27 = vadd.f32 %v6891_v31, %v2075_v15  ;;  %v2826_v56 = vmul.f32 %v2825_v50, %v5766_v47  ;;  %v6895_v61 = vld [vmem:[#allocation91_spill] sm:$0xff]  ;;  %v6897_v15 = vld [vmem:[#allocation20_spill] sm:$0xff] }
 0x24c   : > { %2798 = vrot.lane.b32.xlu1 %v2793_v60, %s3905_s14  ;;  %2796 = vrot.lane.b32.xlu0 %v2792_v63, %s3905_s14  ;;  %v1626_v60 = vadd.f32 %v6888_v2, %v1612_v39  ;;  %v6889_v63 = vld [vmem:[#allocation53_spill] sm:$0xff]  ;;  %v1850_v20 = vadd.f32 %v6890_v54, %v6143_v4  ;;  %v2088_v59 = vadd.f32 %v6892_v36, %v2074_v18  ;;  %v6894_v39 = vld [vmem:[#allocation56_spill] sm:$0xff]  ;;  %v6900_v50 = vld [vmem:[#allocation98_spill] sm:$0xff] }
 0x24d   : > { %v1851_v37 = vadd.f32 %v6889_v63, %v6106_v1  ;;  %v2839_v1 = vstv %s6180_s25  ;;  %v915_v52 = vadd.f32 %v913_v0, %v909_v11  ;;  %v914_v4 = vadd.f32 %v912_v32, %v908_v25  ;;  %v6901_v32 = vld [vmem:[#allocation21_spill] sm:$0xff]  ;;  %v6902_v2 = vld [vmem:[#allocation31_spill] sm:$0xff]  ;;  %s6434_s25 = sld [smem:[#allocation8 + $0x5f]] }
 0x24e   : > { %v2323_v22 = vpop.permute.xlu1 %2322  ;;  %v2321_v58 = vpop.permute.xlu0 %2320  ;;  %v1864_v42 = vadd.f32 %v6894_v39, %v1850_v20  ;;  %v2103_v29 = vadd.f32 %v6895_v61, %v2089_v27  ;;  %v2102_v14 = vadd.f32 %v6896_v16, %v2088_v59  ;;  %v2411_v25 = vstv %s6190_s26  ;;  %v6903_v59 = vld [vmem:[#allocation32_spill] sm:$0xff]  ;;  %v6907_v16 = vld [vmem:[#allocation95_spill] sm:$0xff]  ;;  %s6448_s26 = sld [smem:[#allocation8 + $0x12]] }
 0x24f   : > { %v2327_v17 = vadd.f32 %v2323_v22, %v2313_v3  ;;  %v2326_v24 = vadd.f32 %v2321_v58, %v2312_v35  ;;  %v1865_v49 = vadd.f32 %v6893_v8, %v1851_v37  ;;  %v1870_v35 = vadd.f32 %v6900_v50, %v1626_v60 }
 0x250   : > { %2812 = vrot.lane.b32.xlu1 %v2807_v43, %s3904_s27  ;;  %2810 = vrot.lane.b32.xlu0 %v2806_v6, %s3904_s27  ;;  %v6898_v43 = vld [vmem:[#allocation30_spill] sm:$0xff]  ;;  %v6899_v6 = vld [vmem:[#allocation97_spill] sm:$0xff]  ;;  %v1646_v63 = vadd.f32 %v6902_v2, %v6901_v32  ;;  %v2841_v20 = vmul.f32 %v2839_v1, %v5764_v45  ;;  %v6243_v60 = vmax.f32 %v915_v52, 0.0  ;;  %v2859_v22 = vstv %s6201_s28  ;;  %v6914_v2 = vld [vmem:[#allocation99_spill] sm:$0xff]  ;;  %s6457_s28 = sld [smem:[#allocation8 + $0x8f]] }
 0x251   : > { %v1647_v18 = vadd.f32 %v6898_v43, %v6897_v15  ;;  %v1871_v3 = vadd.f32 %v6899_v6, %v1627_v46  ;;  %v2840_v46 = vmul.f32 %v2839_v1, %v5766_v47  ;;  %v6246_v58 = vmax.f32 %v914_v4, 0.0  ;;  %v6905_v1 = vld [vmem:[#allocation57_spill] sm:$0xff]  ;;  %v6906_v4 = vld [vmem:[#allocation58_spill] sm:$0xff] }
 0x252   : > { %v2337_v11 = vpop.permute.xlu1 %2336  ;;  %v2335_v0 = vpop.permute.xlu0 %2334  ;;  %v2109_v31 = vadd.f32 %v5945_v48, %v1865_v49  ;;  %v2108_v27 = vadd.f32 %v5976_v28, %v1864_v42  ;;  %v2347_v36 = vadd.f32 %v6061_v38, %v2103_v29  ;;  %v1884_v8 = vadd.f32 %v6906_v4, %v1870_v35  ;;  %v6908_v49 = vld [vmem:[#allocation96_spill] sm:$0xff]  ;;  %v6912_v35 = vld [vmem:[#allocation102_spill] sm:$0xff]  ;;  %v6918_v4 = vld [vmem:[#allocation23_spill] sm:$0xff] }
 0x253   : > { %v6235_v37 = vadd.f32 %v2337_v11, %v2327_v17  ;;  %v6237_v54 = vadd.f32 %v2335_v0, %v2326_v24  ;;  %v1661_v17 = vadd.f32 %v6903_v59, %v1647_v18  ;;  %v6904_v24 = vld [vmem:[#allocation33_spill] sm:$0xff]  ;;  %v1885_v52 = vadd.f32 %v6905_v1, %v1871_v3  ;;  %v6910_v18 = vld [vmem:[#allocation59_spill] sm:$0xff]  ;;  %v6911_v3 = vld [vmem:[#allocation60_spill] sm:$0xff] }
 0x254   : > { %2832 = vrot.lane.b32.xlu1 %v2827_v40, %s3905_s14  ;;  %2830 = vrot.lane.b32.xlu0 %v2826_v56, %s3905_s14  ;;  %v2346_v40 = vadd.f32 %v6064_v55, %v2102_v14  ;;  %v1660_v56 = vadd.f32 %v6904_v24, %v1646_v63  ;;  %v2123_v48 = vadd.f32 %v6907_v16, %v2109_v31  ;;  %v6909_v14 = vstv %s6029_s11  ;;  %v6913_v0 = vld [vmem:[#allocation103_spill] sm:$0xff]  ;;  %v6917_v24 = vld [vmem:[#allocation100_spill] sm:$0xff]  ;;  %s6300_s11 = sld [smem:[#allocation8 + $0x76]] }
 0x255   : > { %v2122_v28 = vadd.f32 %v6908_v49, %v2108_v27  ;;  %v2861_v55 = vmul.f32 %v2859_v22, %v6243_v60  ;;  %v2860_v29 = vmul.f32 %v2859_v22, %v6246_v58  ;;  %v2378_v15 = vmul.f32 %v6909_v14, %v5491_v53  ;;  %v6921_v14 = vld [vmem:[#allocation37_spill] sm:$0xff] }
 0x256   : > { %v2357_v39 = vpop.permute.xlu1 %2356  ;;  %v2355_v61 = vpop.permute.xlu0 %2354  ;;  %v2893_v43 = vstv %s6220_s30  ;;  %v1899_v6 = vadd.f32 %v6910_v18, %v1885_v52  ;;  %v1898_v50 = vadd.f32 %v6911_v3, %v1884_v8  ;;  %v2137_v11 = vadd.f32 %v6912_v35, %v2123_v48  ;;  %v6919_v8 = vld [vmem:[#allocation35_spill] sm:$0xff]  ;;  %v6922_v18 = vld [vmem:[#allocation61_spill] sm:$0xff]  ;;  %v6923_v35 = vld [vmem:[#allocation62_spill] sm:$0xff]  ;;  %s6470_s30 = sld [smem:[#allocation8 + $0xa7]] }
 0x257   : > { %v2361_v38 = vadd.f32 %v2357_v39, %v2347_v36  ;;  %v2360_v42 = vadd.f32 %v2355_v61, %v2346_v40  ;;  %v2136_v32 = vadd.f32 %v6913_v0, %v2122_v28  ;;  %v1905_v63 = vadd.f32 %v6914_v2, %v1661_v17  ;;  %v6915_v36 = vld [vmem:[#allocation22_spill] sm:$0xff] }
 0x258   : > { %2846 = vrot.lane.b32.xlu1 %v2841_v20, %s3904_s27  ;;  %2844 = vrot.lane.b32.xlu0 %v2840_v46, %s3904_s27  ;;  %v6278_v20 = vmul.f32 %v2207_v57, %v5207_v7  ;;  %v2413_v31 = vmul.f32 %v2411_v25, %v5489_v62  ;;  %v2445_v27 = vstv %s6231_s7  ;;  %v6916_v40 = vld [vmem:[#allocation34_spill] sm:$0xff]  ;;  %v1904_v1 = vadd.f32 %v6917_v24, %v1660_v56  ;;  %v6928_v24 = vld [vmem:[#allocation109_spill] sm:$0xff]  ;;  %s6473_s7 = sld [smem:[#allocation8 + $0x2a]] }
 0x259   : > { %v1681_v59 = vadd.f32 %v6916_v40, %v6915_v36  ;;  %v1680_v39 = vadd.f32 %v6919_v8, %v6918_v4  ;;  %v2895_v61 = vmul.f32 %v2893_v43, %v6243_v60  ;;  %v2894_v16 = vmul.f32 %v2893_v43, %v6246_v58  ;;  %v6927_v40 = vld [vmem:[#allocation108_spill] sm:$0xff] }
 0x25a   : > { %v2371_v46 = vpop.permute.xlu1 %2370  ;;  %v2369_v22 = vpop.permute.xlu0 %2368  ;;  %v2927_v48 = vstv %s6248_s8  ;;  %v2143_v56 = vadd.f32 %v5979_v30, %v1899_v6  ;;  %v2142_v49 = vadd.f32 %v5982_v19, %v1898_v50  ;;  %v2381_v28 = vadd.f32 %v6114_v41, %v2137_v11  ;;  %v6924_v6 = vld [vmem:[#allocation107_spill] sm:$0xff]  ;;  %s6482_s8 = sld [smem:[#allocation8 + $0xbf]] }
 0x25b   : > { %v6289_v52 = vadd.f32 %v2371_v46, %v2361_v38  ;;  %v6291_v17 = vadd.f32 %v2369_v22, %v2360_v42  ;;  %v2380_v38 = vadd.f32 %v2378_v15, %v2136_v32  ;;  %v6920_v42 = vld [vmem:[#allocation36_spill] sm:$0xff]  ;;  %v1919_v3 = vadd.f32 %v6922_v18, %v1905_v63 }
 0x25c   : > { %2866 = vrot.lane.b32.xlu1 %v2861_v55, %s3905_s14  ;;  %2864 = vrot.lane.b32.xlu0 %v2860_v29, %s3905_s14  ;;  %v1695_v55 = vadd.f32 %v6920_v42, %v1681_v59  ;;  %v1694_v29 = vadd.f32 %v6921_v14, %v1680_v39  ;;  %v1918_v43 = vadd.f32 %v6923_v35, %v1904_v1  ;;  %v2961_v63 = vstv %s6268_s9  ;;  %v6926_v22 = vld [vmem:[#allocation64_spill] sm:$0xff]  ;;  %v6931_v14 = vld [vmem:[#allocation15_spill] sm:$0xff]  ;;  %s3567_s9 = sld [smem:[#allocation8 + $0x42]] }
 0x25d   : > { %v2157_v30 = vadd.f32 %v5917_v9, %v2143_v56  ;;  %v2156_v19 = vadd.f32 %v6924_v6, %v2142_v49  ;;  %v2929_v15 = vmul.f32 %v2927_v48, %v6243_v60  ;;  %v2928_v11 = vmul.f32 %v2927_v48, %v6246_v58  ;;  %v6925_v9 = vld [vmem:[#allocation63_spill] sm:$0xff]  ;;  %v6929_v48 = vld [vmem:[#allocation101_spill] sm:$0xff]  ;;  %v6930_v49 = vld [vmem:[#allocation104_spill] sm:$0xff] }
 0x25e   : > { %v2391_v0 = vpop.permute.xlu1 %2390  ;;  %v2389_v2 = vpop.permute.xlu0 %2388  ;;  %v2412_v32 = vmul.f32 %v2411_v25, %v5491_v53  ;;  %v1933_v46 = vadd.f32 %v6925_v9, %v1919_v3  ;;  %v1932_v36 = vadd.f32 %v6926_v22, %v1918_v43  ;;  %v2208_v4 = vmul.f32 %v2207_v57, %v5209_v33  ;;  %v6932_v57 = vld [vmem:[#allocation39_spill] sm:$0xff] }
 0x25f   : > { %v2395_v41 = vadd.f32 %v2391_v0, %v2381_v28  ;;  %v2394_v50 = vadd.f32 %v2389_v2, %v2380_v38  ;;  %v2171_v59 = vadd.f32 %v6927_v40, %v2157_v30  ;;  %v2170_v1 = vadd.f32 %v6928_v24, %v2156_v19  ;;  %v6933_v2 = vld [vmem:[#allocation24_spill] sm:$0xff]  ;;  %v6935_v19 = vld [vmem:[#allocation41_spill] sm:$0xff] }
 0x260   : > { %2900 = vrot.lane.b32.xlu1 %v2895_v61, %s3905_s14  ;;  %2898 = vrot.lane.b32.xlu0 %v2894_v16, %s3905_s14  ;;  %v2241_v8 = vstv %s6280_s10  ;;  %v2447_v25 = vmul.f32 %v2445_v27, %v5489_v62  ;;  %v2446_v16 = vmul.f32 %v2445_v27, %v5491_v53  ;;  %v1939_v56 = vadd.f32 %v6929_v48, %v1695_v55  ;;  %v6934_v30 = vld [vmem:[#allocation40_spill] sm:$0xff]  ;;  %s3570_s10 = sld [smem:[#allocation8 + $0x5a]] }
 0x261   : > { %v1938_v28 = vadd.f32 %v6930_v49, %v1694_v29  ;;  %v1715_v18 = vadd.f32 %v6932_v57, %v6931_v14  ;;  %v2963_v3 = vmul.f32 %v2961_v63, %v6243_v60  ;;  %v2962_v27 = vmul.f32 %v2961_v63, %v6246_v58  ;;  %v6942_v49 = vld [vmem:[#allocation111_spill] sm:$0xff] }
 0x262   : > { %v2405_v39 = vpop.permute.xlu1 %2404  ;;  %v2403_v61 = vpop.permute.xlu0 %2402  ;;  %v2995_v55 = vstv %s6300_s11  ;;  %v2177_v29 = vadd.f32 %v5985_v44, %v1933_v46  ;;  %v2176_v35 = vadd.f32 %v5990_v23, %v1932_v36  ;;  %v2415_v43 = vadd.f32 %v2413_v31, %v2171_v59  ;;  %v6938_v44 = vld [vmem:[#allocation110_spill] sm:$0xff]  ;;  %s3573_s11 = sld [smem:[#allocation8 + $0x72]] }
 0x263   : > { %v6333_v38 = vadd.f32 %v2405_v39, %v2395_v41  ;;  %v6335_v42 = vadd.f32 %v2403_v61, %v2394_v50  ;;  %v2414_v0 = vadd.f32 %v2412_v32, %v2170_v1  ;;  %v1714_v6 = vadd.f32 %v6934_v30, %v6933_v2  ;;  %v6936_v50 = vld [vmem:[#allocation65_spill] sm:$0xff]  ;;  %v6939_v32 = vld [vmem:[#allocation42_spill] sm:$0xff]  ;;  %v6940_v39 = vld [vmem:[#allocation67_spill] sm:$0xff] }
 0x264   : > { %2934 = vrot.lane.b32.xlu1 %v2929_v15, %s3905_s14  ;;  %2932 = vrot.lane.b32.xlu0 %v2928_v11, %s3905_s14  ;;  %v1729_v41 = vadd.f32 %v6935_v19, %v1715_v18  ;;  %v1953_v15 = vadd.f32 %v6936_v50, %v1939_v56  ;;  %v6937_v11 = vld [vmem:[#allocation66_spill] sm:$0xff]  ;;  %v2191_v40 = vadd.f32 %v5987_v5, %v2177_v29  ;;  %v3029_v1 = vstv %s6319_s18  ;;  %v6941_v61 = vld [vmem:[#allocation68_spill] sm:$0xff]  ;;  %v6945_v50 = vld [vmem:[#allocation69_spill] sm:$0xff]  ;;  %s3579_s18 = sld [smem:[#allocation8 + $0xa2]] }
 0x265   : > { %v1952_v9 = vadd.f32 %v6937_v11, %v1938_v28  ;;  %v2190_v46 = vadd.f32 %v6938_v44, %v2176_v35  ;;  %v1728_v36 = vadd.f32 %v6939_v32, %v1714_v6  ;;  %v2997_v59 = vmul.f32 %v2995_v55, %v6243_v60  ;;  %v6946_v11 = vld [vmem:[#allocation70_spill] sm:$0xff] }
 0x266   : > { %v2425_v63 = vpop.permute.xlu1 %2424  ;;  %v2423_v22 = vpop.permute.xlu0 %2422  ;;  %v2996_v24 = vmul.f32 %v2995_v55, %v6246_v58  ;;  %v1967_v5 = vadd.f32 %v6940_v39, %v1953_v15  ;;  %v2205_v56 = vadd.f32 %v6018_v51, %v2191_v40  ;;  %v2243_v14 = vmul.f32 %v2241_v8, %v5207_v7 }
 0x267   : > { %v2429_v23 = vadd.f32 %v2425_v63, %v2415_v43  ;;  %v2428_v31 = vadd.f32 %v2423_v22, %v2414_v0  ;;  %v1966_v48 = vadd.f32 %v6941_v61, %v1952_v9  ;;  %v2204_v28 = vadd.f32 %v6942_v49, %v2190_v46  ;;  %v6944_v43 = vld [vmem:[#allocation106_spill] sm:$0xff] }
 0x268   : > { %2968 = vrot.lane.b32.xlu1 %v2963_v3, %s3905_s14  ;;  %2966 = vrot.lane.b32.xlu0 %v2962_v27, %s3905_s14  ;;  %v6943_v3 = vld [vmem:[#allocation105_spill] sm:$0xff]  ;;  %v2479_v35 = vstv %s6337_s13  ;;  %v1972_v0 = vadd.f32 %v6944_v43, %v1728_v36  ;;  %v3031_v51 = vmul.f32 %v3029_v1, %v6243_v60  ;;  %v3030_v7 = vmul.f32 %v3029_v1, %v6246_v58  ;;  %v6950_v43 = vld [vmem:[#allocation16_spill] sm:$0xff]  ;;  %s3585_s13 = sld [smem:[#allocation8 + $0x15]] }
 0x269   : > { %v1973_v27 = vadd.f32 %v6943_v3, %v1729_v41  ;;  %v3063_v2 = vstv %s6346_s12  ;;  %v2211_v30 = vadd.f32 %v6278_v20, %v1967_v5  ;;  %v2210_v6 = vadd.f32 %v2208_v4, %v1966_v48  ;;  %s3588_s12 = sld [smem:[#allocation8 + $0x2d]] }
 0x26a   : > { %v2439_v57 = vpop.permute.xlu1 %2438  ;;  %v2437_v18 = vpop.permute.xlu0 %2436  ;;  %v2449_v19 = vadd.f32 %v2447_v25, %v2205_v56  ;;  %v2448_v41 = vadd.f32 %v2446_v16, %v2204_v28  ;;  %v1986_v9 = vadd.f32 %v6946_v11, %v1972_v0  ;;  %v2242_v63 = vmul.f32 %v2241_v8, %v5209_v33 }
 0x26b   : > { %v6373_v55 = vadd.f32 %v2439_v57, %v2429_v23  ;;  %v6375_v29 = vadd.f32 %v2437_v18, %v2428_v31  ;;  %v1987_v15 = vadd.f32 %v6945_v50, %v1973_v27  ;;  %v2481_v44 = vmul.f32 %v2479_v35, %v5489_v62  ;;  %v6947_v31 = vld [vmem:[#allocation73_spill] sm:$0xff]  ;;  %v6952_v50 = vld [vmem:[#allocation44_spill] sm:$0xff] }
 0x26c   : > { %3002 = vrot.lane.b32.xlu1 %v2997_v59, %s3905_s14  ;;  %3000 = vrot.lane.b32.xlu0 %v2996_v24, %s3905_s14  ;;  %v2225_v46 = vadd.f32 %v6053_v21, %v2211_v30  ;;  %v2224_v23 = vadd.f32 %v6055_v10, %v2210_v6  ;;  %v3065_v25 = vmul.f32 %v3063_v2, %v6243_v60  ;;  %v3097_v8 = vstv %s6363_s17  ;;  %v6948_v21 = vld [vmem:[#allocation74_spill] sm:$0xff]  ;;  %v6949_v59 = vld [vmem:[#allocation17_spill] sm:$0xff]  ;;  %s3591_s17 = sld [smem:[#allocation8 + $0x45]] }
 0x26d   : > { %v3064_v16 = vmul.f32 %v3063_v2, %v6246_v58  ;;  %v2480_v33 = vmul.f32 %v2479_v35, %v5491_v53  ;;  %v2001_v32 = vadd.f32 %v6947_v31, %v1987_v15  ;;  %v2000_v36 = vadd.f32 %v6948_v21, %v1986_v9 }
 0x26e   : > { %v2459_v22 = vpop.permute.xlu1 %2458  ;;  %v2457_v40 = vpop.permute.xlu0 %2456  ;;  %v2239_v10 = vadd.f32 %v6089_v34, %v2225_v46  ;;  %v2238_v24 = vadd.f32 %v6949_v59, %v2224_v23  ;;  %v3099_v48 = vmul.f32 %v3097_v8, %v6243_v60  ;;  %v3098_v56 = vmul.f32 %v3097_v8, %v6246_v58 }
 0x26f   : > { %v2463_v20 = vadd.f32 %v2459_v22, %v2449_v19  ;;  %v2462_v4 = vadd.f32 %v2457_v40, %v2448_v41  ;;  %v2873_v49 = vstv %s6384_s23  ;;  %v2513_v34 = vstv %s6386_s15  ;;  %s6584_s23 = sld [smem:[#allocation8 + $0x5d]] }
 0x270   : > { %3036 = vrot.lane.b32.xlu1 %v3031_v51, %s3905_s14  ;;  %3034 = vrot.lane.b32.xlu0 %v3030_v7, %s3905_s14  ;;  %v2245_v28 = vadd.f32 %v2243_v14, %v2001_v32  ;;  %v2244_v57 = vadd.f32 %v2242_v63, %v2000_v36  ;;  %v2483_v18 = vadd.f32 %v2481_v44, %v2239_v10  ;;  %v6951_v51 = vld [vmem:[#allocation43_spill] sm:$0xff]  ;;  %v2907_v9 = vstv %s6407_s16  ;;  %s6594_s15 = sld [smem:[#allocation8 + $0x75]]  ;;  %s3626_s16 = sshll.u32 %s6958_s22, 7 }
 0x271   : > { %v2482_v3 = vadd.f32 %v2480_v33, %v2238_v24  ;;  %v2875_v14 = vmul.f32 %v2873_v49, %v6243_v60  ;;  %v2874_v6 = vmul.f32 %v2873_v49, %v6246_v58  ;;  %v2515_v19 = vmul.f32 %v2513_v34, %v5489_v62 }
 0x272   : > { %v2473_v1 = vpop.permute.xlu1 %2472  ;;  %v2471_v39 = vpop.permute.xlu0 %2470  ;;  %v2259_v0 = vadd.f32 %v6950_v43, %v2245_v28  ;;  %v2258_v7 = vadd.f32 %v6951_v51, %v2244_v57  ;;  %v2514_v11 = vmul.f32 %v2513_v34, %v5491_v53  ;;  %v2908_v46 = vmul.f32 %v2907_v9, %v6246_v58 }
 0x273   : > { %v6409_v5 = vadd.f32 %v2473_v1, %v2463_v20  ;;  %v6411_v61 = vadd.f32 %v2471_v39, %v2462_v4  ;;  %v2941_v4 = vstv %s6419_s21  ;;  %v2547_v33 = vstv %s6421_s24  ;;  %s6603_s21 = sld [smem:[#allocation8 + $0xba]]  ;;  %s6608_s24 = sld [smem:[#allocation8 + $0x8d]] }
 0x274   : > { %3070 = vrot.lane.b32.xlu1 %v3065_v25, %s3905_s14  ;;  %3068 = vrot.lane.b32.xlu0 %v3064_v16, %s3905_s14  ;;  %v2273_v41 = vadd.f32 %v6145_v13, %v2259_v0  ;;  %v2272_v15 = vadd.f32 %v6952_v50, %v2258_v7  ;;  %v2909_v13 = vmul.f32 %v2907_v9, %v6243_v60  ;;  %v2975_v59 = vstv %s6434_s25  ;;  %s6612_s25 = sld [smem:[#allocation8 + $0xa5]] }
 0x275   : > { %v2943_v32 = vmul.f32 %v2941_v4, %v6243_v60  ;;  %v2942_v21 = vmul.f32 %v2941_v4, %v6246_v58  ;;  %v2549_v36 = vmul.f32 %v2547_v33, %v5489_v62  ;;  %v2548_v10 = vmul.f32 %v2547_v33, %v5491_v53 }
 0x276   : > { %v2493_v27 = vpop.permute.xlu1 %2492  ;;  %v2491_v35 = vpop.permute.xlu0 %2490  ;;  %v2517_v23 = vadd.f32 %v2515_v19, %v2273_v41  ;;  %v2516_v20 = vadd.f32 %v2514_v11, %v2272_v15  ;;  %v2976_v62 = vmul.f32 %v2975_v59, %v6246_v58  ;;  %v3043_v0 = vstv %s6457_s28  ;;  %s6628_s28 = sld [smem:[#allocation8 + $0xbd]] }
 0x277   : > { %v2497_v2 = vadd.f32 %v2493_v27, %v2483_v18  ;;  %v2496_v30 = vadd.f32 %v2491_v35, %v2482_v3  ;;  %v2551_v53 = vadd.f32 %v2549_v36, %v6192_v12  ;;  %v2550_v49 = vadd.f32 %v2548_v10, %v6194_v26 }
 0x278   : > { %3104 = vrot.lane.b32.xlu1 %v3099_v48, %s3905_s14  ;;  %3102 = vrot.lane.b32.xlu0 %v3098_v56, %s3905_s14  ;;  %s6445_s14 = sld [smem:[#allocation8 + $0x77]]  ;;  %v2977_v56 = vmul.f32 %v2975_v59, %v6243_v60  ;;  %v2581_v18 = vstv %s6448_s26  ;;  %v3077_v50 = vstv %s6470_s30  ;;  %s6617_s26 = scalar_lea.vmem %s6716_s5, %s3626_s16 }
 0x279   : > { %v2583_v26 = vmul.f32 %v2581_v18, %v5764_v45  ;;  %v2582_v43 = vmul.f32 %v2581_v18, %v5766_v47  ;;  %v2615_v9 = vstv %s6473_s7  ;;  %v2649_v10 = vstv %s3567_s9 }
 0x27a   : > { %v2507_v63 = vpop.permute.xlu1 %2506  ;;  %v2505_v22 = vpop.permute.xlu0 %2504  ;;  %v2683_v18 = vstv %s3570_s10 }
 0x27b   : > { %v6436_v40 = vadd.f32 %v2507_v63, %v2497_v2  ;;  %v6438_v44 = vadd.f32 %v2505_v22, %v2496_v30  ;;  %v2585_v19 = vadd.f32 %v2583_v26, %v6235_v37  ;;  %v2584_v41 = vadd.f32 %v2582_v43, %v6237_v54 }
 0x27c   : > { %2880 = vrot.lane.b32.xlu1 %v2875_v14, %s3904_s27  ;;  %2878 = vrot.lane.b32.xlu0 %v2874_v6, %s3904_s27  ;;  %v3045_v14 = vmul.f32 %v3043_v0, %v6243_v60  ;;  %v3044_v6 = vmul.f32 %v3043_v0, %v6246_v58  ;;  %v2616_v37 = vmul.f32 %v2615_v9, %v5766_v47  ;;  %v3111_v54 = vstv %s6482_s8 }
 0x27d   : > { %v3113_v33 = vmul.f32 %v3111_v54, %v6243_v60 }
 0x27e   : > { %v2527_v25 = vpop.permute.xlu1 %2526  ;;  %v2525_v16 = vpop.permute.xlu0 %2524  ;;  %v3009_v34 = vstv %s6445_s14 }
 0x27f   : > { %v2531_v8 = vadd.f32 %v2527_v25, %v2517_v23  ;;  %v2530_v31 = vadd.f32 %v2525_v16, %v2516_v20  ;;  %v3011_v35 = vmul.f32 %v3009_v34, %v6243_v60  ;;  %v3010_v12 = vmul.f32 %v3009_v34, %v6246_v58 }
 0x280   : > { %2914 = vrot.lane.b32.xlu1 %v2909_v13, %s3904_s27  ;;  %2912 = vrot.lane.b32.xlu0 %v2908_v46, %s3904_s27  ;;  %v3079_v13 = vmul.f32 %v3077_v50, %v6243_v60  ;;  %v3078_v46 = vmul.f32 %v3077_v50, %v6246_v58  ;;  %v2617_v23 = vmul.f32 %v2615_v9, %v5764_v45 }
 0x282   : > { %v2541_v24 = vpop.permute.xlu1 %2540  ;;  %v2539_v1 = vpop.permute.xlu0 %2538 }
 0x283   : > { %v6459_v39 = vadd.f32 %v2541_v24, %v2531_v8  ;;  %v6461_v48 = vadd.f32 %v2539_v1, %v2530_v31  ;;  %v3112_v8 = vmul.f32 %v3111_v54, %v6246_v58  ;;  %v2619_v31 = vadd.f32 %v2617_v23, %v6289_v52 }
 0x284   : > { %2948 = vrot.lane.b32.xlu1 %v2943_v32, %s3904_s27  ;;  %2946 = vrot.lane.b32.xlu0 %v2942_v21, %s3904_s27  ;;  %v2618_v32 = vadd.f32 %v2616_v37, %v6291_v17  ;;  %v2651_v1 = vmul.f32 %v2649_v10, %v5764_v45 }
 0x286   : > { %v2561_v28 = vpop.permute.xlu1 %2560  ;;  %v2559_v57 = vpop.permute.xlu0 %2558  ;;  %v2653_v17 = vadd.f32 %v2651_v1, %v6333_v38 }
 0x287   : > { %v2565_v3 = vadd.f32 %v2561_v28, %v2551_v53  ;;  %v2564_v27 = vadd.f32 %v2559_v57, %v2550_v49 }
 0x288   : > { %2982 = vrot.lane.b32.xlu1 %v2977_v56, %s3904_s27  ;;  %2980 = vrot.lane.b32.xlu0 %v2976_v62, %s3904_s27  ;;  %v2650_v56 = vmul.f32 %v2649_v10, %v5766_v47  ;;  %v2785_v10 = vstv %s3579_s18 }
 0x289   : > { %v2787_v1 = vmul.f32 %v2785_v10, %v5764_v45 }
 0x28a   : > { %v2575_v51 = vpop.permute.xlu1 %2574  ;;  %v2573_v7 = vpop.permute.xlu0 %2572  ;;  %v2652_v34 = vadd.f32 %v2650_v56, %v6335_v42  ;;  %v2786_v56 = vmul.f32 %v2785_v10, %v5766_v47 }
 0x28b   : > { %v6484_v2 = vadd.f32 %v2575_v51, %v2565_v3  ;;  %v6486_v30 = vadd.f32 %v2573_v7, %v2564_v27 }
 0x28c   : > { %3016 = vrot.lane.b32.xlu1 %v3011_v35, %s3904_s27  ;;  %3014 = vrot.lane.b32.xlu0 %v3010_v12, %s3904_s27  ;;  %v2685_v35 = vmul.f32 %v2683_v18, %v5764_v45  ;;  %v2684_v12 = vmul.f32 %v2683_v18, %v5766_v47 }
 0x28e   : > { %v2595_v15 = vpop.permute.xlu1 %2594  ;;  %v2593_v11 = vpop.permute.xlu0 %2592  ;;  %v2687_v38 = vadd.f32 %v2685_v35, %v6373_v55  ;;  %v2686_v42 = vadd.f32 %v2684_v12, %v6375_v29 }
 0x28f   : > { %v2599_v63 = vadd.f32 %v2595_v15, %v2585_v19  ;;  %v2598_v22 = vadd.f32 %v2593_v11, %v2584_v41 }
 0x290   : > { %3050 = vrot.lane.b32.xlu1 %v3045_v14, %s3904_s27  ;;  %3048 = vrot.lane.b32.xlu0 %v3044_v6, %s3904_s27  ;;  %v2717_v6 = vstv %s3573_s11 }
 0x291   : > { %v2719_v50 = vmul.f32 %v2717_v6, %v5764_v45  ;;  %v2718_v15 = vmul.f32 %v2717_v6, %v5766_v47 }
 0x292   : > { %v2609_v20 = vpop.permute.xlu1 %2608  ;;  %v2607_v4 = vpop.permute.xlu0 %2606 }
 0x293   : > { %v6503_v25 = vadd.f32 %v2609_v20, %v2599_v63  ;;  %v6505_v16 = vadd.f32 %v2607_v4, %v2598_v22  ;;  %v2721_v55 = vadd.f32 %v2719_v50, %v6409_v5  ;;  %v2720_v29 = vadd.f32 %v2718_v15, %v6411_v61 }
 0x294   : > { %3084 = vrot.lane.b32.xlu1 %v3079_v13, %s3904_s27  ;;  %3082 = vrot.lane.b32.xlu0 %v3078_v46, %s3904_s27 }
 0x296   : > { %v2629_v21 = vpop.permute.xlu1 %2628  ;;  %v2627_v36 = vpop.permute.xlu0 %2626 }
 0x297   : > { %v2633_v59 = vadd.f32 %v2629_v21, %v2619_v31  ;;  %v2632_v24 = vadd.f32 %v2627_v36, %v2618_v32 }
 0x298   : > { %3118 = vrot.lane.b32.xlu1 %v3113_v33, %s3904_s27  ;;  %3116 = vrot.lane.b32.xlu0 %v3112_v8, %s3904_s27  ;;  %s3576_s27 = sld [smem:[#allocation8 + $0x8a]] }
 0x29a   : > { %v2643_v62 = vpop.permute.xlu1 %2642  ;;  %v2641_v53 = vpop.permute.xlu0 %2640 }
 0x29b   : > { %v6517_v49 = vadd.f32 %v2643_v62, %v2633_v59  ;;  %v6519_v52 = vadd.f32 %v2641_v53, %v2632_v24 }
 0x29e   : > { %v2663_v28 = vpop.permute.xlu1 %2662  ;;  %v2661_v57 = vpop.permute.xlu0 %2660  ;;  %v2751_v23 = vstv %s3576_s27 }
 0x29f   : > { %v2667_v3 = vadd.f32 %v2663_v28, %v2653_v17  ;;  %v2666_v27 = vadd.f32 %v2661_v57, %v2652_v34  ;;  %v2753_v20 = vmul.f32 %v2751_v23, %v5764_v45  ;;  %v2752_v4 = vmul.f32 %v2751_v23, %v5766_v47 }
 0x2a0   : > { %v2789_v28 = vadd.f32 %v2787_v1, %v6459_v39 }
 0x2a1   : > { %v2755_v5 = vadd.f32 %v2753_v20, %v6436_v40  ;;  %v2754_v61 = vadd.f32 %v2752_v4, %v6438_v44  ;;  %v2788_v40 = vadd.f32 %v2786_v56, %v6461_v48 }
 0x2a2   : > { %v2677_v26 = vpop.permute.xlu1 %2676  ;;  %v2675_v43 = vpop.permute.xlu0 %2674 }
 0x2a3   : > { %v6525_v0 = vadd.f32 %v2677_v26, %v2667_v3  ;;  %v6527_v51 = vadd.f32 %v2675_v43, %v2666_v27 }
 0x2a6   : > { %v2697_v7 = vpop.permute.xlu1 %2696  ;;  %v2695_v14 = vpop.permute.xlu0 %2694 }
 0x2a7   : > { %v2701_v19 = vadd.f32 %v2697_v7, %v2687_v38  ;;  %v2700_v41 = vadd.f32 %v2695_v14, %v2686_v42 }
 0x2aa   : > { %v2711_v11 = vpop.permute.xlu1 %2710  ;;  %v2709_v9 = vpop.permute.xlu0 %2708 }
 0x2ab   : > { %v6533_v63 = vadd.f32 %v2711_v11, %v2701_v19  ;;  %v6535_v22 = vadd.f32 %v2709_v9, %v2700_v41 }
 0x2ae   : > { %v2731_v13 = vpop.permute.xlu1 %2730  ;;  %v2729_v46 = vpop.permute.xlu0 %2728 }
 0x2af   : > { %v2735_v37 = vadd.f32 %v2731_v13, %v2721_v55  ;;  %v2734_v54 = vadd.f32 %v2729_v46, %v2720_v29  ;;  %v2853_v55 = vstv %s3585_s13 }
 0x2b0   : > { %v2855_v46 = vmul.f32 %v2853_v55, %v6243_v60  ;;  %v2854_v23 = vmul.f32 %v2853_v55, %v6246_v58 }
 0x2b2   : > { %v2745_v33 = vpop.permute.xlu1 %2744  ;;  %v2743_v8 = vpop.permute.xlu0 %2742 }
 0x2b3   : > { %v6541_v31 = vadd.f32 %v2745_v33, %v2735_v37  ;;  %v6543_v32 = vadd.f32 %v2743_v8, %v2734_v54  ;;  %v2887_v37 = vstv %s3588_s12  ;;  %v2857_v33 = vadd.f32 %v2855_v46, %v6503_v25 }
 0x2b4   : > { %v2889_v54 = vmul.f32 %v2887_v37, %v6243_v60  ;;  %v2856_v8 = vadd.f32 %v2854_v23, %v6505_v16 }
 0x2b6   : > { %v2765_v21 = vpop.permute.xlu1 %2764  ;;  %v2763_v36 = vpop.permute.xlu0 %2762  ;;  %v2891_v16 = vadd.f32 %v2889_v54, %v6517_v49 }
 0x2b7   : > { %v2769_v59 = vadd.f32 %v2765_v21, %v2755_v5  ;;  %v2768_v24 = vadd.f32 %v2763_v36, %v2754_v61  ;;  %v2888_v5 = vmul.f32 %v2887_v37, %v6246_v58  ;;  %v2921_v61 = vstv %s3591_s17 }
 0x2b8   : > { %v2923_v10 = vmul.f32 %v2921_v61, %v6243_v60 }
 0x2b9   : > { %v2890_v56 = vadd.f32 %v2888_v5, %v6519_v52  ;;  %v2819_v5 = vstv %s6603_s21 }
 0x2ba   : > { %v2779_v62 = vpop.permute.xlu1 %2778  ;;  %v2777_v53 = vpop.permute.xlu0 %2776  ;;  %v2925_v46 = vadd.f32 %v2923_v10, %v6525_v0 }
 0x2bb   : > { %v6549_v17 = vadd.f32 %v2779_v62, %v2769_v59  ;;  %v6551_v34 = vadd.f32 %v2777_v53, %v2768_v24  ;;  %v2922_v59 = vmul.f32 %v2921_v61, %v6246_v58  ;;  %v2955_v24 = vstv %s6584_s23 }
 0x2bc   : > { %v2957_v49 = vmul.f32 %v2955_v24, %v6243_v60  ;;  %v2956_v52 = vmul.f32 %v2955_v24, %v6246_v58  ;;  %v3023_v61 = vstv %s6608_s24  ;;  %v3057_v24 = vstv %s6612_s25 }
 0x2bd   : > { %v2924_v23 = vadd.f32 %v2922_v59, %v6527_v51 }
 0x2be   : > { %v2799_v44 = vpop.permute.xlu1 %2798  ;;  %v2797_v57 = vpop.permute.xlu0 %2796  ;;  %v2959_v10 = vadd.f32 %v2957_v49, %v6533_v63  ;;  %v2958_v59 = vadd.f32 %v2956_v52, %v6535_v22  ;;  %v2821_v63 = vmul.f32 %v2819_v5, %v5764_v45  ;;  %v2820_v22 = vmul.f32 %v2819_v5, %v5766_v47 }
 0x2bf   : > { %v6555_v18 = vadd.f32 %v2799_v44, %v2789_v28  ;;  %v6557_v3 = vadd.f32 %v2797_v57, %v2788_v40  ;;  %v3059_v45 = vmul.f32 %v3057_v24, %v6243_v60  ;;  %v3058_v47 = vmul.f32 %v3057_v24, %v6246_v58 }
 0x2c0   : > { %v3091_v49 = vstv %s6628_s28 }
 0x2c2   : > { %v6559_v27 = vpop.permute.xlu1 %2812  ;;  %v6561_v35 = vpop.permute.xlu0 %2810 }
 0x2c6   : > { %v6563_v12 = vpop.permute.xlu1 %2832  ;;  %v6565_v26 = vpop.permute.xlu0 %2830 }
 0x2ca   : > { %v6567_v43 = vpop.permute.xlu1 %2846  ;;  %v6569_v38 = vpop.permute.xlu0 %2844 }
 0x2ce   : > { %v2867_v39 = vpop.permute.xlu1 %2866  ;;  %v2865_v48 = vpop.permute.xlu0 %2864 }
 0x2cf   : > { %v2871_v21 = vadd.f32 %v2867_v39, %v2857_v33  ;;  %v2870_v36 = vadd.f32 %v2865_v48, %v2856_v8  ;;  %v2989_v39 = vstv %s6594_s15 }
 0x2d0   : > { %v2991_v0 = vmul.f32 %v2989_v39, %v6243_v60  ;;  %v2990_v51 = vmul.f32 %v2989_v39, %v6246_v58 }
 0x2d2   : > { %v2901_v42 = vpop.permute.xlu1 %2900  ;;  %v2899_v7 = vpop.permute.xlu0 %2898 }
 0x2d3   : > { %v2905_v28 = vadd.f32 %v2901_v42, %v2891_v16  ;;  %v2904_v40 = vadd.f32 %v2899_v7, %v2890_v56 }
 0x2d6   : > { %v2935_v14 = vpop.permute.xlu1 %2934  ;;  %v2933_v6 = vpop.permute.xlu0 %2932 }
 0x2d7   : > { %v2939_v37 = vadd.f32 %v2935_v14, %v2925_v46  ;;  %v2938_v54 = vadd.f32 %v2933_v6, %v2924_v23  ;;  %v2823_v46 = vadd.f32 %v2821_v63, %v6484_v2  ;;  %v2822_v23 = vadd.f32 %v2820_v22, %v6486_v30 }
 0x2d9   : > { %v2836_v2 = vadd.f32 %v6565_v26, %v2822_v23 }
 0x2da   : > { %v6571_v19 = vpop.permute.xlu1 %2968  ;;  %v6573_v41 = vpop.permute.xlu0 %2966 }
 0x2db   : > { %v2850_v26 = vadd.f32 %v6569_v38, %v2836_v2 }
 0x2de   : > { %v6575_v50 = vpop.permute.xlu1 %3002  ;;  %v6577_v15 = vpop.permute.xlu0 %3000 }
 0x2e2   : > { %v6579_v11 = vpop.permute.xlu1 %3036  ;;  %v6581_v9 = vpop.permute.xlu0 %3034 }
 0x2e6   : > { %v6586_v29 = vpop.permute.xlu1 %3070  ;;  %v6588_v13 = vpop.permute.xlu0 %3068 }
 0x2ea   : > { %v6596_v20 = vpop.permute.xlu1 %3104  ;;  %v6598_v4 = vpop.permute.xlu0 %3102 }
 0x2ee   : > { %v2881_v1 = vpop.permute.xlu1 %2880  ;;  %v2879_v25 = vpop.permute.xlu0 %2878 }
 0x2ef   : > { %v2885_v62 = vadd.f32 %v2881_v1, %v2871_v21  ;;  %v2884_v53 = vadd.f32 %v2879_v25, %v2870_v36  ;;  %v2973_v1 = vadd.f32 %v6571_v19, %v2959_v10  ;;  %v2972_v25 = vadd.f32 %v6573_v41, %v2958_v59 }
 0x2f1   : > { %v3125_v44 = vmax.f32 %v2885_v62, 0.0  ;;  %v3124_v57 = vmax.f32 %v2884_v53, 0.0  ;;  %v3025_v62 = vmul.f32 %v3023_v61, %v6243_v60  ;;  %v3024_v53 = vmul.f32 %v3023_v61, %v6246_v58 }
 0x2f2   : > { %v2915_v48 = vpop.permute.xlu1 %2914  ;;  %v2913_v55 = vpop.permute.xlu0 %2912 }
 0x2f3   : > { %3129 = vst.msk [vmem:[%s6617_s26 + $0x8] sm:$0x3f] %vm3128_vm0, %v3125_v44  ;;  %v2919_v42 = vadd.f32 %v2915_v48, %v2905_v28  ;;  %v2918_v7 = vadd.f32 %v2913_v55, %v2904_v40  ;;  %v2993_v44 = vadd.f32 %v2991_v0, %v6541_v31  ;;  %v2816_v55 = vadd.f32 %v6561_v35, %v6557_v3 }
 0x2f4   : > { %3127 = vst.msk [vmem:[%s6617_s26] sm:$0xff] %vm3126_vm1, %v3124_v57  ;;  %v2992_v57 = vadd.f32 %v2990_v51, %v6543_v32  ;;  %v2817_v32 = vadd.f32 %v6559_v27, %v6555_v18  ;;  %v2837_v3 = vadd.f32 %v6563_v12, %v2823_v46 }
 0x2f5   : > { %v3131_v33 = vmax.f32 %v2919_v42, 0.0  ;;  %v3130_v8 = vmax.f32 %v2918_v7, 0.0  ;;  %v3007_v52 = vadd.f32 %v6575_v50, %v2993_v44  ;;  %v3026_v50 = vadd.f32 %v3024_v53, %v6551_v34 }
 0x2f6   : > { %v2949_v21 = vpop.permute.xlu1 %2948  ;;  %v2947_v36 = vpop.permute.xlu0 %2946  ;;  %v3006_v39 = vadd.f32 %v6577_v15, %v2992_v57  ;;  %v3060_v34 = vadd.f32 %v3058_v47, %v2816_v55  ;;  %v2851_v12 = vadd.f32 %v6567_v43, %v2837_v3 }
 0x2f7   : > { %3610 = vst.msk [vmem:[%s6617_s26 + $0x18] sm:$0x3f] %vm3128_vm0, %v3131_v33  ;;  %v2953_v14 = vadd.f32 %v2949_v21, %v2939_v37  ;;  %v2952_v6 = vadd.f32 %v2947_v36, %v2938_v54  ;;  %v3027_v37 = vadd.f32 %v3025_v62, %v6549_v17  ;;  %v3040_v27 = vadd.f32 %v6581_v9, %v3026_v50 }
 0x2f8   : > { %3609 = vst.msk [vmem:[%s6617_s26 + $0x10] sm:$0xff] %vm3126_vm1, %v3130_v8  ;;  %v3061_v54 = vadd.f32 %v3059_v45, %v2817_v32  ;;  %v3093_v33 = vmul.f32 %v3091_v49, %v6243_v60  ;;  %v3092_v8 = vmul.f32 %v3091_v49, %v6246_v58  ;;  %v3074_v60 = vadd.f32 %v6588_v13, %v3060_v34 }
 0x2f9   : > { %v3136_v16 = vmax.f32 %v2953_v14, 0.0  ;;  %v3135_v56 = vmax.f32 %v2952_v6, 0.0  ;;  %v3041_v30 = vadd.f32 %v6579_v11, %v3027_v37 }
 0x2fa   : > { %v2983_v28 = vpop.permute.xlu1 %2982  ;;  %v2981_v40 = vpop.permute.xlu0 %2980  ;;  %v3075_v51 = vadd.f32 %v6586_v29, %v3061_v54  ;;  %v3095_v10 = vadd.f32 %v3093_v33, %v2851_v12  ;;  %v3094_v43 = vadd.f32 %v3092_v8, %v2850_v26 }
 0x2fb   : > { %3612 = vst.msk [vmem:[%s6617_s26 + $0x28] sm:$0x3f] %vm3128_vm0, %v3136_v16  ;;  %v2987_v19 = vadd.f32 %v2983_v28, %v2973_v1  ;;  %v2986_v41 = vadd.f32 %v2981_v40, %v2972_v25 }
 0x2fc   : > { %3611 = vst.msk [vmem:[%s6617_s26 + $0x20] sm:$0xff] %vm3126_vm1, %v3135_v56  ;;  %v3109_v29 = vadd.f32 %v6596_v20, %v3095_v10  ;;  %v3108_v13 = vadd.f32 %v6598_v4, %v3094_v43 }
 0x2fd   : > { %v3141_v31 = vmax.f32 %v2987_v19, 0.0  ;;  %v3140_v48 = vmax.f32 %v2986_v41, 0.0 }
 0x2fe   : > { %v3017_v42 = vpop.permute.xlu1 %3016  ;;  %v3015_v7 = vpop.permute.xlu0 %3014 }
 0x2ff   : > { %3614 = vst.msk [vmem:[%s6617_s26 + $0x38] sm:$0x3f] %vm3128_vm0, %v3141_v31  ;;  %v3021_v15 = vadd.f32 %v3017_v42, %v3007_v52  ;;  %v3020_v18 = vadd.f32 %v3015_v7, %v3006_v39 }
 0x300   : > { %3613 = vst.msk [vmem:[%s6617_s26 + $0x30] sm:$0xff] %vm3126_vm1, %v3140_v48 }
 0x301   : > { %v3146_v35 = vmax.f32 %v3021_v15, 0.0  ;;  %v3145_v17 = vmax.f32 %v3020_v18, 0.0 }
 0x302   : > { %v3051_v5 = vpop.permute.xlu1 %3050  ;;  %v3049_v0 = vpop.permute.xlu0 %3048 }
 0x303   : > { %3616 = vst.msk [vmem:[%s6617_s26 + $0x48] sm:$0x3f] %vm3128_vm0, %v3146_v35  ;;  %v3055_v11 = vadd.f32 %v3051_v5, %v3041_v30  ;;  %v3054_v9 = vadd.f32 %v3049_v0, %v3040_v27 }
 0x304   : > { %3615 = vst.msk [vmem:[%s6617_s26 + $0x40] sm:$0xff] %vm3126_vm1, %v3145_v17 }
 0x305   : > { %v3151_v61 = vmax.f32 %v3055_v11, 0.0  ;;  %v3150_v58 = vmax.f32 %v3054_v9, 0.0 }
 0x306   : > { %v3085_v21 = vpop.permute.xlu1 %3084  ;;  %v3083_v36 = vpop.permute.xlu0 %3082 }
 0x307   : > { %3618 = vst.msk [vmem:[%s6617_s26 + $0x58] sm:$0x3f] %vm3128_vm0, %v3151_v61  ;;  %v3089_v38 = vadd.f32 %v3085_v21, %v3075_v51  ;;  %v3088_v59 = vadd.f32 %v3083_v36, %v3074_v60 }
 0x308   : > { %3617 = vst.msk [vmem:[%s6617_s26 + $0x50] sm:$0xff] %vm3126_vm1, %v3150_v58 }
 0x309   : > { %v3156_v14 = vmax.f32 %v3089_v38, 0.0  ;;  %v3155_v6 = vmax.f32 %v3088_v59, 0.0 }
 0x30a   : > { %v3119_v24 = vpop.permute.xlu1 %3118  ;;  %v3117_v1 = vpop.permute.xlu0 %3116 }
 0x30b   : > { %3620 = vst.msk [vmem:[%s6617_s26 + $0x68] sm:$0x3f] %vm3128_vm0, %v3156_v14  ;;  %v3123_v25 = vadd.f32 %v3119_v24, %v3109_v29  ;;  %v3122_v16 = vadd.f32 %v3117_v1, %v3108_v13 }
 0x30c   : > { %3619 = vst.msk [vmem:[%s6617_s26 + $0x60] sm:$0xff] %vm3126_vm1, %v3155_v6 }
 0x30d   : > { %v3161_v56 = vmax.f32 %v3123_v25, 0.0  ;;  %v3160_v63 = vmax.f32 %v3122_v16, 0.0 }
 0x30f   : > { %3622 = vst.msk [vmem:[%s6617_s26 + $0x78] sm:$0x3f] %vm3128_vm0, %v3161_v56 }
 0x310   : > { %3621 = vst.msk [vmem:[%s6617_s26 + $0x70] sm:$0xff] %vm3126_vm1, %v3160_v63 }
 0x311 PF: > { %p18_p4 = scmp.ge.s32.totalorder %s4025_s29, 4   ;;  %s6953_s18 = smov %s3887_s19 }
 0x312   : > { %s6954_s19 = smov %s3891_s20  ;;  %s6955_s20 = smov %s4034_s6 }
 0x313   : > { %s6956_s21 = smov %s4025_s29  ;;  %20 = sbr.rel (!%p18_p4) target bundleno = 6 (0x6), region = 107 }
 0x31a   :  { %3186 = vsyncpa [#allocation3], 1 }
 0x31b   :  { %3188 = vsyncpa [#allocation3 + $0x1], 1 }
 0x31c   :  { %3189 = vsyncpa [#allocation4], 1 }
 0x31d   :  { %3191 = vsyncpa [#allocation4 + $0x1], 1 }
 0x31e   :  { %3192 = vsyncpa [#allocation7], 1 }
 0x31f   :  { %3193 = vsyncpa [#allocation10], 1 }

</bundles_post_ra>
